<compile_context>
chip_gen: v6e
topology: v6e:2x2x1
jax: 0.10.0
libtpu: 0.0.40
codegen_flags: <defaults>
</compile_context>

<pallas_src>
import functools

import jax
import jax.numpy as jnp
from jax.experimental import pallas as pl
from jax.experimental.pallas import tpu as pltpu

LN_EPS = 1e-6                    # ConvNeXt-style LayerNorm eps
MATMUL_DTYPE = jnp.bfloat16      # MXU operand dtype; accumulation is always f32
TOKEN_TILE = 512                 # row tile target: mult. of 256 (v6e/v7x) / 128 (v5e)


def _row_tile(M):
    """Largest legal row tile <= TOKEN_TILE ((8,128) rule: mult of 8 or == M)."""
    if M <= TOKEN_TILE:
        return M                 # full-dim block is always legal
    return TOKEN_TILE            # multiple of 8; partial last block is fine (row-wise math)


# ----------------------------------------------------------------------------
# Kernel 1: tiled matmul + bias.  Used for the stem conv (4x4/s4 patchify).
# ----------------------------------------------------------------------------
def _matmul_bias_kernel(x_ref, w_ref, b_ref, o_ref):
    x = x_ref[...].astype(MATMUL_DTYPE)
    acc = jnp.dot(x, w_ref[...], preferred_element_type=jnp.float32)
    o_ref[...] = (acc + b_ref[...]).astype(o_ref.dtype)


def matmul_bias(x, w, b):
    M, K = x.shape
    N = w.shape[1]
    tm = _row_tile(M)
    cost = pl.CostEstimate(
        flops=2 * M * K * N,
        transcendentals=0,
        bytes_accessed=M * K * x.dtype.itemsize + K * N * w.dtype.itemsize
        + M * N * x.dtype.itemsize)
    return pl.pallas_call(
        _matmul_bias_kernel,
        out_shape=jax.ShapeDtypeStruct((M, N), x.dtype),
        grid=(pl.cdiv(M, tm),),
        in_specs=[
            pl.BlockSpec((tm, K), lambda i: (i, 0)),
            pl.BlockSpec((K, N), lambda i: (0, 0)),      # weight stays resident
            pl.BlockSpec((1, N), lambda i: (0, 0)),
        ],
        out_specs=pl.BlockSpec((tm, N), lambda i: (i, 0)),
        compiler_params=pltpu.CompilerParams(dimension_semantics=("parallel",)),
        cost_estimate=cost,
    )(x, w, b.reshape(1, N))


# ----------------------------------------------------------------------------
# Kernel 2: fused downsample = LayerNorm(Cin) + Conv2d(Cin->Cout, 2x2, s2).
# The 2x2/s2 conv is expressed as 4 strided sub-slices of the input, each
# normalized in-kernel and matmul'd against its 2x2 weight sub-block.
# ----------------------------------------------------------------------------
def _downsample_kernel(xs_ref, g_ref, b_ref, ws_ref, bias_ref, o_ref):
    acc = jnp.zeros(o_ref.shape, jnp.float32)
    for p in range(4):                                   # static unroll over 2x2 taps
        xp = xs_ref[p].astype(jnp.float32)               # (TM, Cin)
        mu = jnp.mean(xp, axis=-1, keepdims=True)
        var = jnp.mean(jnp.square(xp - mu), axis=-1, keepdims=True)
        xn = (xp - mu) * jax.lax.rsqrt(var + LN_EPS)
        xn = xn * g_ref[...] + b_ref[...]
        acc = acc + jnp.dot(xn.astype(MATMUL_DTYPE), ws_ref[p],
                            preferred_element_type=jnp.float32)
    o_ref[...] = (acc + bias_ref[...]).astype(o_ref.dtype)


def downsample(x, ln_g, ln_b, ws, bias):
    N, H, W, Cin = x.shape
    Ho, Wo = H // 2, W // 2
    Cout = ws.shape[-1]
    M = N * Ho * Wo
    # 4 strided slices keep channels-last layout; no 6-D transpose of the
    # activation tensor at the stage boundary.
    parts = jnp.stack(
        [x[:, di::2, dj::2, :].reshape(M, Cin) for di in (0, 1) for dj in (0, 1)],
        axis=0)                                          # (4, M, Cin)
    tm = _row_tile(M)
    out = pl.pallas_call(
        _downsample_kernel,
        out_shape=jax.ShapeDtypeStruct((M, Cout), x.dtype),
        grid=(pl.cdiv(M, tm),),
        in_specs=[
            pl.BlockSpec((4, tm, Cin), lambda i: (0, i, 0)),
            pl.BlockSpec((1, Cin), lambda i: (0, 0)),
            pl.BlockSpec((1, Cin), lambda i: (0, 0)),
            pl.BlockSpec((4, Cin, Cout), lambda i: (0, 0, 0)),   # resident weights
            pl.BlockSpec((1, Cout), lambda i: (0, 0)),
        ],
        out_specs=pl.BlockSpec((tm, Cout), lambda i: (i, 0)),
        compiler_params=pltpu.CompilerParams(dimension_semantics=("parallel",)),
    )(parts, ln_g, ln_b, ws, bias.reshape(1, Cout))
    return out.reshape(N, Ho, Wo, Cout)


# ----------------------------------------------------------------------------
# Kernel 3: 7x7 depthwise convolution (padding 3), grid over batch.
# ----------------------------------------------------------------------------
def _dwconv_kernel(xpad_ref, w_ref, b_ref, o_ref, *, H, W, K):
    C = o_ref.shape[-1]
    acc = jnp.zeros((H, W, C), jnp.float32)
    # 49 taps: slice the *ref* per tap so each tap is an offset VMEM load that
    # overlaps with the VPU FMAs, rather than 49 relayout copies of one array.
    for i in range(K):
        for j in range(K):
            tap = xpad_ref[0, pl.ds(i, H), pl.ds(j, W), :].astype(jnp.float32)
            acc = acc + tap * w_ref[i * K + j, :]
    o_ref[0] = (acc + b_ref[0, :]).astype(o_ref.dtype)


def dwconv(x, w_kk_c, b, K=7):
    # TODO(synk): tile over H with a halo + in-kernel border masking to drop the
    # wrapper-side jnp.pad (extra HBM pass) and pipeline within a single image.
    N, H, W, C = x.shape
    P = K // 2
    xpad = jnp.pad(x, ((0, 0), (P, P), (P, P), (0, 0)))
    Hp, Wp = H + 2 * P, W + 2 * P
    kern = functools.partial(_dwconv_kernel, H=H, W=W, K=K)
    return pl.pallas_call(
        kern,
        out_shape=jax.ShapeDtypeStruct((N, H, W, C), x.dtype),
        grid=(N,),
        in_specs=[
            pl.BlockSpec((1, Hp, Wp, C), lambda n: (n, 0, 0, 0)),
            pl.BlockSpec((K * K, C), lambda n: (0, 0)),
            pl.BlockSpec((1, C), lambda n: (0, 0)),
        ],
        out_specs=pl.BlockSpec((1, H, W, C), lambda n: (n, 0, 0, 0)),
        compiler_params=pltpu.CompilerParams(dimension_semantics=("parallel",)),
    )(xpad, w_kk_c, b.reshape(1, C))


# ----------------------------------------------------------------------------
# Kernel 4: fused ConvNeXt-block MLP, tiled over tokens:
#   LayerNorm -> Linear(C,4C) -> GELU -> Linear(4C,C) -> +residual
# ----------------------------------------------------------------------------
def _block_mlp_kernel(x_ref, res_ref, g_ref, bt_ref, w1_ref, b1_ref,
                      w2_ref, b2_ref, o_ref):
    x = x_ref[...].astype(jnp.float32)
    mu = jnp.mean(x, axis=-1, keepdims=True)
    var = jnp.mean(jnp.square(x - mu), axis=-1, keepdims=True)
    xn = (x - mu) * jax.lax.rsqrt(var + LN_EPS)
    xn = xn * g_ref[...] + bt_ref[...]
    h = jnp.dot(xn.astype(MATMUL_DTYPE), w1_ref[...],
                preferred_element_type=jnp.float32) + b1_ref[...]
    # TODO(synk): PyTorch nn.GELU() default is exact erf GELU; tanh approx (EUP path) used here.
    h = jax.nn.gelu(h, approximate=True)
    y = jnp.dot(h.astype(MATMUL_DTYPE), w2_ref[...],
                preferred_element_type=jnp.float32) + b2_ref[...]
    o_ref[...] = (res_ref[...].astype(jnp.float32) + y).astype(o_ref.dtype)


def block_mlp(x2d, res2d, g, bt, w1, b1, w2, b2):
    M, C = x2d.shape
    Hh = w1.shape[1]
    tm = _row_tile(M)
    cost = pl.CostEstimate(
        flops=4 * M * C * Hh,
        transcendentals=M * Hh,
        bytes_accessed=3 * M * C * x2d.dtype.itemsize
        + 2 * C * Hh * w1.dtype.itemsize)
    return pl.pallas_call(
        _block_mlp_kernel,
        out_shape=jax.ShapeDtypeStruct((M, C), x2d.dtype),
        grid=(pl.cdiv(M, tm),),
        in_specs=[
            pl.BlockSpec((tm, C), lambda i: (i, 0)),
            pl.BlockSpec((tm, C), lambda i: (i, 0)),
            pl.BlockSpec((1, C), lambda i: (0, 0)),
            pl.BlockSpec((1, C), lambda i: (0, 0)),
            pl.BlockSpec((C, Hh), lambda i: (0, 0)),     # resident bf16 weights
            pl.BlockSpec((1, Hh), lambda i: (0, 0)),
            pl.BlockSpec((Hh, C), lambda i: (0, 0)),
            pl.BlockSpec((1, C), lambda i: (0, 0)),
        ],
        out_specs=pl.BlockSpec((tm, C), lambda i: (i, 0)),
        compiler_params=pltpu.CompilerParams(dimension_semantics=("parallel",)),
        cost_estimate=cost,
    )(x2d, res2d, g, bt, w1, b1.reshape(1, Hh), w2, b2.reshape(1, C))


# ----------------------------------------------------------------------------
# Kernel 5: classifier head: global average pool over spatial + Linear.
# ----------------------------------------------------------------------------
def _classifier_kernel(x_ref, w_ref, b_ref, o_ref):
    pooled = jnp.mean(x_ref[...].astype(jnp.float32), axis=1)       # (N, C)
    acc = jnp.dot(pooled.astype(MATMUL_DTYPE), w_ref[...],
                  preferred_element_type=jnp.float32)
    o_ref[...] = (acc + b_ref[...]).astype(o_ref.dtype)


def classifier_head(x3d, w, b):
    N, HW, C = x3d.shape
    ncls = w.shape[1]

    def _full(shape):
        nd = len(shape)
        return pl.BlockSpec(shape, lambda i, _nd=nd: (0,) * _nd)

    return pl.pallas_call(
        _classifier_kernel,
        out_shape=jax.ShapeDtypeStruct((N, ncls), x3d.dtype),
        grid=(1,),
        in_specs=[_full((N, HW, C)), _full((C, ncls)), _full((1, ncls))],
        out_specs=_full((N, ncls)),
    )(x3d, w, b.reshape(1, ncls))


# ----------------------------------------------------------------------------
# Glue: stem patchify, block/stage/model forward, parameter init.
# ----------------------------------------------------------------------------
def patch_conv_stem(x_nhwc, w_mat, b, k=4):
    """kxk conv with stride k == non-overlapping patch extraction + matmul.
    Only used for the stem (K = 4*4*3 = 48, small)."""
    N, H, W, C = x_nhwc.shape
    Ho, Wo = H // k, W // k
    patches = (x_nhwc.reshape(N, Ho, k, Wo, k, C)
               .transpose(0, 1, 3, 2, 4, 5)
               .reshape(N * Ho * Wo, k * k * C))
    out = matmul_bias(patches, w_mat, b)
    return out.reshape(N, Ho, Wo, w_mat.shape[1])


def convnext_block_forward(x, p):
    # TODO(synk): further fusion opportunity: compute dwconv + LN + MLP on one
    # VMEM tile to skip the y writeback/reload (kept separate for robustness).
    N, H, W, C = x.shape
    y = dwconv(x, p['dw_w'], p['dw_b'], K=7)
    out = block_mlp(y.reshape(N * H * W, C), x.reshape(N * H * W, C),
                    p['ln_g'], p['ln_b'], p['w1'], p['b1'], p['w2'], p['b2'])
    # stochastic depth is identity at inference time
    return out.reshape(N, H, W, C)


def convnext_forward(x_nchw, params):
    x = jnp.transpose(x_nchw, (0, 2, 3, 1))                      # NCHW -> NHWC
    x = patch_conv_stem(x, params['stem_w'], params['stem_b'], k=4)
    for stage in params['stages']:
        ds = stage['downsample']
        if ds is not None:
            x = downsample(x, ds['ln_g'], ds['ln_b'], ds['w'], ds['b'])
        for blk in stage['blocks']:
            x = convnext_block_forward(x, blk)
    N, H, W, C = x.shape
    return classifier_head(x.reshape(N, H * W, C), params['cls_w'], params['cls_b'])


def init_params(key, channel_dims, layer_numbers, n_classes):
    keys = iter(jax.random.split(key, 512))

    def nrm(shape, scale=0.02):
        return scale * jax.random.normal(next(keys), shape, jnp.float32)

    params = {}
    # stem Conv2d(3, C0, 4, 4): torch weight (C0,3,4,4) -> matmul (4*4*3, C0)
    C0 = channel_dims[0]
    w = nrm((C0, 3, 4, 4))
    params['stem_w'] = (jnp.transpose(w, (2, 3, 1, 0))
                        .reshape(4 * 4 * 3, C0).astype(MATMUL_DTYPE))
    params['stem_b'] = nrm((C0,))

    stages = []
    for si, (C, nl) in enumerate(zip(channel_dims, layer_numbers)):
        stage = {}
        if si == 0:
            stage['downsample'] = None
        else:
            Cin = channel_dims[si - 1]
            wds = nrm((C, Cin, 2, 2))                 # torch conv weight layout
            w_stack = jnp.stack(
                [jnp.transpose(wds[:, :, di, dj], (1, 0))       # (Cin, Cout)
                 for di in (0, 1) for dj in (0, 1)],
                axis=0).astype(MATMUL_DTYPE)                    # (4, Cin, Cout)
            stage['downsample'] = dict(
                ln_g=jnp.ones((1, Cin), jnp.float32),
                ln_b=jnp.zeros((1, Cin), jnp.float32),
                w=w_stack,
                b=nrm((C,)),
            )
        blocks = []
        for _ in range(nl):
            wdw = nrm((C, 1, 7, 7))                   # torch depthwise weight (C,1,7,7)
            blocks.append(dict(
                dw_w=jnp.transpose(wdw.reshape(C, 49), (1, 0)),            # (49, C)
                dw_b=nrm((C,)),
                ln_g=jnp.ones((1, C), jnp.float32),
                ln_b=jnp.zeros((1, C), jnp.float32),
                w1=jnp.transpose(nrm((4 * C, C)), (1, 0)).astype(MATMUL_DTYPE),  # (C, 4C)
                b1=nrm((4 * C,)),
                w2=jnp.transpose(nrm((C, 4 * C)), (1, 0)).astype(MATMUL_DTYPE),  # (4C, C)
                b2=nrm((C,)),
            ))
        stage['blocks'] = blocks
        stages.append(stage)
    params['stages'] = stages

    Cl = channel_dims[-1]
    params['cls_w'] = jnp.transpose(nrm((n_classes, Cl)), (1, 0)).astype(MATMUL_DTYPE)
    params['cls_b'] = nrm((n_classes,))
    return params


if __name__ == "__main__":
    channel_dims = [8, 16]
    layer_numbers = [1, 1]
    n_classes = 10

    key = jax.random.PRNGKey(0)
    pkey, xkey = jax.random.split(key)
    params = init_params(pkey, channel_dims, layer_numbers, n_classes)

    # PyTorch-style NCHW input
    x = jax.random.normal(xkey, (2, 3, 16, 16), jnp.float32)

    logits = jax.jit(lambda a: convnext_forward(a, params))(x)
    jax.block_until_ready(logits)
    assert logits.shape == (2, n_classes), logits.shape
    print("KERNEL_OK")
</pallas_src>

<mosaic_0001>
module attributes {stable_mosaic.version = 11 : i64} {
  func.func @_matmul_bias_kernel(%arg0: i32, %arg1: memref<32x48xf32, #tpu.memory_space<vmem>>, %arg2: memref<48x8xbf16, #tpu.memory_space<vmem>>, %arg3: memref<1x8xf32, #tpu.memory_space<vmem>>, %arg4: memref<32x8xf32, #tpu.memory_space<vmem>>) attributes {dimension_semantics = [#tpu.dimension_semantics<parallel>], iteration_bounds = array<i64: 1>, scalar_prefetch = 0 : i64, scratch_operands = 0 : i64, tpu.core_type = #tpu.core_type<tc>, window_params = [{transform_indices = @transform_0, window_bounds = array<i64: 32, 48>}, {pipeline_mode = #tpu.pipeline_mode<synchronous>, transform_indices = @transform_1, window_bounds = array<i64: 48, 8>}, {pipeline_mode = #tpu.pipeline_mode<synchronous>, transform_indices = @transform_2, window_bounds = array<i64: 1, 8>}, {transform_indices = @transform_3, window_bounds = array<i64: 32, 8>}]} {
    %c0 = arith.constant 0 : index
    %c0_0 = arith.constant 0 : index
    %0 = vector.load %arg1[%c0, %c0_0] : memref<32x48xf32, #tpu.memory_space<vmem>>, vector<32x48xf32>
    %1 = arith.truncf %0 : vector<32x48xf32> to vector<32x48xbf16>
    %c0_1 = arith.constant 0 : index
    %c0_2 = arith.constant 0 : index
    %2 = vector.load %arg2[%c0_1, %c0_2] : memref<48x8xbf16, #tpu.memory_space<vmem>>, vector<48x8xbf16>
    %cst = arith.constant dense<0.000000e+00> : vector<32x8xf32>
    %3 = tpu.matmul %1, %2, %cst {dimension_numbers = #tpu.dot_dimension_numbers<[1], [0], [0], [1], [0, 0, 1, 1], [], []>} : vector<32x48xbf16>, vector<48x8xbf16>, vector<32x8xf32> -> vector<32x8xf32>
    %c0_3 = arith.constant 0 : index
    %c0_4 = arith.constant 0 : index
    %4 = vector.load %arg3[%c0_3, %c0_4] : memref<1x8xf32, #tpu.memory_space<vmem>>, vector<1x8xf32>
    %5 = vector.broadcast %4 : vector<1x8xf32> to vector<32x8xf32>
    %6 = arith.addf %3, %5 : vector<32x8xf32>
    %c0_5 = arith.constant 0 : index
    %c0_6 = arith.constant 0 : index
    %7 = vector.load %arg4[%c0_5, %c0_6] : memref<32x8xf32, #tpu.memory_space<vmem>>, vector<32x8xf32>
    tpu.vector_store %arg4[%c0_5, %c0_6], %6 {strides = array<i32>} : memref<32x8xf32, #tpu.memory_space<vmem>>, vector<32x8xf32>,
    return
  }
  func.func @transform_0(%arg0: i32) -> (i32, i32) {
    %c0_i32 = arith.constant 0 : i32
    %c0_i32_0 = arith.constant 0 : i32
    return %arg0, %c0_i32 : i32, i32
  }
  func.func @transform_1(%arg0: i32) -> (i32, i32) {
    %c0_i32 = arith.constant 0 : i32
    %c0_i32_0 = arith.constant 0 : i32
    %c0_i32_1 = arith.constant 0 : i32
    return %c0_i32, %c0_i32_0 : i32, i32
  }
  func.func @transform_2(%arg0: i32) -> (i32, i32) {
    %c0_i32 = arith.constant 0 : i32
    %c0_i32_0 = arith.constant 0 : i32
    %c0_i32_1 = arith.constant 0 : i32
    return %c0_i32, %c0_i32_0 : i32, i32
  }
  func.func @transform_3(%arg0: i32) -> (i32, i32) {
    %c0_i32 = arith.constant 0 : i32
    %c0_i32_0 = arith.constant 0 : i32
    return %arg0, %c0_i32 : i32, i32
  }
}

module attributes {stable_mosaic.version = 11 : i64} {
  func.func @_dwconv_kernel(%arg0: i32, %arg1: memref<1x10x10x8xf32, #tpu.memory_space<vmem>>, %arg2: memref<49x8xf32, #tpu.memory_space<vmem>>, %arg3: memref<1x8xf32, #tpu.memory_space<vmem>>, %arg4: memref<1x4x4x8xf32, #tpu.memory_space<vmem>>) attributes {dimension_semantics = [#tpu.dimension_semantics<parallel>], iteration_bounds = array<i64: 2>, scalar_prefetch = 0 : i64, scratch_operands = 0 : i64, tpu.core_type = #tpu.core_type<tc>, window_params = [{transform_indices = @transform_0, window_bounds = array<i64: 1, 10, 10, 8>}, {pipeline_mode = #tpu.pipeline_mode<synchronous>, transform_indices = @transform_1, window_bounds = array<i64: 49, 8>}, {pipeline_mode = #tpu.pipeline_mode<synchronous>, transform_indices = @transform_2, window_bounds = array<i64: 1, 8>}, {transform_indices = @transform_3, window_bounds = array<i64: 1, 4, 4, 8>}]} {
    %cst = arith.constant 0.000000e+00 : f32
    %0 = vector.broadcast %cst : f32 to vector<4x4x8xf32>
    %c0 = arith.constant 0 : index
    %c0_0 = arith.constant 0 : index
    %c0_1 = arith.constant 0 : index
    %c0_2 = arith.constant 0 : index
    %1 = vector.load %arg1[%c0, %c0_0, %c0_1, %c0_2] : memref<1x10x10x8xf32, #tpu.memory_space<vmem>>, vector<1x4x4x8xf32>
    %2 = vector.shape_cast %1 : vector<1x4x4x8xf32> to vector<4x4x8xf32>
    %c0_3 = arith.constant 0 : index
    %c0_4 = arith.constant 0 : index
    %3 = vector.load %arg2[%c0_3, %c0_4] : memref<49x8xf32, #tpu.memory_space<vmem>>, vector<1x8xf32>
    %4 = vector.shape_cast %3 : vector<1x8xf32> to vector<8xf32>
    %5 = vector.shape_cast %4 : vector<8xf32> to vector<1x1x8xf32>
    %6 = vector.broadcast %5 : vector<1x1x8xf32> to vector<4x4x8xf32>
    %7 = arith.mulf %2, %6 : vector<4x4x8xf32>
    %8 = arith.addf %0, %7 : vector<4x4x8xf32>
    %c0_5 = arith.constant 0 : index
    %c0_6 = arith.constant 0 : index
    %c1 = arith.constant 1 : index
    %c0_7 = arith.constant 0 : index
    %9 = vector.load %arg1[%c0_5, %c0_6, %c1, %c0_7] : memref<1x10x10x8xf32, #tpu.memory_space<vmem>>, vector<1x4x4x8xf32>
    %10 = vector.shape_cast %9 : vector<1x4x4x8xf32> to vector<4x4x8xf32>
    %c1_8 = arith.constant 1 : index
    %c0_9 = arith.constant 0 : index
    %11 = vector.load %arg2[%c1_8, %c0_9] : memref<49x8xf32, #tpu.memory_space<vmem>>, vector<1x8xf32>
    %12 = vector.shape_cast %11 : vector<1x8xf32> to vector<8xf32>
    %13 = vector.shape_cast %12 : vector<8xf32> to vector<1x1x8xf32>
    %14 = vector.broadcast %13 : vector<1x1x8xf32> to vector<4x4x8xf32>
    %15 = arith.mulf %10, %14 : vector<4x4x8xf32>
    %16 = arith.addf %8, %15 : vector<4x4x8xf32>
    %c0_10 = arith.constant 0 : index
    %c0_11 = arith.constant 0 : index
    %c2 = arith.constant 2 : index
    %c0_12 = arith.constant 0 : index
    %17 = vector.load %arg1[%c0_10, %c0_11, %c2, %c0_12] : memref<1x10x10x8xf32, #tpu.memory_space<vmem>>, vector<1x4x4x8xf32>
    %18 = vector.shape_cast %17 : vector<1x4x4x8xf32> to vector<4x4x8xf32>
    %c2_13 = arith.constant 2 : index
    %c0_14 = arith.constant 0 : index
    %19 = vector.load %arg2[%c2_13, %c0_14] : memref<49x8xf32, #tpu.memory_space<vmem>>, vector<1x8xf32>
    %20 = vector.shape_cast %19 : vector<1x8xf32> to vector<8xf32>
    %21 = vector.shape_cast %20 : vector<8xf32> to vector<1x1x8xf32>
    %22 = vector.broadcast %21 : vector<1x1x8xf32> to vector<4x4x8xf32>
    %23 = arith.mulf %18, %22 : vector<4x4x8xf32>
    %24 = arith.addf %16, %23 : vector<4x4x8xf32>
    %c0_15 = arith.constant 0 : index
    %c0_16 = arith.constant 0 : index
    %c3 = arith.constant 3 : index
    %c0_17 = arith.constant 0 : index
    %25 = vector.load %arg1[%c0_15, %c0_16, %c3, %c0_17] : memref<1x10x10x8xf32, #tpu.memory_space<vmem>>, vector<1x4x4x8xf32>
    %26 = vector.shape_cast %25 : vector<1x4x4x8xf32> to vector<4x4x8xf32>
    %c3_18 = arith.constant 3 : index
    %c0_19 = arith.constant 0 : index
    %27 = vector.load %arg2[%c3_18, %c0_19] : memref<49x8xf32, #tpu.memory_space<vmem>>, vector<1x8xf32>
    %28 = vector.shape_cast %27 : vector<1x8xf32> to vector<8xf32>
    %29 = vector.shape_cast %28 : vector<8xf32> to vector<1x1x8xf32>
    %30 = vector.broadcast %29 : vector<1x1x8xf32> to vector<4x4x8xf32>
    %31 = arith.mulf %26, %30 : vector<4x4x8xf32>
    %32 = arith.addf %24, %31 : vector<4x4x8xf32>
    %c0_20 = arith.constant 0 : index
    %c0_21 = arith.constant 0 : index
    %c4 = arith.constant 4 : index
    %c0_22 = arith.constant 0 : index
    %33 = vector.load %arg1[%c0_20, %c0_21, %c4, %c0_22] : memref<1x10x10x8xf32, #tpu.memory_space<vmem>>, vector<1x4x4x8xf32>
    %34 = vector.shape_cast %33 : vector<1x4x4x8xf32> to vector<4x4x8xf32>
    %c4_23 = arith.constant 4 : index
    %c0_24 = arith.constant 0 : index
    %35 = vector.load %arg2[%c4_23, %c0_24] : memref<49x8xf32, #tpu.memory_space<vmem>>, vector<1x8xf32>
    %36 = vector.shape_cast %35 : vector<1x8xf32> to vector<8xf32>
    %37 = vector.shape_cast %36 : vector<8xf32> to vector<1x1x8xf32>
    %38 = vector.broadcast %37 : vector<1x1x8xf32> to vector<4x4x8xf32>
    %39 = arith.mulf %34, %38 : vector<4x4x8xf32>
    %40 = arith.addf %32, %39 : vector<4x4x8xf32>
    %c0_25 = arith.constant 0 : index
    %c0_26 = arith.constant 0 : index
    %c5 = arith.constant 5 : index
    %c0_27 = arith.constant 0 : index
    %41 = vector.load %arg1[%c0_25, %c0_26, %c5, %c0_27] : memref<1x10x10x8xf32, #tpu.memory_space<vmem>>, vector<1x4x4x8xf32>
    %42 = vector.shape_cast %41 : vector<1x4x4x8xf32> to vector<4x4x8xf32>
    %c5_28 = arith.constant 5 : index
    %c0_29 = arith.constant 0 : index
    %43 = vector.load %arg2[%c5_28, %c0_29] : memref<49x8xf32, #tpu.memory_space<vmem>>, vector<1x8xf32>
    %44 = vector.shape_cast %43 : vector<1x8xf32> to vector<8xf32>
    %45 = vector.shape_cast %44 : vector<8xf32> to vector<1x1x8xf32>
    %46 = vector.broadcast %45 : vector<1x1x8xf32> to vector<4x4x8xf32>
    %47 = arith.mulf %42, %46 : vector<4x4x8xf32>
    %48 = arith.addf %40, %47 : vector<4x4x8xf32>
    %c0_30 = arith.constant 0 : index
    %c0_31 = arith.constant 0 : index
    %c6 = arith.constant 6 : index
    %c0_32 = arith.constant 0 : index
    %49 = vector.load %arg1[%c0_30, %c0_31, %c6, %c0_32] : memref<1x10x10x8xf32, #tpu.memory_space<vmem>>, vector<1x4x4x8xf32>
    %50 = vector.shape_cast %49 : vector<1x4x4x8xf32> to vector<4x4x8xf32>
    %c6_33 = arith.constant 6 : index
    %c0_34 = arith.constant 0 : index
    %51 = vector.load %arg2[%c6_33, %c0_34] : memref<49x8xf32, #tpu.memory_space<vmem>>, vector<1x8xf32>
    %52 = vector.shape_cast %51 : vector<1x8xf32> to vector<8xf32>
    %53 = vector.shape_cast %52 : vector<8xf32> to vector<1x1x8xf32>
    %54 = vector.broadcast %53 : vector<1x1x8xf32> to vector<4x4x8xf32>
    %55 = arith.mulf %50, %54 : vector<4x4x8xf32>
    %56 = arith.addf %48, %55 : vector<4x4x8xf32>
    %c0_35 = arith.constant 0 : index
    %c1_36 = arith.constant 1 : index
    %c0_37 = arith.constant 0 : index
    %c0_38 = arith.constant 0 : index
    %57 = vector.load %arg1[%c0_35, %c1_36, %c0_37, %c0_38] : memref<1x10x10x8xf32, #tpu.memory_space<vmem>>, vector<1x4x4x8xf32>
    %58 = vector.shape_cast %57 : vector<1x4x4x8xf32> to vector<4x4x8xf32>
    %c7 = arith.constant 7 : index
    %c0_39 = arith.constant 0 : index
    %59 = vector.load %arg2[%c7, %c0_39] : memref<49x8xf32, #tpu.memory_space<vmem>>, vector<1x8xf32>
    %60 = vector.shape_cast %59 : vector<1x8xf32> to vector<8xf32>
    %61 = vector.shape_cast %60 : vector<8xf32> to vector<1x1x8xf32>
    %62 = vector.broadcast %61 : vector<1x1x8xf32> to vector<4x4x8xf32>
    %63 = arith.mulf %58, %62 : vector<4x4x8xf32>
    %64 = arith.addf %56, %63 : vector<4x4x8xf32>
    %c0_40 = arith.constant 0 : index
    %c1_41 = arith.constant 1 : index
    %c1_42 = arith.constant 1 : index
    %c0_43 = arith.constant 0 : index
    %65 = vector.load %arg1[%c0_40, %c1_41, %c1_42, %c0_43] : memref<1x10x10x8xf32, #tpu.memory_space<vmem>>, vector<1x4x4x8xf32>
    %66 = vector.shape_cast %65 : vector<1x4x4x8xf32> to vector<4x4x8xf32>
    %c8 = arith.constant 8 : index
    %c0_44 = arith.constant 0 : index
    %67 = vector.load %arg2[%c8, %c0_44] : memref<49x8xf32, #tpu.memory_space<vmem>>, vector<1x8xf32>
    %68 = vector.shape_cast %67 : vector<1x8xf32> to vector<8xf32>
    %69 = vector.shape_cast %68 : vector<8xf32> to vector<1x1x8xf32>
    %70 = vector.broadcast %69 : vector<1x1x8xf32> to vector<4x4x8xf32>
    %71 = arith.mulf %66, %70 : vector<4x4x8xf32>
    %72 = arith.addf %64, %71 : vector<4x4x8xf32>
    %c0_45 = arith.constant 0 : index
    %c1_46 = arith.constant 1 : index
    %c2_47 = arith.constant 2 : index
    %c0_48 = arith.constant 0 : index
    %73 = vector.load %arg1[%c0_45, %c1_46, %c2_47, %c0_48] : memref<1x10x10x8xf32, #tpu.memory_space<vmem>>, vector<1x4x4x8xf32>
    %74 = vector.shape_cast %73 : vector<1x4x4x8xf32> to vector<4x4x8xf32>
    %c9 = arith.constant 9 : index
    %c0_49 = arith.constant 0 : index
    %75 = vector.load %arg2[%c9, %c0_49] : memref<49x8xf32, #tpu.memory_space<vmem>>, vector<1x8xf32>
    %76 = vector.shape_cast %75 : vector<1x8xf32> to vector<8xf32>
    %77 = vector.shape_cast %76 : vector<8xf32> to vector<1x1x8xf32>
    %78 = vector.broadcast %77 : vector<1x1x8xf32> to vector<4x4x8xf32>
    %79 = arith.mulf %74, %78 : vector<4x4x8xf32>
    %80 = arith.addf %72, %79 : vector<4x4x8xf32>
    %c0_50 = arith.constant 0 : index
    %c1_51 = arith.constant 1 : index
    %c3_52 = arith.constant 3 : index
    %c0_53 = arith.constant 0 : index
    %81 = vector.load %arg1[%c0_50, %c1_51, %c3_52, %c0_53] : memref<1x10x10x8xf32, #tpu.memory_space<vmem>>, vector<1x4x4x8xf32>
    %82 = vector.shape_cast %81 : vector<1x4x4x8xf32> to vector<4x4x8xf32>
    %c10 = arith.constant 10 : index
    %c0_54 = arith.constant 0 : index
    %83 = vector.load %arg2[%c10, %c0_54] : memref<49x8xf32, #tpu.memory_space<vmem>>, vector<1x8xf32>
    %84 = vector.shape_cast %83 : vector<1x8xf32> to vector<8xf32>
    %85 = vector.shape_cast %84 : vector<8xf32> to vector<1x1x8xf32>
    %86 = vector.broadcast %85 : vector<1x1x8xf32> to vector<4x4x8xf32>
    %87 = arith.mulf %82, %86 : vector<4x4x8xf32>
    %88 = arith.addf %80, %87 : vector<4x4x8xf32>
    %c0_55 = arith.constant 0 : index
    %c1_56 = arith.constant 1 : index
    %c4_57 = arith.constant 4 : index
    %c0_58 = arith.constant 0 : index
    %89 = vector.load %arg1[%c0_55, %c1_56, %c4_57, %c0_58] : memref<1x10x10x8xf32, #tpu.memory_space<vmem>>, vector<1x4x4x8xf32>
    %90 = vector.shape_cast %89 : vector<1x4x4x8xf32> to vector<4x4x8xf32>
    %c11 = arith.constant 11 : index
    %c0_59 = arith.constant 0 : index
    %91 = vector.load %arg2[%c11, %c0_59] : memref<49x8xf32, #tpu.memory_space<vmem>>, vector<1x8xf32>
    %92 = vector.shape_cast %91 : vector<1x8xf32> to vector<8xf32>
    %93 = vector.shape_cast %92 : vector<8xf32> to vector<1x1x8xf32>
    %94 = vector.broadcast %93 : vector<1x1x8xf32> to vector<4x4x8xf32>
    %95 = arith.mulf %90, %94 : vector<4x4x8xf32>
    %96 = arith.addf %88, %95 : vector<4x4x8xf32>
    %c0_60 = arith.constant 0 : index
    %c1_61 = arith.constant 1 : index
    %c5_62 = arith.constant 5 : index
    %c0_63 = arith.constant 0 : index
    %97 = vector.load %arg1[%c0_60, %c1_61, %c5_62, %c0_63] : memref<1x10x10x8xf32, #tpu.memory_space<vmem>>, vector<1x4x4x8xf32>
    %98 = vector.shape_cast %97 : vector<1x4x4x8xf32> to vector<4x4x8xf32>
    %c12 = arith.constant 12 : index
    %c0_64 = arith.constant 0 : index
    %99 = vector.load %arg2[%c12, %c0_64] : memref<49x8xf32, #tpu.memory_space<vmem>>, vector<1x8xf32>
    %100 = vector.shape_cast %99 : vector<1x8xf32> to vector<8xf32>
    %101 = vector.shape_cast %100 : vector<8xf32> to vector<1x1x8xf32>
    %102 = vector.broadcast %101 : vector<1x1x8xf32> to vector<4x4x8xf32>
    %103 = arith.mulf %98, %102 : vector<4x4x8xf32>
    %104 = arith.addf %96, %103 : vector<4x4x8xf32>
    %c0_65 = arith.constant 0 : index
    %c1_66 = arith.constant 1 : index
    %c6_67 = arith.constant 6 : index
    %c0_68 = arith.constant 0 : index
    %105 = vector.load %arg1[%c0_65, %c1_66, %c6_67, %c0_68] : memref<1x10x10x8xf32, #tpu.memory_space<vmem>>, vector<1x4x4x8xf32>
    %106 = vector.shape_cast %105 : vector<1x4x4x8xf32> to vector<4x4x8xf32>
    %c13 = arith.constant 13 : index
    %c0_69 = arith.constant 0 : index
    %107 = vector.load %arg2[%c13, %c0_69] : memref<49x8xf32, #tpu.memory_space<vmem>>, vector<1x8xf32>
    %108 = vector.shape_cast %107 : vector<1x8xf32> to vector<8xf32>
    %109 = vector.shape_cast %108 : vector<8xf32> to vector<1x1x8xf32>
    %110 = vector.broadcast %109 : vector<1x1x8xf32> to vector<4x4x8xf32>
    %111 = arith.mulf %106, %110 : vector<4x4x8xf32>
    %112 = arith.addf %104, %111 : vector<4x4x8xf32>
    %c0_70 = arith.constant 0 : index
    %c2_71 = arith.constant 2 : index
    %c0_72 = arith.constant 0 : index
    %c0_73 = arith.constant 0 : index
    %113 = vector.load %arg1[%c0_70, %c2_71, %c0_72, %c0_73] : memref<1x10x10x8xf32, #tpu.memory_space<vmem>>, vector<1x4x4x8xf32>
    %114 = vector.shape_cast %113 : vector<1x4x4x8xf32> to vector<4x4x8xf32>
    %c14 = arith.constant 14 : index
    %c0_74 = arith.constant 0 : index
    %115 = vector.load %arg2[%c14, %c0_74] : memref<49x8xf32, #tpu.memory_space<vmem>>, vector<1x8xf32>
    %116 = vector.shape_cast %115 : vector<1x8xf32> to vector<8xf32>
    %117 = vector.shape_cast %116 : vector<8xf32> to vector<1x1x8xf32>
    %118 = vector.broadcast %117 : vector<1x1x8xf32> to vector<4x4x8xf32>
    %119 = arith.mulf %114, %118 : vector<4x4x8xf32>
    %120 = arith.addf %112, %119 : vector<4x4x8xf32>
    %c0_75 = arith.constant 0 : index
    %c2_76 = arith.constant 2 : index
    %c1_77 = arith.constant 1 : index
    %c0_78 = arith.constant 0 : index
    %121 = vector.load %arg1[%c0_75, %c2_76, %c1_77, %c0_78] : memref<1x10x10x8xf32, #tpu.memory_space<vmem>>, vector<1x4x4x8xf32>
    %122 = vector.shape_cast %121 : vector<1x4x4x8xf32> to vector<4x4x8xf32>
    %c15 = arith.constant 15 : index
    %c0_79 = arith.constant 0 : index
    %123 = vector.load %arg2[%c15, %c0_79] : memref<49x8xf32, #tpu.memory_space<vmem>>, vector<1x8xf32>
    %124 = vector.shape_cast %123 : vector<1x8xf32> to vector<8xf32>
    %125 = vector.shape_cast %124 : vector<8xf32> to vector<1x1x8xf32>
    %126 = vector.broadcast %125 : vector<1x1x8xf32> to vector<4x4x8xf32>
    %127 = arith.mulf %122, %126 : vector<4x4x8xf32>
    %128 = arith.addf %120, %127 : vector<4x4x8xf32>
    %c0_80 = arith.constant 0 : index
    %c2_81 = arith.constant 2 : index
    %c2_82 = arith.constant 2 : index
    %c0_83 = arith.constant 0 : index
    %129 = vector.load %arg1[%c0_80, %c2_81, %c2_82, %c0_83] : memref<1x10x10x8xf32, #tpu.memory_space<vmem>>, vector<1x4x4x8xf32>
    %130 = vector.shape_cast %129 : vector<1x4x4x8xf32> to vector<4x4x8xf32>
    %c16 = arith.constant 16 : index
    %c0_84 = arith.constant 0 : index
    %131 = vector.load %arg2[%c16, %c0_84] : memref<49x8xf32, #tpu.memory_space<vmem>>, vector<1x8xf32>
    %132 = vector.shape_cast %131 : vector<1x8xf32> to vector<8xf32>
    %133 = vector.shape_cast %132 : vector<8xf32> to vector<1x1x8xf32>
    %134 = vector.broadcast %133 : vector<1x1x8xf32> to vector<4x4x8xf32>
    %135 = arith.mulf %130, %134 : vector<4x4x8xf32>
    %136 = arith.addf %128, %135 : vector<4x4x8xf32>
    %c0_85 = arith.constant 0 : index
    %c2_86 = arith.constant 2 : index
    %c3_87 = arith.constant 3 : index
    %c0_88 = arith.constant 0 : index
    %137 = vector.load %arg1[%c0_85, %c2_86, %c3_87, %c0_88] : memref<1x10x10x8xf32, #tpu.memory_space<vmem>>, vector<1x4x4x8xf32>
    %138 = vector.shape_cast %137 : vector<1x4x4x8xf32> to vector<4x4x8xf32>
    %c17 = arith.constant 17 : index
    %c0_89 = arith.constant 0 : index
    %139 = vector.load %arg2[%c17, %c0_89] : memref<49x8xf32, #tpu.memory_space<vmem>>, vector<1x8xf32>
    %140 = vector.shape_cast %139 : vector<1x8xf32> to vector<8xf32>
    %141 = vector.shape_cast %140 : vector<8xf32> to vector<1x1x8xf32>
    %142 = vector.broadcast %141 : vector<1x1x8xf32> to vector<4x4x8xf32>
    %143 = arith.mulf %138, %142 : vector<4x4x8xf32>
    %144 = arith.addf %136, %143 : vector<4x4x8xf32>
    %c0_90 = arith.constant 0 : index
    %c2_91 = arith.constant 2 : index
    %c4_92 = arith.constant 4 : index
    %c0_93 = arith.constant 0 : index
    %145 = vector.load %arg1[%c0_90, %c2_91, %c4_92, %c0_93] : memref<1x10x10x8xf32, #tpu.memory_space<vmem>>, vector<1x4x4x8xf32>
    %146 = vector.shape_cast %145 : vector<1x4x4x8xf32> to vector<4x4x8xf32>
    %c18 = arith.constant 18 : index
    %c0_94 = arith.constant 0 : index
    %147 = vector.load %arg2[%c18, %c0_94] : memref<49x8xf32, #tpu.memory_space<vmem>>, vector<1x8xf32>
    %148 = vector.shape_cast %147 : vector<1x8xf32> to vector<8xf32>
    %149 = vector.shape_cast %148 : vector<8xf32> to vector<1x1x8xf32>
    %150 = vector.broadcast %149 : vector<1x1x8xf32> to vector<4x4x8xf32>
    %151 = arith.mulf %146, %150 : vector<4x4x8xf32>
    %152 = arith.addf %144, %151 : vector<4x4x8xf32>
    %c0_95 = arith.constant 0 : index
    %c2_96 = arith.constant 2 : index
    %c5_97 = arith.constant 5 : index
    %c0_98 = arith.constant 0 : index
    %153 = vector.load %arg1[%c0_95, %c2_96, %c5_97, %c0_98] : memref<1x10x10x8xf32, #tpu.memory_space<vmem>>, vector<1x4x4x8xf32>
    %154 = vector.shape_cast %153 : vector<1x4x4x8xf32> to vector<4x4x8xf32>
    %c19 = arith.constant 19 : index
    %c0_99 = arith.constant 0 : index
    %155 = vector.load %arg2[%c19, %c0_99] : memref<49x8xf32, #tpu.memory_space<vmem>>, vector<1x8xf32>
    %156 = vector.shape_cast %155 : vector<1x8xf32> to vector<8xf32>
    %157 = vector.shape_cast %156 : vector<8xf32> to vector<1x1x8xf32>
    %158 = vector.broadcast %157 : vector<1x1x8xf32> to vector<4x4x8xf32>
    %159 = arith.mulf %154, %158 : vector<4x4x8xf32>
    %160 = arith.addf %152, %159 : vector<4x4x8xf32>
    %c0_100 = arith.constant 0 : index
    %c2_101 = arith.constant 2 : index
    %c6_102 = arith.constant 6 : index
    %c0_103 = arith.constant 0 : index
    %161 = vector.load %arg1[%c0_100, %c2_101, %c6_102, %c0_103] : memref<1x10x10x8xf32, #tpu.memory_space<vmem>>, vector<1x4x4x8xf32>
    %162 = vector.shape_cast %161 : vector<1x4x4x8xf32> to vector<4x4x8xf32>
    %c20 = arith.constant 20 : index
    %c0_104 = arith.constant 0 : index
    %163 = vector.load %arg2[%c20, %c0_104] : memref<49x8xf32, #tpu.memory_space<vmem>>, vector<1x8xf32>
    %164 = vector.shape_cast %163 : vector<1x8xf32> to vector<8xf32>
    %165 = vector.shape_cast %164 : vector<8xf32> to vector<1x1x8xf32>
    %166 = vector.broadcast %165 : vector<1x1x8xf32> to vector<4x4x8xf32>
    %167 = arith.mulf %162, %166 : vector<4x4x8xf32>
    %168 = arith.addf %160, %167 : vector<4x4x8xf32>
    %c0_105 = arith.constant 0 : index
    %c3_106 = arith.constant 3 : index
    %c0_107 = arith.constant 0 : index
    %c0_108 = arith.constant 0 : index
    %169 = vector.load %arg1[%c0_105, %c3_106, %c0_107, %c0_108] : memref<1x10x10x8xf32, #tpu.memory_space<vmem>>, vector<1x4x4x8xf32>
    %170 = vector.shape_cast %169 : vector<1x4x4x8xf32> to vector<4x4x8xf32>
    %c21 = arith.constant 21 : index
    %c0_109 = arith.constant 0 : index
    %171 = vector.load %arg2[%c21, %c0_109] : memref<49x8xf32, #tpu.memory_space<vmem>>, vector<1x8xf32>
    %172 = vector.shape_cast %171 : vector<1x8xf32> to vector<8xf32>
    %173 = vector.shape_cast %172 : vector<8xf32> to vector<1x1x8xf32>
    %174 = vector.broadcast %173 : vector<1x1x8xf32> to vector<4x4x8xf32>
    %175 = arith.mulf %170, %174 : vector<4x4x8xf32>
    %176 = arith.addf %168, %175 : vector<4x4x8xf32>
    %c0_110 = arith.constant 0 : index
    %c3_111 = arith.constant 3 : index
    %c1_112 = arith.constant 1 : index
    %c0_113 = arith.constant 0 : index
    %177 = vector.load %arg1[%c0_110, %c3_111, %c1_112, %c0_113] : memref<1x10x10x8xf32, #tpu.memory_space<vmem>>, vector<1x4x4x8xf32>
    %178 = vector.shape_cast %177 : vector<1x4x4x8xf32> to vector<4x4x8xf32>
    %c22 = arith.constant 22 : index
    %c0_114 = arith.constant 0 : index
    %179 = vector.load %arg2[%c22, %c0_114] : memref<49x8xf32, #tpu.memory_space<vmem>>, vector<1x8xf32>
    %180 = vector.shape_cast %179 : vector<1x8xf32> to vector<8xf32>
    %181 = vector.shape_cast %180 : vector<8xf32> to vector<1x1x8xf32>
    %182 = vector.broadcast %181 : vector<1x1x8xf32> to vector<4x4x8xf32>
    %183 = arith.mulf %178, %182 : vector<4x4x8xf32>
    %184 = arith.addf %176, %183 : vector<4x4x8xf32>
    %c0_115 = arith.constant 0 : index
    %c3_116 = arith.constant 3 : index
    %c2_117 = arith.constant 2 : index
    %c0_118 = arith.constant 0 : index
    %185 = vector.load %arg1[%c0_115, %c3_116, %c2_117, %c0_118] : memref<1x10x10x8xf32, #tpu.memory_space<vmem>>, vector<1x4x4x8xf32>
    %186 = vector.shape_cast %185 : vector<1x4x4x8xf32> to vector<4x4x8xf32>
    %c23 = arith.constant 23 : index
    %c0_119 = arith.constant 0 : index
    %187 = vector.load %arg2[%c23, %c0_119] : memref<49x8xf32, #tpu.memory_space<vmem>>, vector<1x8xf32>
    %188 = vector.shape_cast %187 : vector<1x8xf32> to vector<8xf32>
    %189 = vector.shape_cast %188 : vector<8xf32> to vector<1x1x8xf32>
    %190 = vector.broadcast %189 : vector<1x1x8xf32> to vector<4x4x8xf32>
    %191 = arith.mulf %186, %190 : vector<4x4x8xf32>
    %192 = arith.addf %184, %191 : vector<4x4x8xf32>
    %c0_120 = arith.constant 0 : index
    %c3_121 = arith.constant 3 : index
    %c3_122 = arith.constant 3 : index
    %c0_123 = arith.constant 0 : index
    %193 = vector.load %arg1[%c0_120, %c3_121, %c3_122, %c0_123] : memref<1x10x10x8xf32, #tpu.memory_space<vmem>>, vector<1x4x4x8xf32>
    %194 = vector.shape_cast %193 : vector<1x4x4x8xf32> to vector<4x4x8xf32>
    %c24 = arith.constant 24 : index
    %c0_124 = arith.constant 0 : index
    %195 = vector.load %arg2[%c24, %c0_124] : memref<49x8xf32, #tpu.memory_space<vmem>>, vector<1x8xf32>
    %196 = vector.shape_cast %195 : vector<1x8xf32> to vector<8xf32>
    %197 = vector.shape_cast %196 : vector<8xf32> to vector<1x1x8xf32>
    %198 = vector.broadcast %197 : vector<1x1x8xf32> to vector<4x4x8xf32>
    %199 = arith.mulf %194, %198 : vector<4x4x8xf32>
    %200 = arith.addf %192, %199 : vector<4x4x8xf32>
    %c0_125 = arith.constant 0 : index
    %c3_126 = arith.constant 3 : index
    %c4_127 = arith.constant 4 : index
    %c0_128 = arith.constant 0 : index
    %201 = vector.load %arg1[%c0_125, %c3_126, %c4_127, %c0_128] : memref<1x10x10x8xf32, #tpu.memory_space<vmem>>, vector<1x4x4x8xf32>
    %202 = vector.shape_cast %201 : vector<1x4x4x8xf32> to vector<4x4x8xf32>
    %c25 = arith.constant 25 : index
    %c0_129 = arith.constant 0 : index
    %203 = vector.load %arg2[%c25, %c0_129] : memref<49x8xf32, #tpu.memory_space<vmem>>, vector<1x8xf32>
    %204 = vector.shape_cast %203 : vector<1x8xf32> to vector<8xf32>
    %205 = vector.shape_cast %204 : vector<8xf32> to vector<1x1x8xf32>
    %206 = vector.broadcast %205 : vector<1x1x8xf32> to vector<4x4x8xf32>
    %207 = arith.mulf %202, %206 : vector<4x4x8xf32>
    %208 = arith.addf %200, %207 : vector<4x4x8xf32>
    %c0_130 = arith.constant 0 : index
    %c3_131 = arith.constant 3 : index
    %c5_132 = arith.constant 5 : index
    %c0_133 = arith.constant 0 : index
    %209 = vector.load %arg1[%c0_130, %c3_131, %c5_132, %c0_133] : memref<1x10x10x8xf32, #tpu.memory_space<vmem>>, vector<1x4x4x8xf32>
    %210 = vector.shape_cast %209 : vector<1x4x4x8xf32> to vector<4x4x8xf32>
    %c26 = arith.constant 26 : index
    %c0_134 = arith.constant 0 : index
    %211 = vector.load %arg2[%c26, %c0_134] : memref<49x8xf32, #tpu.memory_space<vmem>>, vector<1x8xf32>
    %212 = vector.shape_cast %211 : vector<1x8xf32> to vector<8xf32>
    %213 = vector.shape_cast %212 : vector<8xf32> to vector<1x1x8xf32>
    %214 = vector.broadcast %213 : vector<1x1x8xf32> to vector<4x4x8xf32>
    %215 = arith.mulf %210, %214 : vector<4x4x8xf32>
    %216 = arith.addf %208, %215 : vector<4x4x8xf32>
    %c0_135 = arith.constant 0 : index
    %c3_136 = arith.constant 3 : index
    %c6_137 = arith.constant 6 : index
    %c0_138 = arith.constant 0 : index
    %217 = vector.load %arg1[%c0_135, %c3_136, %c6_137, %c0_138] : memref<1x10x10x8xf32, #tpu.memory_space<vmem>>, vector<1x4x4x8xf32>
    %218 = vector.shape_cast %217 : vector<1x4x4x8xf32> to vector<4x4x8xf32>
    %c27 = arith.constant 27 : index
    %c0_139 = arith.constant 0 : index
    %219 = vector.load %arg2[%c27, %c0_139] : memref<49x8xf32, #tpu.memory_space<vmem>>, vector<1x8xf32>
    %220 = vector.shape_cast %219 : vector<1x8xf32> to vector<8xf32>
    %221 = vector.shape_cast %220 : vector<8xf32> to vector<1x1x8xf32>
    %222 = vector.broadcast %221 : vector<1x1x8xf32> to vector<4x4x8xf32>
    %223 = arith.mulf %218, %222 : vector<4x4x8xf32>
    %224 = arith.addf %216, %223 : vector<4x4x8xf32>
    %c0_140 = arith.constant 0 : index
    %c4_141 = arith.constant 4 : index
    %c0_142 = arith.constant 0 : index
    %c0_143 = arith.constant 0 : index
    %225 = vector.load %arg1[%c0_140, %c4_141, %c0_142, %c0_143] : memref<1x10x10x8xf32, #tpu.memory_space<vmem>>, vector<1x4x4x8xf32>
    %226 = vector.shape_cast %225 : vector<1x4x4x8xf32> to vector<4x4x8xf32>
    %c28 = arith.constant 28 : index
    %c0_144 = arith.constant 0 : index
    %227 = vector.load %arg2[%c28, %c0_144] : memref<49x8xf32, #tpu.memory_space<vmem>>, vector<1x8xf32>
    %228 = vector.shape_cast %227 : vector<1x8xf32> to vector<8xf32>
    %229 = vector.shape_cast %228 : vector<8xf32> to vector<1x1x8xf32>
    %230 = vector.broadcast %229 : vector<1x1x8xf32> to vector<4x4x8xf32>
    %231 = arith.mulf %226, %230 : vector<4x4x8xf32>
    %232 = arith.addf %224, %231 : vector<4x4x8xf32>
    %c0_145 = arith.constant 0 : index
    %c4_146 = arith.constant 4 : index
    %c1_147 = arith.constant 1 : index
    %c0_148 = arith.constant 0 : index
    %233 = vector.load %arg1[%c0_145, %c4_146, %c1_147, %c0_148] : memref<1x10x10x8xf32, #tpu.memory_space<vmem>>, vector<1x4x4x8xf32>
    %234 = vector.shape_cast %233 : vector<1x4x4x8xf32> to vector<4x4x8xf32>
    %c29 = arith.constant 29 : index
    %c0_149 = arith.constant 0 : index
    %235 = vector.load %arg2[%c29, %c0_149] : memref<49x8xf32, #tpu.memory_space<vmem>>, vector<1x8xf32>
    %236 = vector.shape_cast %235 : vector<1x8xf32> to vector<8xf32>
    %237 = vector.shape_cast %236 : vector<8xf32> to vector<1x1x8xf32>
    %238 = vector.broadcast %237 : vector<1x1x8xf32> to vector<4x4x8xf32>
    %239 = arith.mulf %234, %238 : vector<4x4x8xf32>
    %240 = arith.addf %232, %239 : vector<4x4x8xf32>
    %c0_150 = arith.constant 0 : index
    %c4_151 = arith.constant 4 : index
    %c2_152 = arith.constant 2 : index
    %c0_153 = arith.constant 0 : index
    %241 = vector.load %arg1[%c0_150, %c4_151, %c2_152, %c0_153] : memref<1x10x10x8xf32, #tpu.memory_space<vmem>>, vector<1x4x4x8xf32>
    %242 = vector.shape_cast %241 : vector<1x4x4x8xf32> to vector<4x4x8xf32>
    %c30 = arith.constant 30 : index
    %c0_154 = arith.constant 0 : index
    %243 = vector.load %arg2[%c30, %c0_154] : memref<49x8xf32, #tpu.memory_space<vmem>>, vector<1x8xf32>
    %244 = vector.shape_cast %243 : vector<1x8xf32> to vector<8xf32>
    %245 = vector.shape_cast %244 : vector<8xf32> to vector<1x1x8xf32>
    %246 = vector.broadcast %245 : vector<1x1x8xf32> to vector<4x4x8xf32>
    %247 = arith.mulf %242, %246 : vector<4x4x8xf32>
    %248 = arith.addf %240, %247 : vector<4x4x8xf32>
    %c0_155 = arith.constant 0 : index
    %c4_156 = arith.constant 4 : index
    %c3_157 = arith.constant 3 : index
    %c0_158 = arith.constant 0 : index
    %249 = vector.load %arg1[%c0_155, %c4_156, %c3_157, %c0_158] : memref<1x10x10x8xf32, #tpu.memory_space<vmem>>, vector<1x4x4x8xf32>
    %250 = vector.shape_cast %249 : vector<1x4x4x8xf32> to vector<4x4x8xf32>
    %c31 = arith.constant 31 : index
    %c0_159 = arith.constant 0 : index
    %251 = vector.load %arg2[%c31, %c0_159] : memref<49x8xf32, #tpu.memory_space<vmem>>, vector<1x8xf32>
    %252 = vector.shape_cast %251 : vector<1x8xf32> to vector<8xf32>
    %253 = vector.shape_cast %252 : vector<8xf32> to vector<1x1x8xf32>
    %254 = vector.broadcast %253 : vector<1x1x8xf32> to vector<4x4x8xf32>
    %255 = arith.mulf %250, %254 : vector<4x4x8xf32>
    %256 = arith.addf %248, %255 : vector<4x4x8xf32>
    %c0_160 = arith.constant 0 : index
    %c4_161 = arith.constant 4 : index
    %c4_162 = arith.constant 4 : index
    %c0_163 = arith.constant 0 : index
    %257 = vector.load %arg1[%c0_160, %c4_161, %c4_162, %c0_163] : memref<1x10x10x8xf32, #tpu.memory_space<vmem>>, vector<1x4x4x8xf32>
    %258 = vector.shape_cast %257 : vector<1x4x4x8xf32> to vector<4x4x8xf32>
    %c32 = arith.constant 32 : index
    %c0_164 = arith.constant 0 : index
    %259 = vector.load %arg2[%c32, %c0_164] : memref<49x8xf32, #tpu.memory_space<vmem>>, vector<1x8xf32>
    %260 = vector.shape_cast %259 : vector<1x8xf32> to vector<8xf32>
    %261 = vector.shape_cast %260 : vector<8xf32> to vector<1x1x8xf32>
    %262 = vector.broadcast %261 : vector<1x1x8xf32> to vector<4x4x8xf32>
    %263 = arith.mulf %258, %262 : vector<4x4x8xf32>
    %264 = arith.addf %256, %263 : vector<4x4x8xf32>
    %c0_165 = arith.constant 0 : index
    %c4_166 = arith.constant 4 : index
    %c5_167 = arith.constant 5 : index
    %c0_168 = arith.constant 0 : index
    %265 = vector.load %arg1[%c0_165, %c4_166, %c5_167, %c0_168] : memref<1x10x10x8xf32, #tpu.memory_space<vmem>>, vector<1x4x4x8xf32>
    %266 = vector.shape_cast %265 : vector<1x4x4x8xf32> to vector<4x4x8xf32>
    %c33 = arith.constant 33 : index
    %c0_169 = arith.constant 0 : index
    %267 = vector.load %arg2[%c33, %c0_169] : memref<49x8xf32, #tpu.memory_space<vmem>>, vector<1x8xf32>
    %268 = vector.shape_cast %267 : vector<1x8xf32> to vector<8xf32>
    %269 = vector.shape_cast %268 : vector<8xf32> to vector<1x1x8xf32>
    %270 = vector.broadcast %269 : vector<1x1x8xf32> to vector<4x4x8xf32>
    %271 = arith.mulf %266, %270 : vector<4x4x8xf32>
    %272 = arith.addf %264, %271 : vector<4x4x8xf32>
    %c0_170 = arith.constant 0 : index
    %c4_171 = arith.constant 4 : index
    %c6_172 = arith.constant 6 : index
    %c0_173 = arith.constant 0 : index
    %273 = vector.load %arg1[%c0_170, %c4_171, %c6_172, %c0_173] : memref<1x10x10x8xf32, #tpu.memory_space<vmem>>, vector<1x4x4x8xf32>
    %274 = vector.shape_cast %273 : vector<1x4x4x8xf32> to vector<4x4x8xf32>
    %c34 = arith.constant 34 : index
    %c0_174 = arith.constant 0 : index
    %275 = vector.load %arg2[%c34, %c0_174] : memref<49x8xf32, #tpu.memory_space<vmem>>, vector<1x8xf32>
    %276 = vector.shape_cast %275 : vector<1x8xf32> to vector<8xf32>
    %277 = vector.shape_cast %276 : vector<8xf32> to vector<1x1x8xf32>
    %278 = vector.broadcast %277 : vector<1x1x8xf32> to vector<4x4x8xf32>
    %279 = arith.mulf %274, %278 : vector<4x4x8xf32>
    %280 = arith.addf %272, %279 : vector<4x4x8xf32>
    %c0_175 = arith.constant 0 : index
    %c5_176 = arith.constant 5 : index
    %c0_177 = arith.constant 0 : index
    %c0_178 = arith.constant 0 : index
    %281 = vector.load %arg1[%c0_175, %c5_176, %c0_177, %c0_178] : memref<1x10x10x8xf32, #tpu.memory_space<vmem>>, vector<1x4x4x8xf32>
    %282 = vector.shape_cast %281 : vector<1x4x4x8xf32> to vector<4x4x8xf32>
    %c35 = arith.constant 35 : index
    %c0_179 = arith.constant 0 : index
    %283 = vector.load %arg2[%c35, %c0_179] : memref<49x8xf32, #tpu.memory_space<vmem>>, vector<1x8xf32>
    %284 = vector.shape_cast %283 : vector<1x8xf32> to vector<8xf32>
    %285 = vector.shape_cast %284 : vector<8xf32> to vector<1x1x8xf32>
    %286 = vector.broadcast %285 : vector<1x1x8xf32> to vector<4x4x8xf32>
    %287 = arith.mulf %282, %286 : vector<4x4x8xf32>
    %288 = arith.addf %280, %287 : vector<4x4x8xf32>
    %c0_180 = arith.constant 0 : index
    %c5_181 = arith.constant 5 : index
    %c1_182 = arith.constant 1 : index
    %c0_183 = arith.constant 0 : index
    %289 = vector.load %arg1[%c0_180, %c5_181, %c1_182, %c0_183] : memref<1x10x10x8xf32, #tpu.memory_space<vmem>>, vector<1x4x4x8xf32>
    %290 = vector.shape_cast %289 : vector<1x4x4x8xf32> to vector<4x4x8xf32>
    %c36 = arith.constant 36 : index
    %c0_184 = arith.constant 0 : index
    %291 = vector.load %arg2[%c36, %c0_184] : memref<49x8xf32, #tpu.memory_space<vmem>>, vector<1x8xf32>
    %292 = vector.shape_cast %291 : vector<1x8xf32> to vector<8xf32>
    %293 = vector.shape_cast %292 : vector<8xf32> to vector<1x1x8xf32>
    %294 = vector.broadcast %293 : vector<1x1x8xf32> to vector<4x4x8xf32>
    %295 = arith.mulf %290, %294 : vector<4x4x8xf32>
    %296 = arith.addf %288, %295 : vector<4x4x8xf32>
    %c0_185 = arith.constant 0 : index
    %c5_186 = arith.constant 5 : index
    %c2_187 = arith.constant 2 : index
    %c0_188 = arith.constant 0 : index
    %297 = vector.load %arg1[%c0_185, %c5_186, %c2_187, %c0_188] : memref<1x10x10x8xf32, #tpu.memory_space<vmem>>, vector<1x4x4x8xf32>
    %298 = vector.shape_cast %297 : vector<1x4x4x8xf32> to vector<4x4x8xf32>
    %c37 = arith.constant 37 : index
    %c0_189 = arith.constant 0 : index
    %299 = vector.load %arg2[%c37, %c0_189] : memref<49x8xf32, #tpu.memory_space<vmem>>, vector<1x8xf32>
    %300 = vector.shape_cast %299 : vector<1x8xf32> to vector<8xf32>
    %301 = vector.shape_cast %300 : vector<8xf32> to vector<1x1x8xf32>
    %302 = vector.broadcast %301 : vector<1x1x8xf32> to vector<4x4x8xf32>
    %303 = arith.mulf %298, %302 : vector<4x4x8xf32>
    %304 = arith.addf %296, %303 : vector<4x4x8xf32>
    %c0_190 = arith.constant 0 : index
    %c5_191 = arith.constant 5 : index
    %c3_192 = arith.constant 3 : index
    %c0_193 = arith.constant 0 : index
    %305 = vector.load %arg1[%c0_190, %c5_191, %c3_192, %c0_193] : memref<1x10x10x8xf32, #tpu.memory_space<vmem>>, vector<1x4x4x8xf32>
    %306 = vector.shape_cast %305 : vector<1x4x4x8xf32> to vector<4x4x8xf32>
    %c38 = arith.constant 38 : index
    %c0_194 = arith.constant 0 : index
    %307 = vector.load %arg2[%c38, %c0_194] : memref<49x8xf32, #tpu.memory_space<vmem>>, vector<1x8xf32>
    %308 = vector.shape_cast %307 : vector<1x8xf32> to vector<8xf32>
    %309 = vector.shape_cast %308 : vector<8xf32> to vector<1x1x8xf32>
    %310 = vector.broadcast %309 : vector<1x1x8xf32> to vector<4x4x8xf32>
    %311 = arith.mulf %306, %310 : vector<4x4x8xf32>
    %312 = arith.addf %304, %311 : vector<4x4x8xf32>
    %c0_195 = arith.constant 0 : index
    %c5_196 = arith.constant 5 : index
    %c4_197 = arith.constant 4 : index
    %c0_198 = arith.constant 0 : index
    %313 = vector.load %arg1[%c0_195, %c5_196, %c4_197, %c0_198] : memref<1x10x10x8xf32, #tpu.memory_space<vmem>>, vector<1x4x4x8xf32>
    %314 = vector.shape_cast %313 : vector<1x4x4x8xf32> to vector<4x4x8xf32>
    %c39 = arith.constant 39 : index
    %c0_199 = arith.constant 0 : index
    %315 = vector.load %arg2[%c39, %c0_199] : memref<49x8xf32, #tpu.memory_space<vmem>>, vector<1x8xf32>
    %316 = vector.shape_cast %315 : vector<1x8xf32> to vector<8xf32>
    %317 = vector.shape_cast %316 : vector<8xf32> to vector<1x1x8xf32>
    %318 = vector.broadcast %317 : vector<1x1x8xf32> to vector<4x4x8xf32>
    %319 = arith.mulf %314, %318 : vector<4x4x8xf32>
    %320 = arith.addf %312, %319 : vector<4x4x8xf32>
    %c0_200 = arith.constant 0 : index
    %c5_201 = arith.constant 5 : index
    %c5_202 = arith.constant 5 : index
    %c0_203 = arith.constant 0 : index
    %321 = vector.load %arg1[%c0_200, %c5_201, %c5_202, %c0_203] : memref<1x10x10x8xf32, #tpu.memory_space<vmem>>, vector<1x4x4x8xf32>
    %322 = vector.shape_cast %321 : vector<1x4x4x8xf32> to vector<4x4x8xf32>
    %c40 = arith.constant 40 : index
    %c0_204 = arith.constant 0 : index
    %323 = vector.load %arg2[%c40, %c0_204] : memref<49x8xf32, #tpu.memory_space<vmem>>, vector<1x8xf32>
    %324 = vector.shape_cast %323 : vector<1x8xf32> to vector<8xf32>
    %325 = vector.shape_cast %324 : vector<8xf32> to vector<1x1x8xf32>
    %326 = vector.broadcast %325 : vector<1x1x8xf32> to vector<4x4x8xf32>
    %327 = arith.mulf %322, %326 : vector<4x4x8xf32>
    %328 = arith.addf %320, %327 : vector<4x4x8xf32>
    %c0_205 = arith.constant 0 : index
    %c5_206 = arith.constant 5 : index
    %c6_207 = arith.constant 6 : index
    %c0_208 = arith.constant 0 : index
    %329 = vector.load %arg1[%c0_205, %c5_206, %c6_207, %c0_208] : memref<1x10x10x8xf32, #tpu.memory_space<vmem>>, vector<1x4x4x8xf32>
    %330 = vector.shape_cast %329 : vector<1x4x4x8xf32> to vector<4x4x8xf32>
    %c41 = arith.constant 41 : index
    %c0_209 = arith.constant 0 : index
    %331 = vector.load %arg2[%c41, %c0_209] : memref<49x8xf32, #tpu.memory_space<vmem>>, vector<1x8xf32>
    %332 = vector.shape_cast %331 : vector<1x8xf32> to vector<8xf32>
    %333 = vector.shape_cast %332 : vector<8xf32> to vector<1x1x8xf32>
    %334 = vector.broadcast %333 : vector<1x1x8xf32> to vector<4x4x8xf32>
    %335 = arith.mulf %330, %334 : vector<4x4x8xf32>
    %336 = arith.addf %328, %335 : vector<4x4x8xf32>
    %c0_210 = arith.constant 0 : index
    %c6_211 = arith.constant 6 : index
    %c0_212 = arith.constant 0 : index
    %c0_213 = arith.constant 0 : index
    %337 = vector.load %arg1[%c0_210, %c6_211, %c0_212, %c0_213] : memref<1x10x10x8xf32, #tpu.memory_space<vmem>>, vector<1x4x4x8xf32>
    %338 = vector.shape_cast %337 : vector<1x4x4x8xf32> to vector<4x4x8xf32>
    %c42 = arith.constant 42 : index
    %c0_214 = arith.constant 0 : index
    %339 = vector.load %arg2[%c42, %c0_214] : memref<49x8xf32, #tpu.memory_space<vmem>>, vector<1x8xf32>
    %340 = vector.shape_cast %339 : vector<1x8xf32> to vector<8xf32>
    %341 = vector.shape_cast %340 : vector<8xf32> to vector<1x1x8xf32>
    %342 = vector.broadcast %341 : vector<1x1x8xf32> to vector<4x4x8xf32>
    %343 = arith.mulf %338, %342 : vector<4x4x8xf32>
    %344 = arith.addf %336, %343 : vector<4x4x8xf32>
    %c0_215 = arith.constant 0 : index
    %c6_216 = arith.constant 6 : index
    %c1_217 = arith.constant 1 : index
    %c0_218 = arith.constant 0 : index
    %345 = vector.load %arg1[%c0_215, %c6_216, %c1_217, %c0_218] : memref<1x10x10x8xf32, #tpu.memory_space<vmem>>, vector<1x4x4x8xf32>
    %346 = vector.shape_cast %345 : vector<1x4x4x8xf32> to vector<4x4x8xf32>
    %c43 = arith.constant 43 : index
    %c0_219 = arith.constant 0 : index
    %347 = vector.load %arg2[%c43, %c0_219] : memref<49x8xf32, #tpu.memory_space<vmem>>, vector<1x8xf32>
    %348 = vector.shape_cast %347 : vector<1x8xf32> to vector<8xf32>
    %349 = vector.shape_cast %348 : vector<8xf32> to vector<1x1x8xf32>
    %350 = vector.broadcast %349 : vector<1x1x8xf32> to vector<4x4x8xf32>
    %351 = arith.mulf %346, %350 : vector<4x4x8xf32>
    %352 = arith.addf %344, %351 : vector<4x4x8xf32>
    %c0_220 = arith.constant 0 : index
    %c6_221 = arith.constant 6 : index
    %c2_222 = arith.constant 2 : index
    %c0_223 = arith.constant 0 : index
    %353 = vector.load %arg1[%c0_220, %c6_221, %c2_222, %c0_223] : memref<1x10x10x8xf32, #tpu.memory_space<vmem>>, vector<1x4x4x8xf32>
    %354 = vector.shape_cast %353 : vector<1x4x4x8xf32> to vector<4x4x8xf32>
    %c44 = arith.constant 44 : index
    %c0_224 = arith.constant 0 : index
    %355 = vector.load %arg2[%c44, %c0_224] : memref<49x8xf32, #tpu.memory_space<vmem>>, vector<1x8xf32>
    %356 = vector.shape_cast %355 : vector<1x8xf32> to vector<8xf32>
    %357 = vector.shape_cast %356 : vector<8xf32> to vector<1x1x8xf32>
    %358 = vector.broadcast %357 : vector<1x1x8xf32> to vector<4x4x8xf32>
    %359 = arith.mulf %354, %358 : vector<4x4x8xf32>
    %360 = arith.addf %352, %359 : vector<4x4x8xf32>
    %c0_225 = arith.constant 0 : index
    %c6_226 = arith.constant 6 : index
    %c3_227 = arith.constant 3 : index
    %c0_228 = arith.constant 0 : index
    %361 = vector.load %arg1[%c0_225, %c6_226, %c3_227, %c0_228] : memref<1x10x10x8xf32, #tpu.memory_space<vmem>>, vector<1x4x4x8xf32>
    %362 = vector.shape_cast %361 : vector<1x4x4x8xf32> to vector<4x4x8xf32>
    %c45 = arith.constant 45 : index
    %c0_229 = arith.constant 0 : index
    %363 = vector.load %arg2[%c45, %c0_229] : memref<49x8xf32, #tpu.memory_space<vmem>>, vector<1x8xf32>
    %364 = vector.shape_cast %363 : vector<1x8xf32> to vector<8xf32>
    %365 = vector.shape_cast %364 : vector<8xf32> to vector<1x1x8xf32>
    %366 = vector.broadcast %365 : vector<1x1x8xf32> to vector<4x4x8xf32>
    %367 = arith.mulf %362, %366 : vector<4x4x8xf32>
    %368 = arith.addf %360, %367 : vector<4x4x8xf32>
    %c0_230 = arith.constant 0 : index
    %c6_231 = arith.constant 6 : index
    %c4_232 = arith.constant 4 : index
    %c0_233 = arith.constant 0 : index
    %369 = vector.load %arg1[%c0_230, %c6_231, %c4_232, %c0_233] : memref<1x10x10x8xf32, #tpu.memory_space<vmem>>, vector<1x4x4x8xf32>
    %370 = vector.shape_cast %369 : vector<1x4x4x8xf32> to vector<4x4x8xf32>
    %c46 = arith.constant 46 : index
    %c0_234 = arith.constant 0 : index
    %371 = vector.load %arg2[%c46, %c0_234] : memref<49x8xf32, #tpu.memory_space<vmem>>, vector<1x8xf32>
    %372 = vector.shape_cast %371 : vector<1x8xf32> to vector<8xf32>
    %373 = vector.shape_cast %372 : vector<8xf32> to vector<1x1x8xf32>
    %374 = vector.broadcast %373 : vector<1x1x8xf32> to vector<4x4x8xf32>
    %375 = arith.mulf %370, %374 : vector<4x4x8xf32>
    %376 = arith.addf %368, %375 : vector<4x4x8xf32>
    %c0_235 = arith.constant 0 : index
    %c6_236 = arith.constant 6 : index
    %c5_237 = arith.constant 5 : index
    %c0_238 = arith.constant 0 : index
    %377 = vector.load %arg1[%c0_235, %c6_236, %c5_237, %c0_238] : memref<1x10x10x8xf32, #tpu.memory_space<vmem>>, vector<1x4x4x8xf32>
    %378 = vector.shape_cast %377 : vector<1x4x4x8xf32> to vector<4x4x8xf32>
    %c47 = arith.constant 47 : index
    %c0_239 = arith.constant 0 : index
    %379 = vector.load %arg2[%c47, %c0_239] : memref<49x8xf32, #tpu.memory_space<vmem>>, vector<1x8xf32>
    %380 = vector.shape_cast %379 : vector<1x8xf32> to vector<8xf32>
    %381 = vector.shape_cast %380 : vector<8xf32> to vector<1x1x8xf32>
    %382 = vector.broadcast %381 : vector<1x1x8xf32> to vector<4x4x8xf32>
    %383 = arith.mulf %378, %382 : vector<4x4x8xf32>
    %384 = arith.addf %376, %383 : vector<4x4x8xf32>
    %c0_240 = arith.constant 0 : index
    %c6_241 = arith.constant 6 : index
    %c6_242 = arith.constant 6 : index
    %c0_243 = arith.constant 0 : index
    %385 = vector.load %arg1[%c0_240, %c6_241, %c6_242, %c0_243] : memref<1x10x10x8xf32, #tpu.memory_space<vmem>>, vector<1x4x4x8xf32>
    %386 = vector.shape_cast %385 : vector<1x4x4x8xf32> to vector<4x4x8xf32>
    %c48 = arith.constant 48 : index
    %c0_244 = arith.constant 0 : index
    %387 = vector.load %arg2[%c48, %c0_244] : memref<49x8xf32, #tpu.memory_space<vmem>>, vector<1x8xf32>
    %388 = vector.shape_cast %387 : vector<1x8xf32> to vector<8xf32>
    %389 = vector.shape_cast %388 : vector<8xf32> to vector<1x1x8xf32>
    %390 = vector.broadcast %389 : vector<1x1x8xf32> to vector<4x4x8xf32>
    %391 = arith.mulf %386, %390 : vector<4x4x8xf32>
    %392 = arith.addf %384, %391 : vector<4x4x8xf32>
    %c0_245 = arith.constant 0 : index
    %c0_246 = arith.constant 0 : index
    %393 = vector.load %arg3[%c0_245, %c0_246] : memref<1x8xf32, #tpu.memory_space<vmem>>, vector<1x8xf32>
    %394 = vector.shape_cast %393 : vector<1x8xf32> to vector<8xf32>
    %395 = vector.shape_cast %394 : vector<8xf32> to vector<1x1x8xf32>
    %396 = vector.broadcast %395 : vector<1x1x8xf32> to vector<4x4x8xf32>
    %397 = arith.addf %392, %396 : vector<4x4x8xf32>
    %c0_247 = arith.constant 0 : index
    %c0_248 = arith.constant 0 : index
    %c0_249 = arith.constant 0 : index
    %c0_250 = arith.constant 0 : index
    %398 = vector.load %arg4[%c0_247, %c0_248, %c0_249, %c0_250] : memref<1x4x4x8xf32, #tpu.memory_space<vmem>>, vector<1x4x4x8xf32>
    %399 = vector.shape_cast %398 : vector<1x4x4x8xf32> to vector<4x4x8xf32>
    %400 = vector.shape_cast %397 : vector<4x4x8xf32> to vector<1x4x4x8xf32>
    tpu.vector_store %arg4[%c0_247, %c0_248, %c0_249, %c0_250], %400 {strides = array<i32>} : memref<1x4x4x8xf32, #tpu.memory_space<vmem>>, vector<1x4x4x8xf32>,
    return
  }
  func.func @transform_0(%arg0: i32) -> (i32, i32, i32, i32) {
    %c0_i32 = arith.constant 0 : i32
    %c0_i32_0 = arith.constant 0 : i32
    %c0_i32_1 = arith.constant 0 : i32
    %c0_i32_2 = arith.constant 0 : i32
    return %arg0, %c0_i32, %c0_i32_0, %c0_i32_1 : i32, i32, i32, i32
  }
  func.func @transform_1(%arg0: i32) -> (i32, i32) {
    %c0_i32 = arith.constant 0 : i32
    %c0_i32_0 = arith.constant 0 : i32
    %c0_i32_1 = arith.constant 0 : i32
    return %c0_i32, %c0_i32_0 : i32, i32
  }
  func.func @transform_2(%arg0: i32) -> (i32, i32) {
    %c0_i32 = arith.constant 0 : i32
    %c0_i32_0 = arith.constant 0 : i32
    %c0_i32_1 = arith.constant 0 : i32
    return %c0_i32, %c0_i32_0 : i32, i32
  }
  func.func @transform_3(%arg0: i32) -> (i32, i32, i32, i32) {
    %c0_i32 = arith.constant 0 : i32
    %c0_i32_0 = arith.constant 0 : i32
    %c0_i32_1 = arith.constant 0 : i32
    %c0_i32_2 = arith.constant 0 : i32
    return %arg0, %c0_i32, %c0_i32_0, %c0_i32_1 : i32, i32, i32, i32
  }
}

module attributes {stable_mosaic.version = 11 : i64} {
  func.func @_block_mlp_kernel(%arg0: i32, %arg1: memref<32x8xf32, #tpu.memory_space<vmem>>, %arg2: memref<32x8xf32, #tpu.memory_space<vmem>>, %arg3: memref<1x8xf32, #tpu.memory_space<vmem>>, %arg4: memref<1x8xf32, #tpu.memory_space<vmem>>, %arg5: memref<8x32xbf16, #tpu.memory_space<vmem>>, %arg6: memref<1x32xf32, #tpu.memory_space<vmem>>, %arg7: memref<32x8xbf16, #tpu.memory_space<vmem>>, %arg8: memref<1x8xf32, #tpu.memory_space<vmem>>, %arg9: memref<32x8xf32, #tpu.memory_space<vmem>>) attributes {dimension_semantics = [#tpu.dimension_semantics<parallel>], iteration_bounds = array<i64: 1>, scalar_prefetch = 0 : i64, scratch_operands = 0 : i64, tpu.core_type = #tpu.core_type<tc>, window_params = [{transform_indices = @transform_0, window_bounds = array<i64: 32, 8>}, {transform_indices = @transform_1, window_bounds = array<i64: 32, 8>}, {pipeline_mode = #tpu.pipeline_mode<synchronous>, transform_indices = @transform_2, window_bounds = array<i64: 1, 8>}, {pipeline_mode = #tpu.pipeline_mode<synchronous>, transform_indices = @transform_3, window_bounds = array<i64: 1, 8>}, {pipeline_mode = #tpu.pipeline_mode<synchronous>, transform_indices = @transform_4, window_bounds = array<i64: 8, 32>}, {pipeline_mode = #tpu.pipeline_mode<synchronous>, transform_indices = @transform_5, window_bounds = array<i64: 1, 32>}, {pipeline_mode = #tpu.pipeline_mode<synchronous>, transform_indices = @transform_6, window_bounds = array<i64: 32, 8>}, {pipeline_mode = #tpu.pipeline_mode<synchronous>, transform_indices = @transform_7, window_bounds = array<i64: 1, 8>}, {transform_indices = @transform_8, window_bounds = array<i64: 32, 8>}]} {
    %c0 = arith.constant 0 : index
    %c0_0 = arith.constant 0 : index
    %0 = vector.load %arg1[%c0, %c0_0] : memref<32x8xf32, #tpu.memory_space<vmem>>, vector<32x8xf32>
    %cst = arith.constant dense<0.000000e+00> : vector<32xf32>
    %1 = vector.multi_reduction <add>, %0, %cst [1] : vector<32x8xf32> to vector<32xf32>
    %2 = vector.shape_cast %1 : vector<32xf32> to vector<32x1xf32>
    %cst_1 = arith.constant 8.000000e+00 : f32
    %3 = vector.broadcast %cst_1 : f32 to vector<32x1xf32>
    %4 = arith.divf %2, %3 : vector<32x1xf32>
    %5 = vector.broadcast %4 : vector<32x1xf32> to vector<32x8xf32>
    %6 = arith.subf %0, %5 : vector<32x8xf32>
    %7 = arith.mulf %6, %6 : vector<32x8xf32>
    %cst_2 = arith.constant dense<0.000000e+00> : vector<32xf32>
    %8 = vector.multi_reduction <add>, %7, %cst_2 [1] : vector<32x8xf32> to vector<32xf32>
    %9 = vector.shape_cast %8 : vector<32xf32> to vector<32x1xf32>
    %cst_3 = arith.constant 8.000000e+00 : f32
    %10 = vector.broadcast %cst_3 : f32 to vector<32x1xf32>
    %11 = arith.divf %9, %10 : vector<32x1xf32>
    %12 = vector.broadcast %4 : vector<32x1xf32> to vector<32x8xf32>
    %13 = arith.subf %0, %12 : vector<32x8xf32>
    %cst_4 = arith.constant 9.99999997E-7 : f32
    %14 = vector.broadcast %cst_4 : f32 to vector<32x1xf32>
    %15 = arith.addf %11, %14 : vector<32x1xf32>
    %16 = math.rsqrt %15 : vector<32x1xf32>
    %17 = vector.broadcast %16 : vector<32x1xf32> to vector<32x8xf32>
    %18 = arith.mulf %13, %17 : vector<32x8xf32>
    %c0_5 = arith.constant 0 : index
    %c0_6 = arith.constant 0 : index
    %19 = vector.load %arg3[%c0_5, %c0_6] : memref<1x8xf32, #tpu.memory_space<vmem>>, vector<1x8xf32>
    %20 = vector.broadcast %19 : vector<1x8xf32> to vector<32x8xf32>
    %21 = arith.mulf %18, %20 : vector<32x8xf32>
    %c0_7 = arith.constant 0 : index
    %c0_8 = arith.constant 0 : index
    %22 = vector.load %arg4[%c0_7, %c0_8] : memref<1x8xf32, #tpu.memory_space<vmem>>, vector<1x8xf32>
    %23 = vector.broadcast %22 : vector<1x8xf32> to vector<32x8xf32>
    %24 = arith.addf %21, %23 : vector<32x8xf32>
    %25 = arith.truncf %24 : vector<32x8xf32> to vector<32x8xbf16>
    %c0_9 = arith.constant 0 : index
    %c0_10 = arith.constant 0 : index
    %26 = vector.load %arg5[%c0_9, %c0_10] : memref<8x32xbf16, #tpu.memory_space<vmem>>, vector<8x32xbf16>
    %cst_11 = arith.constant dense<0.000000e+00> : vector<32x32xf32>
    %27 = tpu.matmul %25, %26, %cst_11 {dimension_numbers = #tpu.dot_dimension_numbers<[1], [0], [0], [1], [0, 0, 1, 1], [], []>} : vector<32x8xbf16>, vector<8x32xbf16>, vector<32x32xf32> -> vector<32x32xf32>
    %c0_12 = arith.constant 0 : index
    %c0_13 = arith.constant 0 : index
    %28 = vector.load %arg6[%c0_12, %c0_13] : memref<1x32xf32, #tpu.memory_space<vmem>>, vector<1x32xf32>
    %29 = vector.broadcast %28 : vector<1x32xf32> to vector<32x32xf32>
    %30 = arith.addf %27, %29 : vector<32x32xf32>
    %31 = arith.mulf %30, %30 : vector<32x32xf32>
    %32 = arith.mulf %30, %31 : vector<32x32xf32>
    %cst_14 = arith.constant 4.471500e-02 : f32
    %33 = vector.broadcast %cst_14 : f32 to vector<32x32xf32>
    %34 = arith.mulf %33, %32 : vector<32x32xf32>
    %35 = arith.addf %30, %34 : vector<32x32xf32>
    %cst_15 = arith.constant 0.797884583 : f32
    %36 = vector.broadcast %cst_15 : f32 to vector<32x32xf32>
    %37 = arith.mulf %36, %35 : vector<32x32xf32>
    %38 = math.tanh %37 : vector<32x32xf32>
    %cst_16 = arith.constant 1.000000e+00 : f32
    %39 = vector.broadcast %cst_16 : f32 to vector<32x32xf32>
    %40 = arith.addf %39, %38 : vector<32x32xf32>
    %cst_17 = arith.constant 5.000000e-01 : f32
    %41 = vector.broadcast %cst_17 : f32 to vector<32x32xf32>
    %42 = arith.mulf %41, %40 : vector<32x32xf32>
    %43 = arith.mulf %30, %42 : vector<32x32xf32>
    %44 = arith.truncf %43 : vector<32x32xf32> to vector<32x32xbf16>
    %c0_18 = arith.constant 0 : index
    %c0_19 = arith.constant 0 : index
    %45 = vector.load %arg7[%c0_18, %c0_19] : memref<32x8xbf16, #tpu.memory_space<vmem>>, vector<32x8xbf16>
    %cst_20 = arith.constant dense<0.000000e+00> : vector<32x8xf32>
    %46 = tpu.matmul %44, %45, %cst_20 {dimension_numbers = #tpu.dot_dimension_numbers<[1], [0], [0], [1], [0, 0, 1, 1], [], []>} : vector<32x32xbf16>, vector<32x8xbf16>, vector<32x8xf32> -> vector<32x8xf32>
    %c0_21 = arith.constant 0 : index
    %c0_22 = arith.constant 0 : index
    %47 = vector.load %arg8[%c0_21, %c0_22] : memref<1x8xf32, #tpu.memory_space<vmem>>, vector<1x8xf32>
    %48 = vector.broadcast %47 : vector<1x8xf32> to vector<32x8xf32>
    %49 = arith.addf %46, %48 : vector<32x8xf32>
    %c0_23 = arith.constant 0 : index
    %c0_24 = arith.constant 0 : index
    %50 = vector.load %arg2[%c0_23, %c0_24] : memref<32x8xf32, #tpu.memory_space<vmem>>, vector<32x8xf32>
    %51 = arith.addf %50, %49 : vector<32x8xf32>
    %c0_25 = arith.constant 0 : index
    %c0_26 = arith.constant 0 : index
    %52 = vector.load %arg9[%c0_25, %c0_26] : memref<32x8xf32, #tpu.memory_space<vmem>>, vector<32x8xf32>
    tpu.vector_store %arg9[%c0_25, %c0_26], %51 {strides = array<i32>} : memref<32x8xf32, #tpu.memory_space<vmem>>, vector<32x8xf32>,
    return
  }
  func.func @transform_0(%arg0: i32) -> (i32, i32) {
    %c0_i32 = arith.constant 0 : i32
    %c0_i32_0 = arith.constant 0 : i32
    return %arg0, %c0_i32 : i32, i32
  }
  func.func @transform_1(%arg0: i32) -> (i32, i32) {
    %c0_i32 = arith.constant 0 : i32
    %c0_i32_0 = arith.constant 0 : i32
    return %arg0, %c0_i32 : i32, i32
  }
  func.func @transform_2(%arg0: i32) -> (i32, i32) {
    %c0_i32 = arith.constant 0 : i32
    %c0_i32_0 = arith.constant 0 : i32
    %c0_i32_1 = arith.constant 0 : i32
    return %c0_i32, %c0_i32_0 : i32, i32
  }
  func.func @transform_3(%arg0: i32) -> (i32, i32) {
    %c0_i32 = arith.constant 0 : i32
    %c0_i32_0 = arith.constant 0 : i32
    %c0_i32_1 = arith.constant 0 : i32
    return %c0_i32, %c0_i32_0 : i32, i32
  }
  func.func @transform_4(%arg0: i32) -> (i32, i32) {
    %c0_i32 = arith.constant 0 : i32
    %c0_i32_0 = arith.constant 0 : i32
    %c0_i32_1 = arith.constant 0 : i32
    return %c0_i32, %c0_i32_0 : i32, i32
  }
  func.func @transform_5(%arg0: i32) -> (i32, i32) {
    %c0_i32 = arith.constant 0 : i32
    %c0_i32_0 = arith.constant 0 : i32
    %c0_i32_1 = arith.constant 0 : i32
    return %c0_i32, %c0_i32_0 : i32, i32
  }
  func.func @transform_6(%arg0: i32) -> (i32, i32) {
    %c0_i32 = arith.constant 0 : i32
    %c0_i32_0 = arith.constant 0 : i32
    %c0_i32_1 = arith.constant 0 : i32
    return %c0_i32, %c0_i32_0 : i32, i32
  }
  func.func @transform_7(%arg0: i32) -> (i32, i32) {
    %c0_i32 = arith.constant 0 : i32
    %c0_i32_0 = arith.constant 0 : i32
    %c0_i32_1 = arith.constant 0 : i32
    return %c0_i32, %c0_i32_0 : i32, i32
  }
  func.func @transform_8(%arg0: i32) -> (i32, i32) {
    %c0_i32 = arith.constant 0 : i32
    %c0_i32_0 = arith.constant 0 : i32
    return %arg0, %c0_i32 : i32, i32
  }
}

module attributes {stable_mosaic.version = 11 : i64} {
  func.func @_downsample_kernel(%arg0: i32, %arg1: memref<4x8x8xf32, #tpu.memory_space<vmem>>, %arg2: memref<1x8xf32, #tpu.memory_space<vmem>>, %arg3: memref<1x8xf32, #tpu.memory_space<vmem>>, %arg4: memref<4x8x16xbf16, #tpu.memory_space<vmem>>, %arg5: memref<1x16xf32, #tpu.memory_space<vmem>>, %arg6: memref<8x16xf32, #tpu.memory_space<vmem>>) attributes {dimension_semantics = [#tpu.dimension_semantics<parallel>], iteration_bounds = array<i64: 1>, scalar_prefetch = 0 : i64, scratch_operands = 0 : i64, tpu.core_type = #tpu.core_type<tc>, window_params = [{transform_indices = @transform_0, window_bounds = array<i64: 4, 8, 8>}, {pipeline_mode = #tpu.pipeline_mode<synchronous>, transform_indices = @transform_1, window_bounds = array<i64: 1, 8>}, {pipeline_mode = #tpu.pipeline_mode<synchronous>, transform_indices = @transform_2, window_bounds = array<i64: 1, 8>}, {pipeline_mode = #tpu.pipeline_mode<synchronous>, transform_indices = @transform_3, window_bounds = array<i64: 4, 8, 16>}, {pipeline_mode = #tpu.pipeline_mode<synchronous>, transform_indices = @transform_4, window_bounds = array<i64: 1, 16>}, {transform_indices = @transform_5, window_bounds = array<i64: 8, 16>}]} {
    %cst = arith.constant 0.000000e+00 : f32
    %0 = vector.broadcast %cst : f32 to vector<8x16xf32>
    %c0 = arith.constant 0 : index
    %c0_0 = arith.constant 0 : index
    %c0_1 = arith.constant 0 : index
    %1 = vector.load %arg1[%c0, %c0_0, %c0_1] : memref<4x8x8xf32, #tpu.memory_space<vmem>>, vector<1x8x8xf32>
    %2 = vector.shape_cast %1 : vector<1x8x8xf32> to vector<8x8xf32>
    %cst_2 = arith.constant dense<0.000000e+00> : vector<8xf32>
    %3 = vector.multi_reduction <add>, %2, %cst_2 [1] : vector<8x8xf32> to vector<8xf32>
    %4 = vector.shape_cast %3 : vector<8xf32> to vector<8x1xf32>
    %cst_3 = arith.constant 8.000000e+00 : f32
    %5 = vector.broadcast %cst_3 : f32 to vector<8x1xf32>
    %6 = arith.divf %4, %5 : vector<8x1xf32>
    %7 = vector.broadcast %6 : vector<8x1xf32> to vector<8x8xf32>
    %8 = arith.subf %2, %7 : vector<8x8xf32>
    %9 = arith.mulf %8, %8 : vector<8x8xf32>
    %cst_4 = arith.constant dense<0.000000e+00> : vector<8xf32>
    %10 = vector.multi_reduction <add>, %9, %cst_4 [1] : vector<8x8xf32> to vector<8xf32>
    %11 = vector.shape_cast %10 : vector<8xf32> to vector<8x1xf32>
    %cst_5 = arith.constant 8.000000e+00 : f32
    %12 = vector.broadcast %cst_5 : f32 to vector<8x1xf32>
    %13 = arith.divf %11, %12 : vector<8x1xf32>
    %14 = vector.broadcast %6 : vector<8x1xf32> to vector<8x8xf32>
    %15 = arith.subf %2, %14 : vector<8x8xf32>
    %cst_6 = arith.constant 9.99999997E-7 : f32
    %16 = vector.broadcast %cst_6 : f32 to vector<8x1xf32>
    %17 = arith.addf %13, %16 : vector<8x1xf32>
    %18 = math.rsqrt %17 : vector<8x1xf32>
    %19 = vector.broadcast %18 : vector<8x1xf32> to vector<8x8xf32>
    %20 = arith.mulf %15, %19 : vector<8x8xf32>
    %c0_7 = arith.constant 0 : index
    %c0_8 = arith.constant 0 : index
    %21 = vector.load %arg2[%c0_7, %c0_8] : memref<1x8xf32, #tpu.memory_space<vmem>>, vector<1x8xf32>
    %22 = vector.broadcast %21 : vector<1x8xf32> to vector<8x8xf32>
    %23 = arith.mulf %20, %22 : vector<8x8xf32>
    %c0_9 = arith.constant 0 : index
    %c0_10 = arith.constant 0 : index
    %24 = vector.load %arg3[%c0_9, %c0_10] : memref<1x8xf32, #tpu.memory_space<vmem>>, vector<1x8xf32>
    %25 = vector.broadcast %24 : vector<1x8xf32> to vector<8x8xf32>
    %26 = arith.addf %23, %25 : vector<8x8xf32>
    %27 = arith.truncf %26 : vector<8x8xf32> to vector<8x8xbf16>
    %c0_11 = arith.constant 0 : index
    %c0_12 = arith.constant 0 : index
    %c0_13 = arith.constant 0 : index
    %28 = vector.load %arg4[%c0_11, %c0_12, %c0_13] : memref<4x8x16xbf16, #tpu.memory_space<vmem>>, vector<1x8x16xbf16>
    %29 = vector.shape_cast %28 : vector<1x8x16xbf16> to vector<8x16xbf16>
    %cst_14 = arith.constant dense<0.000000e+00> : vector<8x16xf32>
    %30 = tpu.matmul %27, %29, %cst_14 {dimension_numbers = #tpu.dot_dimension_numbers<[1], [0], [0], [1], [0, 0, 1, 1], [], []>} : vector<8x8xbf16>, vector<8x16xbf16>, vector<8x16xf32> -> vector<8x16xf32>
    %31 = arith.addf %0, %30 : vector<8x16xf32>
    %c1 = arith.constant 1 : index
    %c0_15 = arith.constant 0 : index
    %c0_16 = arith.constant 0 : index
    %32 = vector.load %arg1[%c1, %c0_15, %c0_16] : memref<4x8x8xf32, #tpu.memory_space<vmem>>, vector<1x8x8xf32>
    %33 = vector.shape_cast %32 : vector<1x8x8xf32> to vector<8x8xf32>
    %cst_17 = arith.constant dense<0.000000e+00> : vector<8xf32>
    %34 = vector.multi_reduction <add>, %33, %cst_17 [1] : vector<8x8xf32> to vector<8xf32>
    %35 = vector.shape_cast %34 : vector<8xf32> to vector<8x1xf32>
    %cst_18 = arith.constant 8.000000e+00 : f32
    %36 = vector.broadcast %cst_18 : f32 to vector<8x1xf32>
    %37 = arith.divf %35, %36 : vector<8x1xf32>
    %38 = vector.broadcast %37 : vector<8x1xf32> to vector<8x8xf32>
    %39 = arith.subf %33, %38 : vector<8x8xf32>
    %40 = arith.mulf %39, %39 : vector<8x8xf32>
    %cst_19 = arith.constant dense<0.000000e+00> : vector<8xf32>
    %41 = vector.multi_reduction <add>, %40, %cst_19 [1] : vector<8x8xf32> to vector<8xf32>
    %42 = vector.shape_cast %41 : vector<8xf32> to vector<8x1xf32>
    %cst_20 = arith.constant 8.000000e+00 : f32
    %43 = vector.broadcast %cst_20 : f32 to vector<8x1xf32>
    %44 = arith.divf %42, %43 : vector<8x1xf32>
    %45 = vector.broadcast %37 : vector<8x1xf32> to vector<8x8xf32>
    %46 = arith.subf %33, %45 : vector<8x8xf32>
    %cst_21 = arith.constant 9.99999997E-7 : f32
    %47 = vector.broadcast %cst_21 : f32 to vector<8x1xf32>
    %48 = arith.addf %44, %47 : vector<8x1xf32>
    %49 = math.rsqrt %48 : vector<8x1xf32>
    %50 = vector.broadcast %49 : vector<8x1xf32> to vector<8x8xf32>
    %51 = arith.mulf %46, %50 : vector<8x8xf32>
    %c0_22 = arith.constant 0 : index
    %c0_23 = arith.constant 0 : index
    %52 = vector.load %arg2[%c0_22, %c0_23] : memref<1x8xf32, #tpu.memory_space<vmem>>, vector<1x8xf32>
    %53 = vector.broadcast %52 : vector<1x8xf32> to vector<8x8xf32>
    %54 = arith.mulf %51, %53 : vector<8x8xf32>
    %c0_24 = arith.constant 0 : index
    %c0_25 = arith.constant 0 : index
    %55 = vector.load %arg3[%c0_24, %c0_25] : memref<1x8xf32, #tpu.memory_space<vmem>>, vector<1x8xf32>
    %56 = vector.broadcast %55 : vector<1x8xf32> to vector<8x8xf32>
    %57 = arith.addf %54, %56 : vector<8x8xf32>
    %58 = arith.truncf %57 : vector<8x8xf32> to vector<8x8xbf16>
    %c1_26 = arith.constant 1 : index
    %c0_27 = arith.constant 0 : index
    %c0_28 = arith.constant 0 : index
    %59 = vector.load %arg4[%c1_26, %c0_27, %c0_28] : memref<4x8x16xbf16, #tpu.memory_space<vmem>>, vector<1x8x16xbf16>
    %60 = vector.shape_cast %59 : vector<1x8x16xbf16> to vector<8x16xbf16>
    %cst_29 = arith.constant dense<0.000000e+00> : vector<8x16xf32>
    %61 = tpu.matmul %58, %60, %cst_29 {dimension_numbers = #tpu.dot_dimension_numbers<[1], [0], [0], [1], [0, 0, 1, 1], [], []>} : vector<8x8xbf16>, vector<8x16xbf16>, vector<8x16xf32> -> vector<8x16xf32>
    %62 = arith.addf %31, %61 : vector<8x16xf32>
    %c2 = arith.constant 2 : index
    %c0_30 = arith.constant 0 : index
    %c0_31 = arith.constant 0 : index
    %63 = vector.load %arg1[%c2, %c0_30, %c0_31] : memref<4x8x8xf32, #tpu.memory_space<vmem>>, vector<1x8x8xf32>
    %64 = vector.shape_cast %63 : vector<1x8x8xf32> to vector<8x8xf32>
    %cst_32 = arith.constant dense<0.000000e+00> : vector<8xf32>
    %65 = vector.multi_reduction <add>, %64, %cst_32 [1] : vector<8x8xf32> to vector<8xf32>
    %66 = vector.shape_cast %65 : vector<8xf32> to vector<8x1xf32>
    %cst_33 = arith.constant 8.000000e+00 : f32
    %67 = vector.broadcast %cst_33 : f32 to vector<8x1xf32>
    %68 = arith.divf %66, %67 : vector<8x1xf32>
    %69 = vector.broadcast %68 : vector<8x1xf32> to vector<8x8xf32>
    %70 = arith.subf %64, %69 : vector<8x8xf32>
    %71 = arith.mulf %70, %70 : vector<8x8xf32>
    %cst_34 = arith.constant dense<0.000000e+00> : vector<8xf32>
    %72 = vector.multi_reduction <add>, %71, %cst_34 [1] : vector<8x8xf32> to vector<8xf32>
    %73 = vector.shape_cast %72 : vector<8xf32> to vector<8x1xf32>
    %cst_35 = arith.constant 8.000000e+00 : f32
    %74 = vector.broadcast %cst_35 : f32 to vector<8x1xf32>
    %75 = arith.divf %73, %74 : vector<8x1xf32>
    %76 = vector.broadcast %68 : vector<8x1xf32> to vector<8x8xf32>
    %77 = arith.subf %64, %76 : vector<8x8xf32>
    %cst_36 = arith.constant 9.99999997E-7 : f32
    %78 = vector.broadcast %cst_36 : f32 to vector<8x1xf32>
    %79 = arith.addf %75, %78 : vector<8x1xf32>
    %80 = math.rsqrt %79 : vector<8x1xf32>
    %81 = vector.broadcast %80 : vector<8x1xf32> to vector<8x8xf32>
    %82 = arith.mulf %77, %81 : vector<8x8xf32>
    %c0_37 = arith.constant 0 : index
    %c0_38 = arith.constant 0 : index
    %83 = vector.load %arg2[%c0_37, %c0_38] : memref<1x8xf32, #tpu.memory_space<vmem>>, vector<1x8xf32>
    %84 = vector.broadcast %83 : vector<1x8xf32> to vector<8x8xf32>
    %85 = arith.mulf %82, %84 : vector<8x8xf32>
    %c0_39 = arith.constant 0 : index
    %c0_40 = arith.constant 0 : index
    %86 = vector.load %arg3[%c0_39, %c0_40] : memref<1x8xf32, #tpu.memory_space<vmem>>, vector<1x8xf32>
    %87 = vector.broadcast %86 : vector<1x8xf32> to vector<8x8xf32>
    %88 = arith.addf %85, %87 : vector<8x8xf32>
    %89 = arith.truncf %88 : vector<8x8xf32> to vector<8x8xbf16>
    %c2_41 = arith.constant 2 : index
    %c0_42 = arith.constant 0 : index
    %c0_43 = arith.constant 0 : index
    %90 = vector.load %arg4[%c2_41, %c0_42, %c0_43] : memref<4x8x16xbf16, #tpu.memory_space<vmem>>, vector<1x8x16xbf16>
    %91 = vector.shape_cast %90 : vector<1x8x16xbf16> to vector<8x16xbf16>
    %cst_44 = arith.constant dense<0.000000e+00> : vector<8x16xf32>
    %92 = tpu.matmul %89, %91, %cst_44 {dimension_numbers = #tpu.dot_dimension_numbers<[1], [0], [0], [1], [0, 0, 1, 1], [], []>} : vector<8x8xbf16>, vector<8x16xbf16>, vector<8x16xf32> -> vector<8x16xf32>
    %93 = arith.addf %62, %92 : vector<8x16xf32>
    %c3 = arith.constant 3 : index
    %c0_45 = arith.constant 0 : index
    %c0_46 = arith.constant 0 : index
    %94 = vector.load %arg1[%c3, %c0_45, %c0_46] : memref<4x8x8xf32, #tpu.memory_space<vmem>>, vector<1x8x8xf32>
    %95 = vector.shape_cast %94 : vector<1x8x8xf32> to vector<8x8xf32>
    %cst_47 = arith.constant dense<0.000000e+00> : vector<8xf32>
    %96 = vector.multi_reduction <add>, %95, %cst_47 [1] : vector<8x8xf32> to vector<8xf32>
    %97 = vector.shape_cast %96 : vector<8xf32> to vector<8x1xf32>
    %cst_48 = arith.constant 8.000000e+00 : f32
    %98 = vector.broadcast %cst_48 : f32 to vector<8x1xf32>
    %99 = arith.divf %97, %98 : vector<8x1xf32>
    %100 = vector.broadcast %99 : vector<8x1xf32> to vector<8x8xf32>
    %101 = arith.subf %95, %100 : vector<8x8xf32>
    %102 = arith.mulf %101, %101 : vector<8x8xf32>
    %cst_49 = arith.constant dense<0.000000e+00> : vector<8xf32>
    %103 = vector.multi_reduction <add>, %102, %cst_49 [1] : vector<8x8xf32> to vector<8xf32>
    %104 = vector.shape_cast %103 : vector<8xf32> to vector<8x1xf32>
    %cst_50 = arith.constant 8.000000e+00 : f32
    %105 = vector.broadcast %cst_50 : f32 to vector<8x1xf32>
    %106 = arith.divf %104, %105 : vector<8x1xf32>
    %107 = vector.broadcast %99 : vector<8x1xf32> to vector<8x8xf32>
    %108 = arith.subf %95, %107 : vector<8x8xf32>
    %cst_51 = arith.constant 9.99999997E-7 : f32
    %109 = vector.broadcast %cst_51 : f32 to vector<8x1xf32>
    %110 = arith.addf %106, %109 : vector<8x1xf32>
    %111 = math.rsqrt %110 : vector<8x1xf32>
    %112 = vector.broadcast %111 : vector<8x1xf32> to vector<8x8xf32>
    %113 = arith.mulf %108, %112 : vector<8x8xf32>
    %c0_52 = arith.constant 0 : index
    %c0_53 = arith.constant 0 : index
    %114 = vector.load %arg2[%c0_52, %c0_53] : memref<1x8xf32, #tpu.memory_space<vmem>>, vector<1x8xf32>
    %115 = vector.broadcast %114 : vector<1x8xf32> to vector<8x8xf32>
    %116 = arith.mulf %113, %115 : vector<8x8xf32>
    %c0_54 = arith.constant 0 : index
    %c0_55 = arith.constant 0 : index
    %117 = vector.load %arg3[%c0_54, %c0_55] : memref<1x8xf32, #tpu.memory_space<vmem>>, vector<1x8xf32>
    %118 = vector.broadcast %117 : vector<1x8xf32> to vector<8x8xf32>
    %119 = arith.addf %116, %118 : vector<8x8xf32>
    %120 = arith.truncf %119 : vector<8x8xf32> to vector<8x8xbf16>
    %c3_56 = arith.constant 3 : index
    %c0_57 = arith.constant 0 : index
    %c0_58 = arith.constant 0 : index
    %121 = vector.load %arg4[%c3_56, %c0_57, %c0_58] : memref<4x8x16xbf16, #tpu.memory_space<vmem>>, vector<1x8x16xbf16>
    %122 = vector.shape_cast %121 : vector<1x8x16xbf16> to vector<8x16xbf16>
    %cst_59 = arith.constant dense<0.000000e+00> : vector<8x16xf32>
    %123 = tpu.matmul %120, %122, %cst_59 {dimension_numbers = #tpu.dot_dimension_numbers<[1], [0], [0], [1], [0, 0, 1, 1], [], []>} : vector<8x8xbf16>, vector<8x16xbf16>, vector<8x16xf32> -> vector<8x16xf32>
    %124 = arith.addf %93, %123 : vector<8x16xf32>
    %c0_60 = arith.constant 0 : index
    %c0_61 = arith.constant 0 : index
    %125 = vector.load %arg5[%c0_60, %c0_61] : memref<1x16xf32, #tpu.memory_space<vmem>>, vector<1x16xf32>
    %126 = vector.broadcast %125 : vector<1x16xf32> to vector<8x16xf32>
    %127 = arith.addf %124, %126 : vector<8x16xf32>
    %c0_62 = arith.constant 0 : index
    %c0_63 = arith.constant 0 : index
    %128 = vector.load %arg6[%c0_62, %c0_63] : memref<8x16xf32, #tpu.memory_space<vmem>>, vector<8x16xf32>
    tpu.vector_store %arg6[%c0_62, %c0_63], %127 {strides = array<i32>} : memref<8x16xf32, #tpu.memory_space<vmem>>, vector<8x16xf32>,
    return
  }
  func.func @transform_0(%arg0: i32) -> (i32, i32, i32) {
    %c0_i32 = arith.constant 0 : i32
    %c0_i32_0 = arith.constant 0 : i32
    %c0_i32_1 = arith.constant 0 : i32
    return %c0_i32, %arg0, %c0_i32_0 : i32, i32, i32
  }
  func.func @transform_1(%arg0: i32) -> (i32, i32) {
    %c0_i32 = arith.constant 0 : i32
    %c0_i32_0 = arith.constant 0 : i32
    %c0_i32_1 = arith.constant 0 : i32
    return %c0_i32, %c0_i32_0 : i32, i32
  }
  func.func @transform_2(%arg0: i32) -> (i32, i32) {
    %c0_i32 = arith.constant 0 : i32
    %c0_i32_0 = arith.constant 0 : i32
    %c0_i32_1 = arith.constant 0 : i32
    return %c0_i32, %c0_i32_0 : i32, i32
  }
  func.func @transform_3(%arg0: i32) -> (i32, i32, i32) {
    %c0_i32 = arith.constant 0 : i32
    %c0_i32_0 = arith.constant 0 : i32
    %c0_i32_1 = arith.constant 0 : i32
    %c0_i32_2 = arith.constant 0 : i32
    return %c0_i32, %c0_i32_0, %c0_i32_1 : i32, i32, i32
  }
  func.func @transform_4(%arg0: i32) -> (i32, i32) {
    %c0_i32 = arith.constant 0 : i32
    %c0_i32_0 = arith.constant 0 : i32
    %c0_i32_1 = arith.constant 0 : i32
    return %c0_i32, %c0_i32_0 : i32, i32
  }
  func.func @transform_5(%arg0: i32) -> (i32, i32) {
    %c0_i32 = arith.constant 0 : i32
    %c0_i32_0 = arith.constant 0 : i32
    return %arg0, %c0_i32 : i32, i32
  }
}

module attributes {stable_mosaic.version = 11 : i64} {
  func.func @_dwconv_kernel(%arg0: i32, %arg1: memref<1x8x8x16xf32, #tpu.memory_space<vmem>>, %arg2: memref<49x16xf32, #tpu.memory_space<vmem>>, %arg3: memref<1x16xf32, #tpu.memory_space<vmem>>, %arg4: memref<1x2x2x16xf32, #tpu.memory_space<vmem>>) attributes {dimension_semantics = [#tpu.dimension_semantics<parallel>], iteration_bounds = array<i64: 2>, scalar_prefetch = 0 : i64, scratch_operands = 0 : i64, tpu.core_type = #tpu.core_type<tc>, window_params = [{transform_indices = @transform_0, window_bounds = array<i64: 1, 8, 8, 16>}, {pipeline_mode = #tpu.pipeline_mode<synchronous>, transform_indices = @transform_1, window_bounds = array<i64: 49, 16>}, {pipeline_mode = #tpu.pipeline_mode<synchronous>, transform_indices = @transform_2, window_bounds = array<i64: 1, 16>}, {transform_indices = @transform_3, window_bounds = array<i64: 1, 2, 2, 16>}]} {
    %cst = arith.constant 0.000000e+00 : f32
    %0 = vector.broadcast %cst : f32 to vector<2x2x16xf32>
    %c0 = arith.constant 0 : index
    %c0_0 = arith.constant 0 : index
    %c0_1 = arith.constant 0 : index
    %c0_2 = arith.constant 0 : index
    %1 = vector.load %arg1[%c0, %c0_0, %c0_1, %c0_2] : memref<1x8x8x16xf32, #tpu.memory_space<vmem>>, vector<1x2x2x16xf32>
    %2 = vector.shape_cast %1 : vector<1x2x2x16xf32> to vector<2x2x16xf32>
    %c0_3 = arith.constant 0 : index
    %c0_4 = arith.constant 0 : index
    %3 = vector.load %arg2[%c0_3, %c0_4] : memref<49x16xf32, #tpu.memory_space<vmem>>, vector<1x16xf32>
    %4 = vector.shape_cast %3 : vector<1x16xf32> to vector<16xf32>
    %5 = vector.shape_cast %4 : vector<16xf32> to vector<1x1x16xf32>
    %6 = vector.broadcast %5 : vector<1x1x16xf32> to vector<2x2x16xf32>
    %7 = arith.mulf %2, %6 : vector<2x2x16xf32>
    %8 = arith.addf %0, %7 : vector<2x2x16xf32>
    %c0_5 = arith.constant 0 : index
    %c0_6 = arith.constant 0 : index
    %c1 = arith.constant 1 : index
    %c0_7 = arith.constant 0 : index
    %9 = vector.load %arg1[%c0_5, %c0_6, %c1, %c0_7] : memref<1x8x8x16xf32, #tpu.memory_space<vmem>>, vector<1x2x2x16xf32>
    %10 = vector.shape_cast %9 : vector<1x2x2x16xf32> to vector<2x2x16xf32>
    %c1_8 = arith.constant 1 : index
    %c0_9 = arith.constant 0 : index
    %11 = vector.load %arg2[%c1_8, %c0_9] : memref<49x16xf32, #tpu.memory_space<vmem>>, vector<1x16xf32>
    %12 = vector.shape_cast %11 : vector<1x16xf32> to vector<16xf32>
    %13 = vector.shape_cast %12 : vector<16xf32> to vector<1x1x16xf32>
    %14 = vector.broadcast %13 : vector<1x1x16xf32> to vector<2x2x16xf32>
    %15 = arith.mulf %10, %14 : vector<2x2x16xf32>
    %16 = arith.addf %8, %15 : vector<2x2x16xf32>
    %c0_10 = arith.constant 0 : index
    %c0_11 = arith.constant 0 : index
    %c2 = arith.constant 2 : index
    %c0_12 = arith.constant 0 : index
    %17 = vector.load %arg1[%c0_10, %c0_11, %c2, %c0_12] : memref<1x8x8x16xf32, #tpu.memory_space<vmem>>, vector<1x2x2x16xf32>
    %18 = vector.shape_cast %17 : vector<1x2x2x16xf32> to vector<2x2x16xf32>
    %c2_13 = arith.constant 2 : index
    %c0_14 = arith.constant 0 : index
    %19 = vector.load %arg2[%c2_13, %c0_14] : memref<49x16xf32, #tpu.memory_space<vmem>>, vector<1x16xf32>
    %20 = vector.shape_cast %19 : vector<1x16xf32> to vector<16xf32>
    %21 = vector.shape_cast %20 : vector<16xf32> to vector<1x1x16xf32>
    %22 = vector.broadcast %21 : vector<1x1x16xf32> to vector<2x2x16xf32>
    %23 = arith.mulf %18, %22 : vector<2x2x16xf32>
    %24 = arith.addf %16, %23 : vector<2x2x16xf32>
    %c0_15 = arith.constant 0 : index
    %c0_16 = arith.constant 0 : index
    %c3 = arith.constant 3 : index
    %c0_17 = arith.constant 0 : index
    %25 = vector.load %arg1[%c0_15, %c0_16, %c3, %c0_17] : memref<1x8x8x16xf32, #tpu.memory_space<vmem>>, vector<1x2x2x16xf32>
    %26 = vector.shape_cast %25 : vector<1x2x2x16xf32> to vector<2x2x16xf32>
    %c3_18 = arith.constant 3 : index
    %c0_19 = arith.constant 0 : index
    %27 = vector.load %arg2[%c3_18, %c0_19] : memref<49x16xf32, #tpu.memory_space<vmem>>, vector<1x16xf32>
    %28 = vector.shape_cast %27 : vector<1x16xf32> to vector<16xf32>
    %29 = vector.shape_cast %28 : vector<16xf32> to vector<1x1x16xf32>
    %30 = vector.broadcast %29 : vector<1x1x16xf32> to vector<2x2x16xf32>
    %31 = arith.mulf %26, %30 : vector<2x2x16xf32>
    %32 = arith.addf %24, %31 : vector<2x2x16xf32>
    %c0_20 = arith.constant 0 : index
    %c0_21 = arith.constant 0 : index
    %c4 = arith.constant 4 : index
    %c0_22 = arith.constant 0 : index
    %33 = vector.load %arg1[%c0_20, %c0_21, %c4, %c0_22] : memref<1x8x8x16xf32, #tpu.memory_space<vmem>>, vector<1x2x2x16xf32>
    %34 = vector.shape_cast %33 : vector<1x2x2x16xf32> to vector<2x2x16xf32>
    %c4_23 = arith.constant 4 : index
    %c0_24 = arith.constant 0 : index
    %35 = vector.load %arg2[%c4_23, %c0_24] : memref<49x16xf32, #tpu.memory_space<vmem>>, vector<1x16xf32>
    %36 = vector.shape_cast %35 : vector<1x16xf32> to vector<16xf32>
    %37 = vector.shape_cast %36 : vector<16xf32> to vector<1x1x16xf32>
    %38 = vector.broadcast %37 : vector<1x1x16xf32> to vector<2x2x16xf32>
    %39 = arith.mulf %34, %38 : vector<2x2x16xf32>
    %40 = arith.addf %32, %39 : vector<2x2x16xf32>
    %c0_25 = arith.constant 0 : index
    %c0_26 = arith.constant 0 : index
    %c5 = arith.constant 5 : index
    %c0_27 = arith.constant 0 : index
    %41 = vector.load %arg1[%c0_25, %c0_26, %c5, %c0_27] : memref<1x8x8x16xf32, #tpu.memory_space<vmem>>, vector<1x2x2x16xf32>
    %42 = vector.shape_cast %41 : vector<1x2x2x16xf32> to vector<2x2x16xf32>
    %c5_28 = arith.constant 5 : index
    %c0_29 = arith.constant 0 : index
    %43 = vector.load %arg2[%c5_28, %c0_29] : memref<49x16xf32, #tpu.memory_space<vmem>>, vector<1x16xf32>
    %44 = vector.shape_cast %43 : vector<1x16xf32> to vector<16xf32>
    %45 = vector.shape_cast %44 : vector<16xf32> to vector<1x1x16xf32>
    %46 = vector.broadcast %45 : vector<1x1x16xf32> to vector<2x2x16xf32>
    %47 = arith.mulf %42, %46 : vector<2x2x16xf32>
    %48 = arith.addf %40, %47 : vector<2x2x16xf32>
    %c0_30 = arith.constant 0 : index
    %c0_31 = arith.constant 0 : index
    %c6 = arith.constant 6 : index
    %c0_32 = arith.constant 0 : index
    %49 = vector.load %arg1[%c0_30, %c0_31, %c6, %c0_32] : memref<1x8x8x16xf32, #tpu.memory_space<vmem>>, vector<1x2x2x16xf32>
    %50 = vector.shape_cast %49 : vector<1x2x2x16xf32> to vector<2x2x16xf32>
    %c6_33 = arith.constant 6 : index
    %c0_34 = arith.constant 0 : index
    %51 = vector.load %arg2[%c6_33, %c0_34] : memref<49x16xf32, #tpu.memory_space<vmem>>, vector<1x16xf32>
    %52 = vector.shape_cast %51 : vector<1x16xf32> to vector<16xf32>
    %53 = vector.shape_cast %52 : vector<16xf32> to vector<1x1x16xf32>
    %54 = vector.broadcast %53 : vector<1x1x16xf32> to vector<2x2x16xf32>
    %55 = arith.mulf %50, %54 : vector<2x2x16xf32>
    %56 = arith.addf %48, %55 : vector<2x2x16xf32>
    %c0_35 = arith.constant 0 : index
    %c1_36 = arith.constant 1 : index
    %c0_37 = arith.constant 0 : index
    %c0_38 = arith.constant 0 : index
    %57 = vector.load %arg1[%c0_35, %c1_36, %c0_37, %c0_38] : memref<1x8x8x16xf32, #tpu.memory_space<vmem>>, vector<1x2x2x16xf32>
    %58 = vector.shape_cast %57 : vector<1x2x2x16xf32> to vector<2x2x16xf32>
    %c7 = arith.constant 7 : index
    %c0_39 = arith.constant 0 : index
    %59 = vector.load %arg2[%c7, %c0_39] : memref<49x16xf32, #tpu.memory_space<vmem>>, vector<1x16xf32>
    %60 = vector.shape_cast %59 : vector<1x16xf32> to vector<16xf32>
    %61 = vector.shape_cast %60 : vector<16xf32> to vector<1x1x16xf32>
    %62 = vector.broadcast %61 : vector<1x1x16xf32> to vector<2x2x16xf32>
    %63 = arith.mulf %58, %62 : vector<2x2x16xf32>
    %64 = arith.addf %56, %63 : vector<2x2x16xf32>
    %c0_40 = arith.constant 0 : index
    %c1_41 = arith.constant 1 : index
    %c1_42 = arith.constant 1 : index
    %c0_43 = arith.constant 0 : index
    %65 = vector.load %arg1[%c0_40, %c1_41, %c1_42, %c0_43] : memref<1x8x8x16xf32, #tpu.memory_space<vmem>>, vector<1x2x2x16xf32>
    %66 = vector.shape_cast %65 : vector<1x2x2x16xf32> to vector<2x2x16xf32>
    %c8 = arith.constant 8 : index
    %c0_44 = arith.constant 0 : index
    %67 = vector.load %arg2[%c8, %c0_44] : memref<49x16xf32, #tpu.memory_space<vmem>>, vector<1x16xf32>
    %68 = vector.shape_cast %67 : vector<1x16xf32> to vector<16xf32>
    %69 = vector.shape_cast %68 : vector<16xf32> to vector<1x1x16xf32>
    %70 = vector.broadcast %69 : vector<1x1x16xf32> to vector<2x2x16xf32>
    %71 = arith.mulf %66, %70 : vector<2x2x16xf32>
    %72 = arith.addf %64, %71 : vector<2x2x16xf32>
    %c0_45 = arith.constant 0 : index
    %c1_46 = arith.constant 1 : index
    %c2_47 = arith.constant 2 : index
    %c0_48 = arith.constant 0 : index
    %73 = vector.load %arg1[%c0_45, %c1_46, %c2_47, %c0_48] : memref<1x8x8x16xf32, #tpu.memory_space<vmem>>, vector<1x2x2x16xf32>
    %74 = vector.shape_cast %73 : vector<1x2x2x16xf32> to vector<2x2x16xf32>
    %c9 = arith.constant 9 : index
    %c0_49 = arith.constant 0 : index
    %75 = vector.load %arg2[%c9, %c0_49] : memref<49x16xf32, #tpu.memory_space<vmem>>, vector<1x16xf32>
    %76 = vector.shape_cast %75 : vector<1x16xf32> to vector<16xf32>
    %77 = vector.shape_cast %76 : vector<16xf32> to vector<1x1x16xf32>
    %78 = vector.broadcast %77 : vector<1x1x16xf32> to vector<2x2x16xf32>
    %79 = arith.mulf %74, %78 : vector<2x2x16xf32>
    %80 = arith.addf %72, %79 : vector<2x2x16xf32>
    %c0_50 = arith.constant 0 : index
    %c1_51 = arith.constant 1 : index
    %c3_52 = arith.constant 3 : index
    %c0_53 = arith.constant 0 : index
    %81 = vector.load %arg1[%c0_50, %c1_51, %c3_52, %c0_53] : memref<1x8x8x16xf32, #tpu.memory_space<vmem>>, vector<1x2x2x16xf32>
    %82 = vector.shape_cast %81 : vector<1x2x2x16xf32> to vector<2x2x16xf32>
    %c10 = arith.constant 10 : index
    %c0_54 = arith.constant 0 : index
    %83 = vector.load %arg2[%c10, %c0_54] : memref<49x16xf32, #tpu.memory_space<vmem>>, vector<1x16xf32>
    %84 = vector.shape_cast %83 : vector<1x16xf32> to vector<16xf32>
    %85 = vector.shape_cast %84 : vector<16xf32> to vector<1x1x16xf32>
    %86 = vector.broadcast %85 : vector<1x1x16xf32> to vector<2x2x16xf32>
    %87 = arith.mulf %82, %86 : vector<2x2x16xf32>
    %88 = arith.addf %80, %87 : vector<2x2x16xf32>
    %c0_55 = arith.constant 0 : index
    %c1_56 = arith.constant 1 : index
    %c4_57 = arith.constant 4 : index
    %c0_58 = arith.constant 0 : index
    %89 = vector.load %arg1[%c0_55, %c1_56, %c4_57, %c0_58] : memref<1x8x8x16xf32, #tpu.memory_space<vmem>>, vector<1x2x2x16xf32>
    %90 = vector.shape_cast %89 : vector<1x2x2x16xf32> to vector<2x2x16xf32>
    %c11 = arith.constant 11 : index
    %c0_59 = arith.constant 0 : index
    %91 = vector.load %arg2[%c11, %c0_59] : memref<49x16xf32, #tpu.memory_space<vmem>>, vector<1x16xf32>
    %92 = vector.shape_cast %91 : vector<1x16xf32> to vector<16xf32>
    %93 = vector.shape_cast %92 : vector<16xf32> to vector<1x1x16xf32>
    %94 = vector.broadcast %93 : vector<1x1x16xf32> to vector<2x2x16xf32>
    %95 = arith.mulf %90, %94 : vector<2x2x16xf32>
    %96 = arith.addf %88, %95 : vector<2x2x16xf32>
    %c0_60 = arith.constant 0 : index
    %c1_61 = arith.constant 1 : index
    %c5_62 = arith.constant 5 : index
    %c0_63 = arith.constant 0 : index
    %97 = vector.load %arg1[%c0_60, %c1_61, %c5_62, %c0_63] : memref<1x8x8x16xf32, #tpu.memory_space<vmem>>, vector<1x2x2x16xf32>
    %98 = vector.shape_cast %97 : vector<1x2x2x16xf32> to vector<2x2x16xf32>
    %c12 = arith.constant 12 : index
    %c0_64 = arith.constant 0 : index
    %99 = vector.load %arg2[%c12, %c0_64] : memref<49x16xf32, #tpu.memory_space<vmem>>, vector<1x16xf32>
    %100 = vector.shape_cast %99 : vector<1x16xf32> to vector<16xf32>
    %101 = vector.shape_cast %100 : vector<16xf32> to vector<1x1x16xf32>
    %102 = vector.broadcast %101 : vector<1x1x16xf32> to vector<2x2x16xf32>
    %103 = arith.mulf %98, %102 : vector<2x2x16xf32>
    %104 = arith.addf %96, %103 : vector<2x2x16xf32>
    %c0_65 = arith.constant 0 : index
    %c1_66 = arith.constant 1 : index
    %c6_67 = arith.constant 6 : index
    %c0_68 = arith.constant 0 : index
    %105 = vector.load %arg1[%c0_65, %c1_66, %c6_67, %c0_68] : memref<1x8x8x16xf32, #tpu.memory_space<vmem>>, vector<1x2x2x16xf32>
    %106 = vector.shape_cast %105 : vector<1x2x2x16xf32> to vector<2x2x16xf32>
    %c13 = arith.constant 13 : index
    %c0_69 = arith.constant 0 : index
    %107 = vector.load %arg2[%c13, %c0_69] : memref<49x16xf32, #tpu.memory_space<vmem>>, vector<1x16xf32>
    %108 = vector.shape_cast %107 : vector<1x16xf32> to vector<16xf32>
    %109 = vector.shape_cast %108 : vector<16xf32> to vector<1x1x16xf32>
    %110 = vector.broadcast %109 : vector<1x1x16xf32> to vector<2x2x16xf32>
    %111 = arith.mulf %106, %110 : vector<2x2x16xf32>
    %112 = arith.addf %104, %111 : vector<2x2x16xf32>
    %c0_70 = arith.constant 0 : index
    %c2_71 = arith.constant 2 : index
    %c0_72 = arith.constant 0 : index
    %c0_73 = arith.constant 0 : index
    %113 = vector.load %arg1[%c0_70, %c2_71, %c0_72, %c0_73] : memref<1x8x8x16xf32, #tpu.memory_space<vmem>>, vector<1x2x2x16xf32>
    %114 = vector.shape_cast %113 : vector<1x2x2x16xf32> to vector<2x2x16xf32>
    %c14 = arith.constant 14 : index
    %c0_74 = arith.constant 0 : index
    %115 = vector.load %arg2[%c14, %c0_74] : memref<49x16xf32, #tpu.memory_space<vmem>>, vector<1x16xf32>
    %116 = vector.shape_cast %115 : vector<1x16xf32> to vector<16xf32>
    %117 = vector.shape_cast %116 : vector<16xf32> to vector<1x1x16xf32>
    %118 = vector.broadcast %117 : vector<1x1x16xf32> to vector<2x2x16xf32>
    %119 = arith.mulf %114, %118 : vector<2x2x16xf32>
    %120 = arith.addf %112, %119 : vector<2x2x16xf32>
    %c0_75 = arith.constant 0 : index
    %c2_76 = arith.constant 2 : index
    %c1_77 = arith.constant 1 : index
    %c0_78 = arith.constant 0 : index
    %121 = vector.load %arg1[%c0_75, %c2_76, %c1_77, %c0_78] : memref<1x8x8x16xf32, #tpu.memory_space<vmem>>, vector<1x2x2x16xf32>
    %122 = vector.shape_cast %121 : vector<1x2x2x16xf32> to vector<2x2x16xf32>
    %c15 = arith.constant 15 : index
    %c0_79 = arith.constant 0 : index
    %123 = vector.load %arg2[%c15, %c0_79] : memref<49x16xf32, #tpu.memory_space<vmem>>, vector<1x16xf32>
    %124 = vector.shape_cast %123 : vector<1x16xf32> to vector<16xf32>
    %125 = vector.shape_cast %124 : vector<16xf32> to vector<1x1x16xf32>
    %126 = vector.broadcast %125 : vector<1x1x16xf32> to vector<2x2x16xf32>
    %127 = arith.mulf %122, %126 : vector<2x2x16xf32>
    %128 = arith.addf %120, %127 : vector<2x2x16xf32>
    %c0_80 = arith.constant 0 : index
    %c2_81 = arith.constant 2 : index
    %c2_82 = arith.constant 2 : index
    %c0_83 = arith.constant 0 : index
    %129 = vector.load %arg1[%c0_80, %c2_81, %c2_82, %c0_83] : memref<1x8x8x16xf32, #tpu.memory_space<vmem>>, vector<1x2x2x16xf32>
    %130 = vector.shape_cast %129 : vector<1x2x2x16xf32> to vector<2x2x16xf32>
    %c16 = arith.constant 16 : index
    %c0_84 = arith.constant 0 : index
    %131 = vector.load %arg2[%c16, %c0_84] : memref<49x16xf32, #tpu.memory_space<vmem>>, vector<1x16xf32>
    %132 = vector.shape_cast %131 : vector<1x16xf32> to vector<16xf32>
    %133 = vector.shape_cast %132 : vector<16xf32> to vector<1x1x16xf32>
    %134 = vector.broadcast %133 : vector<1x1x16xf32> to vector<2x2x16xf32>
    %135 = arith.mulf %130, %134 : vector<2x2x16xf32>
    %136 = arith.addf %128, %135 : vector<2x2x16xf32>
    %c0_85 = arith.constant 0 : index
    %c2_86 = arith.constant 2 : index
    %c3_87 = arith.constant 3 : index
    %c0_88 = arith.constant 0 : index
    %137 = vector.load %arg1[%c0_85, %c2_86, %c3_87, %c0_88] : memref<1x8x8x16xf32, #tpu.memory_space<vmem>>, vector<1x2x2x16xf32>
    %138 = vector.shape_cast %137 : vector<1x2x2x16xf32> to vector<2x2x16xf32>
    %c17 = arith.constant 17 : index
    %c0_89 = arith.constant 0 : index
    %139 = vector.load %arg2[%c17, %c0_89] : memref<49x16xf32, #tpu.memory_space<vmem>>, vector<1x16xf32>
    %140 = vector.shape_cast %139 : vector<1x16xf32> to vector<16xf32>
    %141 = vector.shape_cast %140 : vector<16xf32> to vector<1x1x16xf32>
    %142 = vector.broadcast %141 : vector<1x1x16xf32> to vector<2x2x16xf32>
    %143 = arith.mulf %138, %142 : vector<2x2x16xf32>
    %144 = arith.addf %136, %143 : vector<2x2x16xf32>
    %c0_90 = arith.constant 0 : index
    %c2_91 = arith.constant 2 : index
    %c4_92 = arith.constant 4 : index
    %c0_93 = arith.constant 0 : index
    %145 = vector.load %arg1[%c0_90, %c2_91, %c4_92, %c0_93] : memref<1x8x8x16xf32, #tpu.memory_space<vmem>>, vector<1x2x2x16xf32>
    %146 = vector.shape_cast %145 : vector<1x2x2x16xf32> to vector<2x2x16xf32>
    %c18 = arith.constant 18 : index
    %c0_94 = arith.constant 0 : index
    %147 = vector.load %arg2[%c18, %c0_94] : memref<49x16xf32, #tpu.memory_space<vmem>>, vector<1x16xf32>
    %148 = vector.shape_cast %147 : vector<1x16xf32> to vector<16xf32>
    %149 = vector.shape_cast %148 : vector<16xf32> to vector<1x1x16xf32>
    %150 = vector.broadcast %149 : vector<1x1x16xf32> to vector<2x2x16xf32>
    %151 = arith.mulf %146, %150 : vector<2x2x16xf32>
    %152 = arith.addf %144, %151 : vector<2x2x16xf32>
    %c0_95 = arith.constant 0 : index
    %c2_96 = arith.constant 2 : index
    %c5_97 = arith.constant 5 : index
    %c0_98 = arith.constant 0 : index
    %153 = vector.load %arg1[%c0_95, %c2_96, %c5_97, %c0_98] : memref<1x8x8x16xf32, #tpu.memory_space<vmem>>, vector<1x2x2x16xf32>
    %154 = vector.shape_cast %153 : vector<1x2x2x16xf32> to vector<2x2x16xf32>
    %c19 = arith.constant 19 : index
    %c0_99 = arith.constant 0 : index
    %155 = vector.load %arg2[%c19, %c0_99] : memref<49x16xf32, #tpu.memory_space<vmem>>, vector<1x16xf32>
    %156 = vector.shape_cast %155 : vector<1x16xf32> to vector<16xf32>
    %157 = vector.shape_cast %156 : vector<16xf32> to vector<1x1x16xf32>
    %158 = vector.broadcast %157 : vector<1x1x16xf32> to vector<2x2x16xf32>
    %159 = arith.mulf %154, %158 : vector<2x2x16xf32>
    %160 = arith.addf %152, %159 : vector<2x2x16xf32>
    %c0_100 = arith.constant 0 : index
    %c2_101 = arith.constant 2 : index
    %c6_102 = arith.constant 6 : index
    %c0_103 = arith.constant 0 : index
    %161 = vector.load %arg1[%c0_100, %c2_101, %c6_102, %c0_103] : memref<1x8x8x16xf32, #tpu.memory_space<vmem>>, vector<1x2x2x16xf32>
    %162 = vector.shape_cast %161 : vector<1x2x2x16xf32> to vector<2x2x16xf32>
    %c20 = arith.constant 20 : index
    %c0_104 = arith.constant 0 : index
    %163 = vector.load %arg2[%c20, %c0_104] : memref<49x16xf32, #tpu.memory_space<vmem>>, vector<1x16xf32>
    %164 = vector.shape_cast %163 : vector<1x16xf32> to vector<16xf32>
    %165 = vector.shape_cast %164 : vector<16xf32> to vector<1x1x16xf32>
    %166 = vector.broadcast %165 : vector<1x1x16xf32> to vector<2x2x16xf32>
    %167 = arith.mulf %162, %166 : vector<2x2x16xf32>
    %168 = arith.addf %160, %167 : vector<2x2x16xf32>
    %c0_105 = arith.constant 0 : index
    %c3_106 = arith.constant 3 : index
    %c0_107 = arith.constant 0 : index
    %c0_108 = arith.constant 0 : index
    %169 = vector.load %arg1[%c0_105, %c3_106, %c0_107, %c0_108] : memref<1x8x8x16xf32, #tpu.memory_space<vmem>>, vector<1x2x2x16xf32>
    %170 = vector.shape_cast %169 : vector<1x2x2x16xf32> to vector<2x2x16xf32>
    %c21 = arith.constant 21 : index
    %c0_109 = arith.constant 0 : index
    %171 = vector.load %arg2[%c21, %c0_109] : memref<49x16xf32, #tpu.memory_space<vmem>>, vector<1x16xf32>
    %172 = vector.shape_cast %171 : vector<1x16xf32> to vector<16xf32>
    %173 = vector.shape_cast %172 : vector<16xf32> to vector<1x1x16xf32>
    %174 = vector.broadcast %173 : vector<1x1x16xf32> to vector<2x2x16xf32>
    %175 = arith.mulf %170, %174 : vector<2x2x16xf32>
    %176 = arith.addf %168, %175 : vector<2x2x16xf32>
    %c0_110 = arith.constant 0 : index
    %c3_111 = arith.constant 3 : index
    %c1_112 = arith.constant 1 : index
    %c0_113 = arith.constant 0 : index
    %177 = vector.load %arg1[%c0_110, %c3_111, %c1_112, %c0_113] : memref<1x8x8x16xf32, #tpu.memory_space<vmem>>, vector<1x2x2x16xf32>
    %178 = vector.shape_cast %177 : vector<1x2x2x16xf32> to vector<2x2x16xf32>
    %c22 = arith.constant 22 : index
    %c0_114 = arith.constant 0 : index
    %179 = vector.load %arg2[%c22, %c0_114] : memref<49x16xf32, #tpu.memory_space<vmem>>, vector<1x16xf32>
    %180 = vector.shape_cast %179 : vector<1x16xf32> to vector<16xf32>
    %181 = vector.shape_cast %180 : vector<16xf32> to vector<1x1x16xf32>
    %182 = vector.broadcast %181 : vector<1x1x16xf32> to vector<2x2x16xf32>
    %183 = arith.mulf %178, %182 : vector<2x2x16xf32>
    %184 = arith.addf %176, %183 : vector<2x2x16xf32>
    %c0_115 = arith.constant 0 : index
    %c3_116 = arith.constant 3 : index
    %c2_117 = arith.constant 2 : index
    %c0_118 = arith.constant 0 : index
    %185 = vector.load %arg1[%c0_115, %c3_116, %c2_117, %c0_118] : memref<1x8x8x16xf32, #tpu.memory_space<vmem>>, vector<1x2x2x16xf32>
    %186 = vector.shape_cast %185 : vector<1x2x2x16xf32> to vector<2x2x16xf32>
    %c23 = arith.constant 23 : index
    %c0_119 = arith.constant 0 : index
    %187 = vector.load %arg2[%c23, %c0_119] : memref<49x16xf32, #tpu.memory_space<vmem>>, vector<1x16xf32>
    %188 = vector.shape_cast %187 : vector<1x16xf32> to vector<16xf32>
    %189 = vector.shape_cast %188 : vector<16xf32> to vector<1x1x16xf32>
    %190 = vector.broadcast %189 : vector<1x1x16xf32> to vector<2x2x16xf32>
    %191 = arith.mulf %186, %190 : vector<2x2x16xf32>
    %192 = arith.addf %184, %191 : vector<2x2x16xf32>
    %c0_120 = arith.constant 0 : index
    %c3_121 = arith.constant 3 : index
    %c3_122 = arith.constant 3 : index
    %c0_123 = arith.constant 0 : index
    %193 = vector.load %arg1[%c0_120, %c3_121, %c3_122, %c0_123] : memref<1x8x8x16xf32, #tpu.memory_space<vmem>>, vector<1x2x2x16xf32>
    %194 = vector.shape_cast %193 : vector<1x2x2x16xf32> to vector<2x2x16xf32>
    %c24 = arith.constant 24 : index
    %c0_124 = arith.constant 0 : index
    %195 = vector.load %arg2[%c24, %c0_124] : memref<49x16xf32, #tpu.memory_space<vmem>>, vector<1x16xf32>
    %196 = vector.shape_cast %195 : vector<1x16xf32> to vector<16xf32>
    %197 = vector.shape_cast %196 : vector<16xf32> to vector<1x1x16xf32>
    %198 = vector.broadcast %197 : vector<1x1x16xf32> to vector<2x2x16xf32>
    %199 = arith.mulf %194, %198 : vector<2x2x16xf32>
    %200 = arith.addf %192, %199 : vector<2x2x16xf32>
    %c0_125 = arith.constant 0 : index
    %c3_126 = arith.constant 3 : index
    %c4_127 = arith.constant 4 : index
    %c0_128 = arith.constant 0 : index
    %201 = vector.load %arg1[%c0_125, %c3_126, %c4_127, %c0_128] : memref<1x8x8x16xf32, #tpu.memory_space<vmem>>, vector<1x2x2x16xf32>
    %202 = vector.shape_cast %201 : vector<1x2x2x16xf32> to vector<2x2x16xf32>
    %c25 = arith.constant 25 : index
    %c0_129 = arith.constant 0 : index
    %203 = vector.load %arg2[%c25, %c0_129] : memref<49x16xf32, #tpu.memory_space<vmem>>, vector<1x16xf32>
    %204 = vector.shape_cast %203 : vector<1x16xf32> to vector<16xf32>
    %205 = vector.shape_cast %204 : vector<16xf32> to vector<1x1x16xf32>
    %206 = vector.broadcast %205 : vector<1x1x16xf32> to vector<2x2x16xf32>
    %207 = arith.mulf %202, %206 : vector<2x2x16xf32>
    %208 = arith.addf %200, %207 : vector<2x2x16xf32>
    %c0_130 = arith.constant 0 : index
    %c3_131 = arith.constant 3 : index
    %c5_132 = arith.constant 5 : index
    %c0_133 = arith.constant 0 : index
    %209 = vector.load %arg1[%c0_130, %c3_131, %c5_132, %c0_133] : memref<1x8x8x16xf32, #tpu.memory_space<vmem>>, vector<1x2x2x16xf32>
    %210 = vector.shape_cast %209 : vector<1x2x2x16xf32> to vector<2x2x16xf32>
    %c26 = arith.constant 26 : index
    %c0_134 = arith.constant 0 : index
    %211 = vector.load %arg2[%c26, %c0_134] : memref<49x16xf32, #tpu.memory_space<vmem>>, vector<1x16xf32>
    %212 = vector.shape_cast %211 : vector<1x16xf32> to vector<16xf32>
    %213 = vector.shape_cast %212 : vector<16xf32> to vector<1x1x16xf32>
    %214 = vector.broadcast %213 : vector<1x1x16xf32> to vector<2x2x16xf32>
    %215 = arith.mulf %210, %214 : vector<2x2x16xf32>
    %216 = arith.addf %208, %215 : vector<2x2x16xf32>
    %c0_135 = arith.constant 0 : index
    %c3_136 = arith.constant 3 : index
    %c6_137 = arith.constant 6 : index
    %c0_138 = arith.constant 0 : index
    %217 = vector.load %arg1[%c0_135, %c3_136, %c6_137, %c0_138] : memref<1x8x8x16xf32, #tpu.memory_space<vmem>>, vector<1x2x2x16xf32>
    %218 = vector.shape_cast %217 : vector<1x2x2x16xf32> to vector<2x2x16xf32>
    %c27 = arith.constant 27 : index
    %c0_139 = arith.constant 0 : index
    %219 = vector.load %arg2[%c27, %c0_139] : memref<49x16xf32, #tpu.memory_space<vmem>>, vector<1x16xf32>
    %220 = vector.shape_cast %219 : vector<1x16xf32> to vector<16xf32>
    %221 = vector.shape_cast %220 : vector<16xf32> to vector<1x1x16xf32>
    %222 = vector.broadcast %221 : vector<1x1x16xf32> to vector<2x2x16xf32>
    %223 = arith.mulf %218, %222 : vector<2x2x16xf32>
    %224 = arith.addf %216, %223 : vector<2x2x16xf32>
    %c0_140 = arith.constant 0 : index
    %c4_141 = arith.constant 4 : index
    %c0_142 = arith.constant 0 : index
    %c0_143 = arith.constant 0 : index
    %225 = vector.load %arg1[%c0_140, %c4_141, %c0_142, %c0_143] : memref<1x8x8x16xf32, #tpu.memory_space<vmem>>, vector<1x2x2x16xf32>
    %226 = vector.shape_cast %225 : vector<1x2x2x16xf32> to vector<2x2x16xf32>
    %c28 = arith.constant 28 : index
    %c0_144 = arith.constant 0 : index
    %227 = vector.load %arg2[%c28, %c0_144] : memref<49x16xf32, #tpu.memory_space<vmem>>, vector<1x16xf32>
    %228 = vector.shape_cast %227 : vector<1x16xf32> to vector<16xf32>
    %229 = vector.shape_cast %228 : vector<16xf32> to vector<1x1x16xf32>
    %230 = vector.broadcast %229 : vector<1x1x16xf32> to vector<2x2x16xf32>
    %231 = arith.mulf %226, %230 : vector<2x2x16xf32>
    %232 = arith.addf %224, %231 : vector<2x2x16xf32>
    %c0_145 = arith.constant 0 : index
    %c4_146 = arith.constant 4 : index
    %c1_147 = arith.constant 1 : index
    %c0_148 = arith.constant 0 : index
    %233 = vector.load %arg1[%c0_145, %c4_146, %c1_147, %c0_148] : memref<1x8x8x16xf32, #tpu.memory_space<vmem>>, vector<1x2x2x16xf32>
    %234 = vector.shape_cast %233 : vector<1x2x2x16xf32> to vector<2x2x16xf32>
    %c29 = arith.constant 29 : index
    %c0_149 = arith.constant 0 : index
    %235 = vector.load %arg2[%c29, %c0_149] : memref<49x16xf32, #tpu.memory_space<vmem>>, vector<1x16xf32>
    %236 = vector.shape_cast %235 : vector<1x16xf32> to vector<16xf32>
    %237 = vector.shape_cast %236 : vector<16xf32> to vector<1x1x16xf32>
    %238 = vector.broadcast %237 : vector<1x1x16xf32> to vector<2x2x16xf32>
    %239 = arith.mulf %234, %238 : vector<2x2x16xf32>
    %240 = arith.addf %232, %239 : vector<2x2x16xf32>
    %c0_150 = arith.constant 0 : index
    %c4_151 = arith.constant 4 : index
    %c2_152 = arith.constant 2 : index
    %c0_153 = arith.constant 0 : index
    %241 = vector.load %arg1[%c0_150, %c4_151, %c2_152, %c0_153] : memref<1x8x8x16xf32, #tpu.memory_space<vmem>>, vector<1x2x2x16xf32>
    %242 = vector.shape_cast %241 : vector<1x2x2x16xf32> to vector<2x2x16xf32>
    %c30 = arith.constant 30 : index
    %c0_154 = arith.constant 0 : index
    %243 = vector.load %arg2[%c30, %c0_154] : memref<49x16xf32, #tpu.memory_space<vmem>>, vector<1x16xf32>
    %244 = vector.shape_cast %243 : vector<1x16xf32> to vector<16xf32>
    %245 = vector.shape_cast %244 : vector<16xf32> to vector<1x1x16xf32>
    %246 = vector.broadcast %245 : vector<1x1x16xf32> to vector<2x2x16xf32>
    %247 = arith.mulf %242, %246 : vector<2x2x16xf32>
    %248 = arith.addf %240, %247 : vector<2x2x16xf32>
    %c0_155 = arith.constant 0 : index
    %c4_156 = arith.constant 4 : index
    %c3_157 = arith.constant 3 : index
    %c0_158 = arith.constant 0 : index
    %249 = vector.load %arg1[%c0_155, %c4_156, %c3_157, %c0_158] : memref<1x8x8x16xf32, #tpu.memory_space<vmem>>, vector<1x2x2x16xf32>
    %250 = vector.shape_cast %249 : vector<1x2x2x16xf32> to vector<2x2x16xf32>
    %c31 = arith.constant 31 : index
    %c0_159 = arith.constant 0 : index
    %251 = vector.load %arg2[%c31, %c0_159] : memref<49x16xf32, #tpu.memory_space<vmem>>, vector<1x16xf32>
    %252 = vector.shape_cast %251 : vector<1x16xf32> to vector<16xf32>
    %253 = vector.shape_cast %252 : vector<16xf32> to vector<1x1x16xf32>
    %254 = vector.broadcast %253 : vector<1x1x16xf32> to vector<2x2x16xf32>
    %255 = arith.mulf %250, %254 : vector<2x2x16xf32>
    %256 = arith.addf %248, %255 : vector<2x2x16xf32>
    %c0_160 = arith.constant 0 : index
    %c4_161 = arith.constant 4 : index
    %c4_162 = arith.constant 4 : index
    %c0_163 = arith.constant 0 : index
    %257 = vector.load %arg1[%c0_160, %c4_161, %c4_162, %c0_163] : memref<1x8x8x16xf32, #tpu.memory_space<vmem>>, vector<1x2x2x16xf32>
    %258 = vector.shape_cast %257 : vector<1x2x2x16xf32> to vector<2x2x16xf32>
    %c32 = arith.constant 32 : index
    %c0_164 = arith.constant 0 : index
    %259 = vector.load %arg2[%c32, %c0_164] : memref<49x16xf32, #tpu.memory_space<vmem>>, vector<1x16xf32>
    %260 = vector.shape_cast %259 : vector<1x16xf32> to vector<16xf32>
    %261 = vector.shape_cast %260 : vector<16xf32> to vector<1x1x16xf32>
    %262 = vector.broadcast %261 : vector<1x1x16xf32> to vector<2x2x16xf32>
    %263 = arith.mulf %258, %262 : vector<2x2x16xf32>
    %264 = arith.addf %256, %263 : vector<2x2x16xf32>
    %c0_165 = arith.constant 0 : index
    %c4_166 = arith.constant 4 : index
    %c5_167 = arith.constant 5 : index
    %c0_168 = arith.constant 0 : index
    %265 = vector.load %arg1[%c0_165, %c4_166, %c5_167, %c0_168] : memref<1x8x8x16xf32, #tpu.memory_space<vmem>>, vector<1x2x2x16xf32>
    %266 = vector.shape_cast %265 : vector<1x2x2x16xf32> to vector<2x2x16xf32>
    %c33 = arith.constant 33 : index
    %c0_169 = arith.constant 0 : index
    %267 = vector.load %arg2[%c33, %c0_169] : memref<49x16xf32, #tpu.memory_space<vmem>>, vector<1x16xf32>
    %268 = vector.shape_cast %267 : vector<1x16xf32> to vector<16xf32>
    %269 = vector.shape_cast %268 : vector<16xf32> to vector<1x1x16xf32>
    %270 = vector.broadcast %269 : vector<1x1x16xf32> to vector<2x2x16xf32>
    %271 = arith.mulf %266, %270 : vector<2x2x16xf32>
    %272 = arith.addf %264, %271 : vector<2x2x16xf32>
    %c0_170 = arith.constant 0 : index
    %c4_171 = arith.constant 4 : index
    %c6_172 = arith.constant 6 : index
    %c0_173 = arith.constant 0 : index
    %273 = vector.load %arg1[%c0_170, %c4_171, %c6_172, %c0_173] : memref<1x8x8x16xf32, #tpu.memory_space<vmem>>, vector<1x2x2x16xf32>
    %274 = vector.shape_cast %273 : vector<1x2x2x16xf32> to vector<2x2x16xf32>
    %c34 = arith.constant 34 : index
    %c0_174 = arith.constant 0 : index
    %275 = vector.load %arg2[%c34, %c0_174] : memref<49x16xf32, #tpu.memory_space<vmem>>, vector<1x16xf32>
    %276 = vector.shape_cast %275 : vector<1x16xf32> to vector<16xf32>
    %277 = vector.shape_cast %276 : vector<16xf32> to vector<1x1x16xf32>
    %278 = vector.broadcast %277 : vector<1x1x16xf32> to vector<2x2x16xf32>
    %279 = arith.mulf %274, %278 : vector<2x2x16xf32>
    %280 = arith.addf %272, %279 : vector<2x2x16xf32>
    %c0_175 = arith.constant 0 : index
    %c5_176 = arith.constant 5 : index
    %c0_177 = arith.constant 0 : index
    %c0_178 = arith.constant 0 : index
    %281 = vector.load %arg1[%c0_175, %c5_176, %c0_177, %c0_178] : memref<1x8x8x16xf32, #tpu.memory_space<vmem>>, vector<1x2x2x16xf32>
    %282 = vector.shape_cast %281 : vector<1x2x2x16xf32> to vector<2x2x16xf32>
    %c35 = arith.constant 35 : index
    %c0_179 = arith.constant 0 : index
    %283 = vector.load %arg2[%c35, %c0_179] : memref<49x16xf32, #tpu.memory_space<vmem>>, vector<1x16xf32>
    %284 = vector.shape_cast %283 : vector<1x16xf32> to vector<16xf32>
    %285 = vector.shape_cast %284 : vector<16xf32> to vector<1x1x16xf32>
    %286 = vector.broadcast %285 : vector<1x1x16xf32> to vector<2x2x16xf32>
    %287 = arith.mulf %282, %286 : vector<2x2x16xf32>
    %288 = arith.addf %280, %287 : vector<2x2x16xf32>
    %c0_180 = arith.constant 0 : index
    %c5_181 = arith.constant 5 : index
    %c1_182 = arith.constant 1 : index
    %c0_183 = arith.constant 0 : index
    %289 = vector.load %arg1[%c0_180, %c5_181, %c1_182, %c0_183] : memref<1x8x8x16xf32, #tpu.memory_space<vmem>>, vector<1x2x2x16xf32>
    %290 = vector.shape_cast %289 : vector<1x2x2x16xf32> to vector<2x2x16xf32>
    %c36 = arith.constant 36 : index
    %c0_184 = arith.constant 0 : index
    %291 = vector.load %arg2[%c36, %c0_184] : memref<49x16xf32, #tpu.memory_space<vmem>>, vector<1x16xf32>
    %292 = vector.shape_cast %291 : vector<1x16xf32> to vector<16xf32>
    %293 = vector.shape_cast %292 : vector<16xf32> to vector<1x1x16xf32>
    %294 = vector.broadcast %293 : vector<1x1x16xf32> to vector<2x2x16xf32>
    %295 = arith.mulf %290, %294 : vector<2x2x16xf32>
    %296 = arith.addf %288, %295 : vector<2x2x16xf32>
    %c0_185 = arith.constant 0 : index
    %c5_186 = arith.constant 5 : index
    %c2_187 = arith.constant 2 : index
    %c0_188 = arith.constant 0 : index
    %297 = vector.load %arg1[%c0_185, %c5_186, %c2_187, %c0_188] : memref<1x8x8x16xf32, #tpu.memory_space<vmem>>, vector<1x2x2x16xf32>
    %298 = vector.shape_cast %297 : vector<1x2x2x16xf32> to vector<2x2x16xf32>
    %c37 = arith.constant 37 : index
    %c0_189 = arith.constant 0 : index
    %299 = vector.load %arg2[%c37, %c0_189] : memref<49x16xf32, #tpu.memory_space<vmem>>, vector<1x16xf32>
    %300 = vector.shape_cast %299 : vector<1x16xf32> to vector<16xf32>
    %301 = vector.shape_cast %300 : vector<16xf32> to vector<1x1x16xf32>
    %302 = vector.broadcast %301 : vector<1x1x16xf32> to vector<2x2x16xf32>
    %303 = arith.mulf %298, %302 : vector<2x2x16xf32>
    %304 = arith.addf %296, %303 : vector<2x2x16xf32>
    %c0_190 = arith.constant 0 : index
    %c5_191 = arith.constant 5 : index
    %c3_192 = arith.constant 3 : index
    %c0_193 = arith.constant 0 : index
    %305 = vector.load %arg1[%c0_190, %c5_191, %c3_192, %c0_193] : memref<1x8x8x16xf32, #tpu.memory_space<vmem>>, vector<1x2x2x16xf32>
    %306 = vector.shape_cast %305 : vector<1x2x2x16xf32> to vector<2x2x16xf32>
    %c38 = arith.constant 38 : index
    %c0_194 = arith.constant 0 : index
    %307 = vector.load %arg2[%c38, %c0_194] : memref<49x16xf32, #tpu.memory_space<vmem>>, vector<1x16xf32>
    %308 = vector.shape_cast %307 : vector<1x16xf32> to vector<16xf32>
    %309 = vector.shape_cast %308 : vector<16xf32> to vector<1x1x16xf32>
    %310 = vector.broadcast %309 : vector<1x1x16xf32> to vector<2x2x16xf32>
    %311 = arith.mulf %306, %310 : vector<2x2x16xf32>
    %312 = arith.addf %304, %311 : vector<2x2x16xf32>
    %c0_195 = arith.constant 0 : index
    %c5_196 = arith.constant 5 : index
    %c4_197 = arith.constant 4 : index
    %c0_198 = arith.constant 0 : index
    %313 = vector.load %arg1[%c0_195, %c5_196, %c4_197, %c0_198] : memref<1x8x8x16xf32, #tpu.memory_space<vmem>>, vector<1x2x2x16xf32>
    %314 = vector.shape_cast %313 : vector<1x2x2x16xf32> to vector<2x2x16xf32>
    %c39 = arith.constant 39 : index
    %c0_199 = arith.constant 0 : index
    %315 = vector.load %arg2[%c39, %c0_199] : memref<49x16xf32, #tpu.memory_space<vmem>>, vector<1x16xf32>
    %316 = vector.shape_cast %315 : vector<1x16xf32> to vector<16xf32>
    %317 = vector.shape_cast %316 : vector<16xf32> to vector<1x1x16xf32>
    %318 = vector.broadcast %317 : vector<1x1x16xf32> to vector<2x2x16xf32>
    %319 = arith.mulf %314, %318 : vector<2x2x16xf32>
    %320 = arith.addf %312, %319 : vector<2x2x16xf32>
    %c0_200 = arith.constant 0 : index
    %c5_201 = arith.constant 5 : index
    %c5_202 = arith.constant 5 : index
    %c0_203 = arith.constant 0 : index
    %321 = vector.load %arg1[%c0_200, %c5_201, %c5_202, %c0_203] : memref<1x8x8x16xf32, #tpu.memory_space<vmem>>, vector<1x2x2x16xf32>
    %322 = vector.shape_cast %321 : vector<1x2x2x16xf32> to vector<2x2x16xf32>
    %c40 = arith.constant 40 : index
    %c0_204 = arith.constant 0 : index
    %323 = vector.load %arg2[%c40, %c0_204] : memref<49x16xf32, #tpu.memory_space<vmem>>, vector<1x16xf32>
    %324 = vector.shape_cast %323 : vector<1x16xf32> to vector<16xf32>
    %325 = vector.shape_cast %324 : vector<16xf32> to vector<1x1x16xf32>
    %326 = vector.broadcast %325 : vector<1x1x16xf32> to vector<2x2x16xf32>
    %327 = arith.mulf %322, %326 : vector<2x2x16xf32>
    %328 = arith.addf %320, %327 : vector<2x2x16xf32>
    %c0_205 = arith.constant 0 : index
    %c5_206 = arith.constant 5 : index
    %c6_207 = arith.constant 6 : index
    %c0_208 = arith.constant 0 : index
    %329 = vector.load %arg1[%c0_205, %c5_206, %c6_207, %c0_208] : memref<1x8x8x16xf32, #tpu.memory_space<vmem>>, vector<1x2x2x16xf32>
    %330 = vector.shape_cast %329 : vector<1x2x2x16xf32> to vector<2x2x16xf32>
    %c41 = arith.constant 41 : index
    %c0_209 = arith.constant 0 : index
    %331 = vector.load %arg2[%c41, %c0_209] : memref<49x16xf32, #tpu.memory_space<vmem>>, vector<1x16xf32>
    %332 = vector.shape_cast %331 : vector<1x16xf32> to vector<16xf32>
    %333 = vector.shape_cast %332 : vector<16xf32> to vector<1x1x16xf32>
    %334 = vector.broadcast %333 : vector<1x1x16xf32> to vector<2x2x16xf32>
    %335 = arith.mulf %330, %334 : vector<2x2x16xf32>
    %336 = arith.addf %328, %335 : vector<2x2x16xf32>
    %c0_210 = arith.constant 0 : index
    %c6_211 = arith.constant 6 : index
    %c0_212 = arith.constant 0 : index
    %c0_213 = arith.constant 0 : index
    %337 = vector.load %arg1[%c0_210, %c6_211, %c0_212, %c0_213] : memref<1x8x8x16xf32, #tpu.memory_space<vmem>>, vector<1x2x2x16xf32>
    %338 = vector.shape_cast %337 : vector<1x2x2x16xf32> to vector<2x2x16xf32>
    %c42 = arith.constant 42 : index
    %c0_214 = arith.constant 0 : index
    %339 = vector.load %arg2[%c42, %c0_214] : memref<49x16xf32, #tpu.memory_space<vmem>>, vector<1x16xf32>
    %340 = vector.shape_cast %339 : vector<1x16xf32> to vector<16xf32>
    %341 = vector.shape_cast %340 : vector<16xf32> to vector<1x1x16xf32>
    %342 = vector.broadcast %341 : vector<1x1x16xf32> to vector<2x2x16xf32>
    %343 = arith.mulf %338, %342 : vector<2x2x16xf32>
    %344 = arith.addf %336, %343 : vector<2x2x16xf32>
    %c0_215 = arith.constant 0 : index
    %c6_216 = arith.constant 6 : index
    %c1_217 = arith.constant 1 : index
    %c0_218 = arith.constant 0 : index
    %345 = vector.load %arg1[%c0_215, %c6_216, %c1_217, %c0_218] : memref<1x8x8x16xf32, #tpu.memory_space<vmem>>, vector<1x2x2x16xf32>
    %346 = vector.shape_cast %345 : vector<1x2x2x16xf32> to vector<2x2x16xf32>
    %c43 = arith.constant 43 : index
    %c0_219 = arith.constant 0 : index
    %347 = vector.load %arg2[%c43, %c0_219] : memref<49x16xf32, #tpu.memory_space<vmem>>, vector<1x16xf32>
    %348 = vector.shape_cast %347 : vector<1x16xf32> to vector<16xf32>
    %349 = vector.shape_cast %348 : vector<16xf32> to vector<1x1x16xf32>
    %350 = vector.broadcast %349 : vector<1x1x16xf32> to vector<2x2x16xf32>
    %351 = arith.mulf %346, %350 : vector<2x2x16xf32>
    %352 = arith.addf %344, %351 : vector<2x2x16xf32>
    %c0_220 = arith.constant 0 : index
    %c6_221 = arith.constant 6 : index
    %c2_222 = arith.constant 2 : index
    %c0_223 = arith.constant 0 : index
    %353 = vector.load %arg1[%c0_220, %c6_221, %c2_222, %c0_223] : memref<1x8x8x16xf32, #tpu.memory_space<vmem>>, vector<1x2x2x16xf32>
    %354 = vector.shape_cast %353 : vector<1x2x2x16xf32> to vector<2x2x16xf32>
    %c44 = arith.constant 44 : index
    %c0_224 = arith.constant 0 : index
    %355 = vector.load %arg2[%c44, %c0_224] : memref<49x16xf32, #tpu.memory_space<vmem>>, vector<1x16xf32>
    %356 = vector.shape_cast %355 : vector<1x16xf32> to vector<16xf32>
    %357 = vector.shape_cast %356 : vector<16xf32> to vector<1x1x16xf32>
    %358 = vector.broadcast %357 : vector<1x1x16xf32> to vector<2x2x16xf32>
    %359 = arith.mulf %354, %358 : vector<2x2x16xf32>
    %360 = arith.addf %352, %359 : vector<2x2x16xf32>
    %c0_225 = arith.constant 0 : index
    %c6_226 = arith.constant 6 : index
    %c3_227 = arith.constant 3 : index
    %c0_228 = arith.constant 0 : index
    %361 = vector.load %arg1[%c0_225, %c6_226, %c3_227, %c0_228] : memref<1x8x8x16xf32, #tpu.memory_space<vmem>>, vector<1x2x2x16xf32>
    %362 = vector.shape_cast %361 : vector<1x2x2x16xf32> to vector<2x2x16xf32>
    %c45 = arith.constant 45 : index
    %c0_229 = arith.constant 0 : index
    %363 = vector.load %arg2[%c45, %c0_229] : memref<49x16xf32, #tpu.memory_space<vmem>>, vector<1x16xf32>
    %364 = vector.shape_cast %363 : vector<1x16xf32> to vector<16xf32>
    %365 = vector.shape_cast %364 : vector<16xf32> to vector<1x1x16xf32>
    %366 = vector.broadcast %365 : vector<1x1x16xf32> to vector<2x2x16xf32>
    %367 = arith.mulf %362, %366 : vector<2x2x16xf32>
    %368 = arith.addf %360, %367 : vector<2x2x16xf32>
    %c0_230 = arith.constant 0 : index
    %c6_231 = arith.constant 6 : index
    %c4_232 = arith.constant 4 : index
    %c0_233 = arith.constant 0 : index
    %369 = vector.load %arg1[%c0_230, %c6_231, %c4_232, %c0_233] : memref<1x8x8x16xf32, #tpu.memory_space<vmem>>, vector<1x2x2x16xf32>
    %370 = vector.shape_cast %369 : vector<1x2x2x16xf32> to vector<2x2x16xf32>
    %c46 = arith.constant 46 : index
    %c0_234 = arith.constant 0 : index
    %371 = vector.load %arg2[%c46, %c0_234] : memref<49x16xf32, #tpu.memory_space<vmem>>, vector<1x16xf32>
    %372 = vector.shape_cast %371 : vector<1x16xf32> to vector<16xf32>
    %373 = vector.shape_cast %372 : vector<16xf32> to vector<1x1x16xf32>
    %374 = vector.broadcast %373 : vector<1x1x16xf32> to vector<2x2x16xf32>
    %375 = arith.mulf %370, %374 : vector<2x2x16xf32>
    %376 = arith.addf %368, %375 : vector<2x2x16xf32>
    %c0_235 = arith.constant 0 : index
    %c6_236 = arith.constant 6 : index
    %c5_237 = arith.constant 5 : index
    %c0_238 = arith.constant 0 : index
    %377 = vector.load %arg1[%c0_235, %c6_236, %c5_237, %c0_238] : memref<1x8x8x16xf32, #tpu.memory_space<vmem>>, vector<1x2x2x16xf32>
    %378 = vector.shape_cast %377 : vector<1x2x2x16xf32> to vector<2x2x16xf32>
    %c47 = arith.constant 47 : index
    %c0_239 = arith.constant 0 : index
    %379 = vector.load %arg2[%c47, %c0_239] : memref<49x16xf32, #tpu.memory_space<vmem>>, vector<1x16xf32>
    %380 = vector.shape_cast %379 : vector<1x16xf32> to vector<16xf32>
    %381 = vector.shape_cast %380 : vector<16xf32> to vector<1x1x16xf32>
    %382 = vector.broadcast %381 : vector<1x1x16xf32> to vector<2x2x16xf32>
    %383 = arith.mulf %378, %382 : vector<2x2x16xf32>
    %384 = arith.addf %376, %383 : vector<2x2x16xf32>
    %c0_240 = arith.constant 0 : index
    %c6_241 = arith.constant 6 : index
    %c6_242 = arith.constant 6 : index
    %c0_243 = arith.constant 0 : index
    %385 = vector.load %arg1[%c0_240, %c6_241, %c6_242, %c0_243] : memref<1x8x8x16xf32, #tpu.memory_space<vmem>>, vector<1x2x2x16xf32>
    %386 = vector.shape_cast %385 : vector<1x2x2x16xf32> to vector<2x2x16xf32>
    %c48 = arith.constant 48 : index
    %c0_244 = arith.constant 0 : index
    %387 = vector.load %arg2[%c48, %c0_244] : memref<49x16xf32, #tpu.memory_space<vmem>>, vector<1x16xf32>
    %388 = vector.shape_cast %387 : vector<1x16xf32> to vector<16xf32>
    %389 = vector.shape_cast %388 : vector<16xf32> to vector<1x1x16xf32>
    %390 = vector.broadcast %389 : vector<1x1x16xf32> to vector<2x2x16xf32>
    %391 = arith.mulf %386, %390 : vector<2x2x16xf32>
    %392 = arith.addf %384, %391 : vector<2x2x16xf32>
    %c0_245 = arith.constant 0 : index
    %c0_246 = arith.constant 0 : index
    %393 = vector.load %arg3[%c0_245, %c0_246] : memref<1x16xf32, #tpu.memory_space<vmem>>, vector<1x16xf32>
    %394 = vector.shape_cast %393 : vector<1x16xf32> to vector<16xf32>
    %395 = vector.shape_cast %394 : vector<16xf32> to vector<1x1x16xf32>
    %396 = vector.broadcast %395 : vector<1x1x16xf32> to vector<2x2x16xf32>
    %397 = arith.addf %392, %396 : vector<2x2x16xf32>
    %c0_247 = arith.constant 0 : index
    %c0_248 = arith.constant 0 : index
    %c0_249 = arith.constant 0 : index
    %c0_250 = arith.constant 0 : index
    %398 = vector.load %arg4[%c0_247, %c0_248, %c0_249, %c0_250] : memref<1x2x2x16xf32, #tpu.memory_space<vmem>>, vector<1x2x2x16xf32>
    %399 = vector.shape_cast %398 : vector<1x2x2x16xf32> to vector<2x2x16xf32>
    %400 = vector.shape_cast %397 : vector<2x2x16xf32> to vector<1x2x2x16xf32>
    tpu.vector_store %arg4[%c0_247, %c0_248, %c0_249, %c0_250], %400 {strides = array<i32>} : memref<1x2x2x16xf32, #tpu.memory_space<vmem>>, vector<1x2x2x16xf32>,
    return
  }
  func.func @transform_0(%arg0: i32) -> (i32, i32, i32, i32) {
    %c0_i32 = arith.constant 0 : i32
    %c0_i32_0 = arith.constant 0 : i32
    %c0_i32_1 = arith.constant 0 : i32
    %c0_i32_2 = arith.constant 0 : i32
    return %arg0, %c0_i32, %c0_i32_0, %c0_i32_1 : i32, i32, i32, i32
  }
  func.func @transform_1(%arg0: i32) -> (i32, i32) {
    %c0_i32 = arith.constant 0 : i32
    %c0_i32_0 = arith.constant 0 : i32
    %c0_i32_1 = arith.constant 0 : i32
    return %c0_i32, %c0_i32_0 : i32, i32
  }
  func.func @transform_2(%arg0: i32) -> (i32, i32) {
    %c0_i32 = arith.constant 0 : i32
    %c0_i32_0 = arith.constant 0 : i32
    %c0_i32_1 = arith.constant 0 : i32
    return %c0_i32, %c0_i32_0 : i32, i32
  }
  func.func @transform_3(%arg0: i32) -> (i32, i32, i32, i32) {
    %c0_i32 = arith.constant 0 : i32
    %c0_i32_0 = arith.constant 0 : i32
    %c0_i32_1 = arith.constant 0 : i32
    %c0_i32_2 = arith.constant 0 : i32
    return %arg0, %c0_i32, %c0_i32_0, %c0_i32_1 : i32, i32, i32, i32
  }
}

module attributes {stable_mosaic.version = 11 : i64} {
  func.func @_block_mlp_kernel(%arg0: i32, %arg1: memref<8x16xf32, #tpu.memory_space<vmem>>, %arg2: memref<8x16xf32, #tpu.memory_space<vmem>>, %arg3: memref<1x16xf32, #tpu.memory_space<vmem>>, %arg4: memref<1x16xf32, #tpu.memory_space<vmem>>, %arg5: memref<16x64xbf16, #tpu.memory_space<vmem>>, %arg6: memref<1x64xf32, #tpu.memory_space<vmem>>, %arg7: memref<64x16xbf16, #tpu.memory_space<vmem>>, %arg8: memref<1x16xf32, #tpu.memory_space<vmem>>, %arg9: memref<8x16xf32, #tpu.memory_space<vmem>>) attributes {dimension_semantics = [#tpu.dimension_semantics<parallel>], iteration_bounds = array<i64: 1>, scalar_prefetch = 0 : i64, scratch_operands = 0 : i64, tpu.core_type = #tpu.core_type<tc>, window_params = [{transform_indices = @transform_0, window_bounds = array<i64: 8, 16>}, {transform_indices = @transform_1, window_bounds = array<i64: 8, 16>}, {pipeline_mode = #tpu.pipeline_mode<synchronous>, transform_indices = @transform_2, window_bounds = array<i64: 1, 16>}, {pipeline_mode = #tpu.pipeline_mode<synchronous>, transform_indices = @transform_3, window_bounds = array<i64: 1, 16>}, {pipeline_mode = #tpu.pipeline_mode<synchronous>, transform_indices = @transform_4, window_bounds = array<i64: 16, 64>}, {pipeline_mode = #tpu.pipeline_mode<synchronous>, transform_indices = @transform_5, window_bounds = array<i64: 1, 64>}, {pipeline_mode = #tpu.pipeline_mode<synchronous>, transform_indices = @transform_6, window_bounds = array<i64: 64, 16>}, {pipeline_mode = #tpu.pipeline_mode<synchronous>, transform_indices = @transform_7, window_bounds = array<i64: 1, 16>}, {transform_indices = @transform_8, window_bounds = array<i64: 8, 16>}]} {
    %c0 = arith.constant 0 : index
    %c0_0 = arith.constant 0 : index
    %0 = vector.load %arg1[%c0, %c0_0] : memref<8x16xf32, #tpu.memory_space<vmem>>, vector<8x16xf32>
    %cst = arith.constant dense<0.000000e+00> : vector<8xf32>
    %1 = vector.multi_reduction <add>, %0, %cst [1] : vector<8x16xf32> to vector<8xf32>
    %2 = vector.shape_cast %1 : vector<8xf32> to vector<8x1xf32>
    %cst_1 = arith.constant 1.600000e+01 : f32
    %3 = vector.broadcast %cst_1 : f32 to vector<8x1xf32>
    %4 = arith.divf %2, %3 : vector<8x1xf32>
    %5 = vector.broadcast %4 : vector<8x1xf32> to vector<8x16xf32>
    %6 = arith.subf %0, %5 : vector<8x16xf32>
    %7 = arith.mulf %6, %6 : vector<8x16xf32>
    %cst_2 = arith.constant dense<0.000000e+00> : vector<8xf32>
    %8 = vector.multi_reduction <add>, %7, %cst_2 [1] : vector<8x16xf32> to vector<8xf32>
    %9 = vector.shape_cast %8 : vector<8xf32> to vector<8x1xf32>
    %cst_3 = arith.constant 1.600000e+01 : f32
    %10 = vector.broadcast %cst_3 : f32 to vector<8x1xf32>
    %11 = arith.divf %9, %10 : vector<8x1xf32>
    %12 = vector.broadcast %4 : vector<8x1xf32> to vector<8x16xf32>
    %13 = arith.subf %0, %12 : vector<8x16xf32>
    %cst_4 = arith.constant 9.99999997E-7 : f32
    %14 = vector.broadcast %cst_4 : f32 to vector<8x1xf32>
    %15 = arith.addf %11, %14 : vector<8x1xf32>
    %16 = math.rsqrt %15 : vector<8x1xf32>
    %17 = vector.broadcast %16 : vector<8x1xf32> to vector<8x16xf32>
    %18 = arith.mulf %13, %17 : vector<8x16xf32>
    %c0_5 = arith.constant 0 : index
    %c0_6 = arith.constant 0 : index
    %19 = vector.load %arg3[%c0_5, %c0_6] : memref<1x16xf32, #tpu.memory_space<vmem>>, vector<1x16xf32>
    %20 = vector.broadcast %19 : vector<1x16xf32> to vector<8x16xf32>
    %21 = arith.mulf %18, %20 : vector<8x16xf32>
    %c0_7 = arith.constant 0 : index
    %c0_8 = arith.constant 0 : index
    %22 = vector.load %arg4[%c0_7, %c0_8] : memref<1x16xf32, #tpu.memory_space<vmem>>, vector<1x16xf32>
    %23 = vector.broadcast %22 : vector<1x16xf32> to vector<8x16xf32>
    %24 = arith.addf %21, %23 : vector<8x16xf32>
    %25 = arith.truncf %24 : vector<8x16xf32> to vector<8x16xbf16>
    %c0_9 = arith.constant 0 : index
    %c0_10 = arith.constant 0 : index
    %26 = vector.load %arg5[%c0_9, %c0_10] : memref<16x64xbf16, #tpu.memory_space<vmem>>, vector<16x64xbf16>
    %cst_11 = arith.constant dense<0.000000e+00> : vector<8x64xf32>
    %27 = tpu.matmul %25, %26, %cst_11 {dimension_numbers = #tpu.dot_dimension_numbers<[1], [0], [0], [1], [0, 0, 1, 1], [], []>} : vector<8x16xbf16>, vector<16x64xbf16>, vector<8x64xf32> -> vector<8x64xf32>
    %c0_12 = arith.constant 0 : index
    %c0_13 = arith.constant 0 : index
    %28 = vector.load %arg6[%c0_12, %c0_13] : memref<1x64xf32, #tpu.memory_space<vmem>>, vector<1x64xf32>
    %29 = vector.broadcast %28 : vector<1x64xf32> to vector<8x64xf32>
    %30 = arith.addf %27, %29 : vector<8x64xf32>
    %31 = arith.mulf %30, %30 : vector<8x64xf32>
    %32 = arith.mulf %30, %31 : vector<8x64xf32>
    %cst_14 = arith.constant 4.471500e-02 : f32
    %33 = vector.broadcast %cst_14 : f32 to vector<8x64xf32>
    %34 = arith.mulf %33, %32 : vector<8x64xf32>
    %35 = arith.addf %30, %34 : vector<8x64xf32>
    %cst_15 = arith.constant 0.797884583 : f32
    %36 = vector.broadcast %cst_15 : f32 to vector<8x64xf32>
    %37 = arith.mulf %36, %35 : vector<8x64xf32>
    %38 = math.tanh %37 : vector<8x64xf32>
    %cst_16 = arith.constant 1.000000e+00 : f32
    %39 = vector.broadcast %cst_16 : f32 to vector<8x64xf32>
    %40 = arith.addf %39, %38 : vector<8x64xf32>
    %cst_17 = arith.constant 5.000000e-01 : f32
    %41 = vector.broadcast %cst_17 : f32 to vector<8x64xf32>
    %42 = arith.mulf %41, %40 : vector<8x64xf32>
    %43 = arith.mulf %30, %42 : vector<8x64xf32>
    %44 = arith.truncf %43 : vector<8x64xf32> to vector<8x64xbf16>
    %c0_18 = arith.constant 0 : index
    %c0_19 = arith.constant 0 : index
    %45 = vector.load %arg7[%c0_18, %c0_19] : memref<64x16xbf16, #tpu.memory_space<vmem>>, vector<64x16xbf16>
    %cst_20 = arith.constant dense<0.000000e+00> : vector<8x16xf32>
    %46 = tpu.matmul %44, %45, %cst_20 {dimension_numbers = #tpu.dot_dimension_numbers<[1], [0], [0], [1], [0, 0, 1, 1], [], []>} : vector<8x64xbf16>, vector<64x16xbf16>, vector<8x16xf32> -> vector<8x16xf32>
    %c0_21 = arith.constant 0 : index
    %c0_22 = arith.constant 0 : index
    %47 = vector.load %arg8[%c0_21, %c0_22] : memref<1x16xf32, #tpu.memory_space<vmem>>, vector<1x16xf32>
    %48 = vector.broadcast %47 : vector<1x16xf32> to vector<8x16xf32>
    %49 = arith.addf %46, %48 : vector<8x16xf32>
    %c0_23 = arith.constant 0 : index
    %c0_24 = arith.constant 0 : index
    %50 = vector.load %arg2[%c0_23, %c0_24] : memref<8x16xf32, #tpu.memory_space<vmem>>, vector<8x16xf32>
    %51 = arith.addf %50, %49 : vector<8x16xf32>
    %c0_25 = arith.constant 0 : index
    %c0_26 = arith.constant 0 : index
    %52 = vector.load %arg9[%c0_25, %c0_26] : memref<8x16xf32, #tpu.memory_space<vmem>>, vector<8x16xf32>
    tpu.vector_store %arg9[%c0_25, %c0_26], %51 {strides = array<i32>} : memref<8x16xf32, #tpu.memory_space<vmem>>, vector<8x16xf32>,
    return
  }
  func.func @transform_0(%arg0: i32) -> (i32, i32) {
    %c0_i32 = arith.constant 0 : i32
    %c0_i32_0 = arith.constant 0 : i32
    return %arg0, %c0_i32 : i32, i32
  }
  func.func @transform_1(%arg0: i32) -> (i32, i32) {
    %c0_i32 = arith.constant 0 : i32
    %c0_i32_0 = arith.constant 0 : i32
    return %arg0, %c0_i32 : i32, i32
  }
  func.func @transform_2(%arg0: i32) -> (i32, i32) {
    %c0_i32 = arith.constant 0 : i32
    %c0_i32_0 = arith.constant 0 : i32
    %c0_i32_1 = arith.constant 0 : i32
    return %c0_i32, %c0_i32_0 : i32, i32
  }
  func.func @transform_3(%arg0: i32) -> (i32, i32) {
    %c0_i32 = arith.constant 0 : i32
    %c0_i32_0 = arith.constant 0 : i32
    %c0_i32_1 = arith.constant 0 : i32
    return %c0_i32, %c0_i32_0 : i32, i32
  }
  func.func @transform_4(%arg0: i32) -> (i32, i32) {
    %c0_i32 = arith.constant 0 : i32
    %c0_i32_0 = arith.constant 0 : i32
    %c0_i32_1 = arith.constant 0 : i32
    return %c0_i32, %c0_i32_0 : i32, i32
  }
  func.func @transform_5(%arg0: i32) -> (i32, i32) {
    %c0_i32 = arith.constant 0 : i32
    %c0_i32_0 = arith.constant 0 : i32
    %c0_i32_1 = arith.constant 0 : i32
    return %c0_i32, %c0_i32_0 : i32, i32
  }
  func.func @transform_6(%arg0: i32) -> (i32, i32) {
    %c0_i32 = arith.constant 0 : i32
    %c0_i32_0 = arith.constant 0 : i32
    %c0_i32_1 = arith.constant 0 : i32
    return %c0_i32, %c0_i32_0 : i32, i32
  }
  func.func @transform_7(%arg0: i32) -> (i32, i32) {
    %c0_i32 = arith.constant 0 : i32
    %c0_i32_0 = arith.constant 0 : i32
    %c0_i32_1 = arith.constant 0 : i32
    return %c0_i32, %c0_i32_0 : i32, i32
  }
  func.func @transform_8(%arg0: i32) -> (i32, i32) {
    %c0_i32 = arith.constant 0 : i32
    %c0_i32_0 = arith.constant 0 : i32
    return %arg0, %c0_i32 : i32, i32
  }
}

module attributes {stable_mosaic.version = 11 : i64} {
  func.func @_classifier_kernel(%arg0: i32, %arg1: memref<2x4x16xf32, #tpu.memory_space<vmem>>, %arg2: memref<16x10xbf16, #tpu.memory_space<vmem>>, %arg3: memref<1x10xf32, #tpu.memory_space<vmem>>, %arg4: memref<2x10xf32, #tpu.memory_space<vmem>>) attributes {dimension_semantics = [#tpu.dimension_semantics<arbitrary>], iteration_bounds = array<i64: 1>, scalar_prefetch = 0 : i64, scratch_operands = 0 : i64, tpu.core_type = #tpu.core_type<tc>, window_params = [{pipeline_mode = #tpu.pipeline_mode<synchronous>, transform_indices = @transform_0, window_bounds = array<i64: 2, 4, 16>}, {pipeline_mode = #tpu.pipeline_mode<synchronous>, transform_indices = @transform_1, window_bounds = array<i64: 16, 10>}, {pipeline_mode = #tpu.pipeline_mode<synchronous>, transform_indices = @transform_2, window_bounds = array<i64: 1, 10>}, {pipeline_mode = #tpu.pipeline_mode<synchronous>, transform_indices = @transform_3, window_bounds = array<i64: 2, 10>}]} {
    %c0 = arith.constant 0 : index
    %c0_0 = arith.constant 0 : index
    %c0_1 = arith.constant 0 : index
    %0 = vector.load %arg1[%c0, %c0_0, %c0_1] : memref<2x4x16xf32, #tpu.memory_space<vmem>>, vector<2x4x16xf32>
    %cst = arith.constant dense<0.000000e+00> : vector<2x16xf32>
    %1 = vector.multi_reduction <add>, %0, %cst [1] : vector<2x4x16xf32> to vector<2x16xf32>
    %cst_2 = arith.constant 4.000000e+00 : f32
    %2 = vector.broadcast %cst_2 : f32 to vector<2x16xf32>
    %3 = arith.divf %1, %2 : vector<2x16xf32>
    %4 = arith.truncf %3 : vector<2x16xf32> to vector<2x16xbf16>
    %c0_3 = arith.constant 0 : index
    %c0_4 = arith.constant 0 : index
    %5 = vector.load %arg2[%c0_3, %c0_4] : memref<16x10xbf16, #tpu.memory_space<vmem>>, vector<16x10xbf16>
    %cst_5 = arith.constant dense<0.000000e+00> : vector<2x10xf32>
    %6 = tpu.matmul %4, %5, %cst_5 {dimension_numbers = #tpu.dot_dimension_numbers<[1], [0], [0], [1], [0, 0, 1, 1], [], []>} : vector<2x16xbf16>, vector<16x10xbf16>, vector<2x10xf32> -> vector<2x10xf32>
    %c0_6 = arith.constant 0 : index
    %c0_7 = arith.constant 0 : index
    %7 = vector.load %arg3[%c0_6, %c0_7] : memref<1x10xf32, #tpu.memory_space<vmem>>, vector<1x10xf32>
    %8 = vector.broadcast %7 : vector<1x10xf32> to vector<2x10xf32>
    %9 = arith.addf %6, %8 : vector<2x10xf32>
    %c0_8 = arith.constant 0 : index
    %c0_9 = arith.constant 0 : index
    %10 = vector.load %arg4[%c0_8, %c0_9] : memref<2x10xf32, #tpu.memory_space<vmem>>, vector<2x10xf32>
    tpu.vector_store %arg4[%c0_8, %c0_9], %9 {strides = array<i32>} : memref<2x10xf32, #tpu.memory_space<vmem>>, vector<2x10xf32>,
    return
  }
  func.func @transform_0(%arg0: i32) -> (i32, i32, i32) {
    %c0_i32 = arith.constant 0 : i32
    %c0_i32_0 = arith.constant 0 : i32
    %c0_i32_1 = arith.constant 0 : i32
    %c0_i32_2 = arith.constant 0 : i32
    return %c0_i32, %c0_i32_0, %c0_i32_1 : i32, i32, i32
  }
  func.func @transform_1(%arg0: i32) -> (i32, i32) {
    %c0_i32 = arith.constant 0 : i32
    %c0_i32_0 = arith.constant 0 : i32
    %c0_i32_1 = arith.constant 0 : i32
    return %c0_i32, %c0_i32_0 : i32, i32
  }
  func.func @transform_2(%arg0: i32) -> (i32, i32) {
    %c0_i32 = arith.constant 0 : i32
    %c0_i32_0 = arith.constant 0 : i32
    %c0_i32_1 = arith.constant 0 : i32
    return %c0_i32, %c0_i32_0 : i32, i32
  }
  func.func @transform_3(%arg0: i32) -> (i32, i32) {
    %c0_i32 = arith.constant 0 : i32
    %c0_i32_0 = arith.constant 0 : i32
    %c0_i32_1 = arith.constant 0 : i32
    return %c0_i32, %c0_i32_0 : i32, i32
  }
}

</mosaic_0001>

<bundles_post_ra>
// kernel: _lambda_.7
= control target key start
LH: loop header
LB: loop body
LE: loop exit
PB: predicated region body
PF: predicated region fallthrough
CT: control target
= control target key end

     0   :  { %vm52_vm0 = vcmask 392192   ;;  %vm108_vm1 = vcmask 64512   ;;  %s197_s1 = inlined_call_operand.vmem [shape: bf16[48,8], index: 1, kind: input, shape index: {}]   ;;  %s198_s0 = inlined_call_operand.vmem [shape: f32[32,48], index: 0, kind: input, shape index: {}]   ;;  %s199_s2 = inlined_call_operand.vmem [shape: f32[1,8], index: 2, kind: input, shape index: {}]   ;;  %s200_s3 = inlined_call_operand.vmem [shape: f32[32,8], index: 3, kind: output, shape index: {}]  }
   0x1   :  { %v138_v0 = vld [vmem:[%s197_s1 + $0x10] sm:$0xff]   ;;  %v139_v1 = vld [vmem:[%s197_s1 + $0x8] sm:$0xff]   ;;  %v15_v2 = vld [vmem:[%s198_s0] sm:$0xff] }
   0x2   :  { %128 = vmatprep.subr.bf16.mxu0 %v138_v0  ;;  %v16_v3 = vld [vmem:[%s198_s0 + $0x8] sm:$0xff]  ;;  %v140_v4 = vld [vmem:[%s197_s1] sm:$0xff]   ;;  %v17_v6 = vld [vmem:[%s198_s0 + $0x10] sm:$0xff] }
   0x3   :  { %129 = vmatpush3.bf16.msra.mxu0 %v138_v0  ;;  %v19_v5 = vpack.c.bf16 %v16_v3, %v15_v2  ;;  %v18_v7 = vld [vmem:[%s198_s0 + $0x18] sm:$0xff]  ;;  %v117_v9 = vld [vmem:[%s199_s2] ss:$0 sm:$0xff] }
   0x4   :  { %130 = vmatprep.subr.bf16.mxu0 %v139_v1  ;;  %v20_v8 = vpack.c.bf16 %v18_v7, %v17_v6 }
   0x5   :  { %134 = vmatprep.mubr.msk.bf16.mxu0 %vm52_vm0, %v19_v5 }
   0x7   :  { %131 = vmatpush3.bf16.msra.mxu0 %v139_v1 }
   0x8   :  { %132 = vmatprep.subr.bf16.mxu0 %v140_v4 }
   0xb   :  { %133 = vmatpush3.bf16.msra.mxu0 %v140_v4 }
   0xe   :  { %135 = vmatmul.mubr.msk.bf16.vlgmr.msra.gmra.mxu0 %vm52_vm0, %v20_v8 }
  0xce   :  { %v136_v10 = vpop.f32.mrf.mxu0 }
  0xcf   :  { %v102_v11 = vadd.f32 %v136_v10, %v117_v9 }
  0xd0   :  { %v93_v12 = vpop.f32.mrf.mxu0 }
  0xd1   :  { %111 = vst.msk [vmem:[%s200_s3 + $0x10] sm:$0xff] %vm108_vm1, %v102_v11  ;;  %v94_v13 = vadd.f32 %v117_v9, %v93_v12 }
  0xd2   :  { %v137_v14 = vpop.f32.mrf.mxu0 }
  0xd3   :  { %109 = vst.msk [vmem:[%s200_s3] sm:$0xff] %vm108_vm1, %v94_v13  ;;  %v105_v15 = vadd.f32 %v137_v14, %v117_v9 }
  0xd4   :  { %v96_v16 = vpop.f32.mrf.mxu0 }
  0xd5   :  { %112 = vst.msk [vmem:[%s200_s3 + $0x18] sm:$0xff] %vm108_vm1, %v105_v15  ;;  %v97_v17 = vadd.f32 %v117_v9, %v96_v16 }
  0xd7   :  { %110 = vst.msk [vmem:[%s200_s3 + $0x8] sm:$0xff] %vm108_vm1, %v97_v17 }

// kernel: _lambda_.9
= control target key start
LH: loop header
LB: loop body
LE: loop exit
PB: predicated region body
PF: predicated region fallthrough
CT: control target
= control target key end

     0   :  { %vm34_vm0 = vcmask 64512   ;;  %vm126_vm1 = vcmask 1043456   ;;  %vm240_vm2 = vcmask 261120   ;;  %s478_s0 = inlined_call_operand.vmem [shape: f32[32,8], index: 0, kind: input, shape index: {}]   ;;  %s479_s4 = inlined_call_operand.vmem [shape: bf16[8,32], index: 4, kind: input, shape index: {}]   ;;  %s480_s2 = inlined_call_operand.vmem [shape: f32[1,8], index: 2, kind: input, shape index: {}]   ;;  %s481_s3 = inlined_call_operand.vmem [shape: f32[1,8], index: 3, kind: input, shape index: {}]   ;;  %s482_s6 = inlined_call_operand.vmem [shape: bf16[32,8], index: 6, kind: input, shape index: {}]   ;;  %s483_s5 = inlined_call_operand.vmem [shape: f32[1,32], index: 5, kind: input, shape index: {}]   ;;  %s484_s7 = inlined_call_operand.vmem [shape: f32[1,8], index: 7, kind: input, shape index: {}]   ;;  %s485_s1 = inlined_call_operand.vmem [shape: f32[32,8], index: 1, kind: input, shape index: {}]   ;;  %s486_s8 = inlined_call_operand.vmem [shape: f32[32,8], index: 8, kind: output, shape index: {}]  }
   0x1   :  { %v30_v0 = vld [vmem:[%s478_s0] sm:$0xff]  ;;  %v32_v1 = vld [vmem:[%s478_s0 + $0x10] sm:$0xff]  ;;  %v31_v2 = vld [vmem:[%s478_s0 + $0x8] sm:$0xff] }
   0x2   :  { %v35_v3 = vsel %vm34_vm0, %v30_v0, 0.0  ;;  %v41_v4 = vsel %vm34_vm0, %v32_v1, 0.0  ;;  %v33_v5 = vld [vmem:[%s478_s0 + $0x18] sm:$0xff]  ;;  %v38_v6 = vsel %vm34_vm0, %v31_v2, 0.0  ;;  %v112_v28 = vld [vmem:[%s479_s4] sm:$0xf] }
   0x3   :  { %36 = vadd.xlane.f32.xlu0 %v35_v3  ;;  %42 = vadd.xlane.f32.xlu1 %v41_v4  ;;  %v44_v7 = vsel %vm34_vm0, %v33_v5, 0.0  ;;  %v128_v29 = vsel %vm126_vm1, %v112_v28, 0  ;;  %v312_v44 = vld [vmem:[%s480_s2] ss:$0 sm:$0xff]  ;;  %v344_v62 = vld [vmem:[%s482_s6 + $0x8] sm:$0xff]  }
   0x4   :  { %343 = vmatprep.subr.msk.bf16.mxu0 %vm126_vm1, %v112_v28  ;;  %v313_v49 = vld [vmem:[%s481_s3] ss:$0 sm:$0xff]  ;;  %335 = vmatprep.subr.bf16.mxu1 %v344_v62 }
   0x5   :  { %330 = vmatpush3.bf16.msra.mxu0 %v128_v29  ;;  %v345_v63 = vld [vmem:[%s482_s6] sm:$0xff]   ;;  %336 = vmatpush3.bf16.msra.mxu1 %v344_v62 }
   0x6   :  { %337 = vmatprep.subr.bf16.mxu1 %v345_v63 }
   0x7   :  { %39 = vadd.xlane.f32.xlu0 %v38_v6  ;;  %45 = vadd.xlane.f32.xlu1 %v44_v7 }
   0x9   :  { %338 = vmatpush3.bf16.msra.mxu1 %v345_v63 }
  0x8c   :  { %v37_v8 = vpop.xlane.xlu0 %36  ;;  %v43_v9 = vpop.xlane.xlu1 %42 }
  0x8d   :  { %v48_v10 = vmul.f32 0.125, %v37_v8  ;;  %v50_v11 = vmul.f32 0.125, %v43_v9 }
  0x8f   :  { %v52_v12 = vsub.f32 %v30_v0, %v48_v10  ;;  %v54_v13 = vsub.f32 %v32_v1, %v50_v11  ;;  %v314_v0 = vld [vmem:[%s483_s5] ss:$0 sm:$0xff] }
  0x90   :  { %v40_v14 = vpop.xlane.xlu0 %39  ;;  %v46_v15 = vpop.xlane.xlu1 %45 }
  0x91   :  { %v49_v16 = vmul.f32 0.125, %v40_v14  ;;  %v51_v17 = vmul.f32 0.125, %v46_v15  ;;  %v56_v18 = vmul.f32 %v52_v12, %v52_v12  ;;  %v58_v19 = vmul.f32 %v54_v13, %v54_v13 }
  0x93   :  { %v53_v20 = vsub.f32 %v31_v2, %v49_v16  ;;  %v55_v21 = vsub.f32 %v33_v5, %v51_v17  ;;  %v60_v22 = vsel %vm34_vm0, %v56_v18, 0.0  ;;  %v66_v23 = vsel %vm34_vm0, %v58_v19, 0.0 }
  0x94   :  { %61 = vadd.xlane.f32.xlu0 %v60_v22 }
  0x95   :  { %v57_v24 = vmul.f32 %v53_v20, %v53_v20  ;;  %v59_v25 = vmul.f32 %v55_v21, %v55_v21 }
  0x97   :  { %v63_v26 = vsel %vm34_vm0, %v57_v24, 0.0  ;;  %v69_v27 = vsel %vm34_vm0, %v59_v25, 0.0 }
  0x98   :  { %67 = vadd.xlane.f32.xlu0 %v66_v23  ;;  %64 = vadd.xlane.f32.xlu1 %v63_v26 }
  0x9c   :  { %70 = vadd.xlane.f32.xlu1 %v69_v27 }
 0x11d   :  { %v62_v30 = vpop.xlane.xlu0 %61 }
 0x11e   :  { %v72_v31 = vmul.f32 0.125, %v62_v30 }
 0x120   :  { %v76_v32 = vadd.f32 1e-06, %v72_v31 }
 0x121   :  { %v65_v33 = vpop.xlane.xlu1 %64  ;;  %v68_v34 = vpop.xlane.xlu0 %67 }
 0x122   :  { %346 = vrsqrt.f32 %v76_v32  ;;  %v73_v35 = vmul.f32 0.125, %v65_v33  ;;  %v74_v36 = vmul.f32 0.125, %v68_v34 }
 0x124   :  { %v77_v37 = vadd.f32 1e-06, %v73_v35  ;;  %v78_v38 = vadd.f32 1e-06, %v74_v36 }
 0x125   :  { %v71_v39 = vpop.xlane.xlu1 %70 }
 0x126   :  { %348 = vrsqrt.f32 %v77_v37  ;;  %v75_v40 = vmul.f32 0.125, %v71_v39 }
 0x127   :  { %350 = vrsqrt.f32 %v78_v38 }
 0x128   :  { %v79_v41 = vadd.f32 1e-06, %v75_v40 }
 0x12a   :  { %352 = vrsqrt.f32 %v79_v41 }
 0x12f   :  { %v347_v42 = vpop.eup %346 }
 0x130   :  { %v84_v43 = vmul.f32 %v347_v42, %v52_v12 }
 0x132   :  { %v95_v48 = vmul.f32 %v312_v44, %v84_v43 }
 0x133   :  { %v349_v45 = vpop.eup %348 }
 0x134   :  { %v351_v46 = vpop.eup %350  ;;  %v85_v47 = vmul.f32 %v349_v45, %v53_v20  ;;  %v106_v53 = vadd.f32 %v313_v49, %v95_v48 }
 0x135   :  { %v86_v50 = vmul.f32 %v351_v46, %v54_v13 }
 0x136   :  { %v96_v51 = vmul.f32 %v312_v44, %v85_v47  ;;  %v317_v47 = vld [vmem:[%s484_s7] ss:$0 sm:$0xff] }
 0x137   :  { %v353_v52 = vpop.eup %352  ;;  %v97_v56 = vmul.f32 %v312_v44, %v86_v50 }
 0x138   :  { %v107_v54 = vadd.f32 %v313_v49, %v96_v51  ;;  %v87_v55 = vmul.f32 %v353_v52, %v55_v21  ;;  %v296_v52 = vld [vmem:[%s485_s1] sm:$0xff] }
 0x139   :  { %v108_v59 = vadd.f32 %v313_v49, %v97_v56  ;;  %v299_v56 = vld [vmem:[%s485_s1 + $0x18] sm:$0xff] }
 0x13a   :  { %v110_v57 = vpack.c.bf16 %v107_v54, %v106_v53  ;;  %v98_v58 = vmul.f32 %v312_v44, %v87_v55 }
 0x13c   :  { %331 = vmatprep.mubr.msk.bf16.mxu0 %vm34_vm0, %v110_v57  ;;  %v109_v60 = vadd.f32 %v313_v49, %v98_v58  ;;  %v298_v49 = vld [vmem:[%s485_s1 + $0x10] sm:$0xff] }
 0x13e   :  { %v111_v61 = vpack.c.bf16 %v109_v60, %v108_v59  ;;  %v297_v60 = vld [vmem:[%s485_s1 + $0x8] sm:$0xff] }
 0x140   :  { %332 = vmatmul.mubr.msk.bf16.vlgmr.msra.gmra.mxu0 %vm34_vm0, %v111_v61 }
 0x200   :  { %v333_v1 = vpop.f32.mrf.mxu0 }
 0x201   :  { %v173_v2 = vadd.f32 %v333_v1, %v314_v0 }
 0x202   :  { %v164_v3 = vpop.f32.mrf.mxu0 }
 0x203   :  { %v181_v4 = vmul.f32 %v173_v2, %v173_v2  ;;  %v165_v5 = vadd.f32 %v314_v0, %v164_v3 }
 0x204   :  { %v334_v6 = vpop.f32.mrf.mxu0 }
 0x205   :  { %v185_v7 = vmul.f32 %v181_v4, %v173_v2  ;;  %v179_v8 = vmul.f32 %v165_v5, %v165_v5  ;;  %v176_v9 = vadd.f32 %v334_v6, %v314_v0 }
 0x206   :  { %v167_v10 = vpop.f32.mrf.mxu0 }
 0x207   :  { %v189_v11 = vmul.f32 0.044715, %v185_v7  ;;  %v183_v12 = vmul.f32 %v179_v8, %v165_v5  ;;  %v182_v13 = vmul.f32 %v176_v9, %v176_v9  ;;  %v168_v14 = vadd.f32 %v314_v0, %v167_v10 }
 0x209   :  { %v193_v15 = vadd.f32 %v189_v11, %v173_v2  ;;  %v187_v16 = vmul.f32 0.044715, %v183_v12  ;;  %v186_v17 = vmul.f32 %v182_v13, %v176_v9  ;;  %v180_v18 = vmul.f32 %v168_v14, %v168_v14 }
 0x20b   :  { %v197_v19 = vmul.f32 0.7978846, %v193_v15  ;;  %v191_v20 = vadd.f32 %v187_v16, %v165_v5  ;;  %v190_v21 = vmul.f32 0.044715, %v186_v17  ;;  %v184_v22 = vmul.f32 %v180_v18, %v168_v14 }
 0x20d   :  { %v195_v23 = vmul.f32 0.7978846, %v191_v20  ;;  %v194_v24 = vadd.f32 %v190_v21, %v176_v9  ;;  %v188_v25 = vmul.f32 0.044715, %v184_v22  ;;  %354 = vtanh.f32 %v197_v19 }
 0x20f   :  { %v198_v26 = vmul.f32 0.7978846, %v194_v24  ;;  %v192_v27 = vadd.f32 %v188_v25, %v168_v14  ;;  %356 = vtanh.f32 %v195_v23 }
 0x211   :  { %358 = vtanh.f32 %v198_v26  ;;  %v196_v28 = vmul.f32 0.7978846, %v192_v27 }
 0x213   :  { %360 = vtanh.f32 %v196_v28 }
 0x21a   :  { %v355_v29 = vpop.eup %354 }
 0x21b   :  { %v205_v33 = vadd.f32 1.0, %v355_v29 }
 0x21c   :  { %v357_v30 = vpop.eup %356 }
 0x21d   :  { %v203_v31 = vadd.f32 1.0, %v357_v30  ;;  %v209_v39 = vmul.f32 0.5, %v205_v33 }
 0x21e   :  { %v359_v32 = vpop.eup %358 }
 0x21f   :  { %v206_v34 = vadd.f32 1.0, %v359_v32  ;;  %v207_v38 = vmul.f32 0.5, %v203_v31  ;;  %v213_v44 = vmul.f32 %v209_v39, %v173_v2 }
 0x220   :  { %v361_v35 = vpop.eup %360 }
 0x221   :  { %v210_v36 = vmul.f32 0.5, %v206_v34  ;;  %v204_v37 = vadd.f32 1.0, %v361_v35  ;;  %v211_v42 = vmul.f32 %v207_v38, %v165_v5 }
 0x223   :  { %v208_v40 = vmul.f32 0.5, %v204_v37  ;;  %v214_v41 = vmul.f32 %v210_v36, %v176_v9 }
 0x225   :  { %v212_v43 = vmul.f32 %v208_v40, %v168_v14  ;;  %v216_v46 = vpack.c.bf16 %v214_v41, %v213_v44 }
 0x227   :  { %v215_v45 = vpack.c.bf16 %v212_v43, %v211_v42 }
 0x229   :  { %339 = vmatprep.mubr.msk.bf16.mxu1 %vm240_vm2, %v215_v45 }
 0x22a   :  { %340 = vmatmul.mubr.msk.bf16.vlgmr.msra.gmra.mxu1 %vm240_vm2, %v216_v46 }
 0x2ea   :  { %v341_v48 = vpop.f32.mrf.mxu1 }
 0x2eb   :  { %v290_v50 = vadd.f32 %v341_v48, %v317_v47 }
 0x2ec   :  { %v281_v51 = vpop.f32.mrf.mxu1 }
 0x2ed   :  { %v302_v53 = vadd.f32 %v298_v49, %v290_v50  ;;  %v282_v54 = vadd.f32 %v317_v47, %v281_v51 }
 0x2ee   :  { %v342_v55 = vpop.f32.mrf.mxu1 }
 0x2ef   :  { %306 = vst.msk [vmem:[%s486_s8 + $0x10] sm:$0xff] %vm34_vm0, %v302_v53  ;;  %v300_v57 = vadd.f32 %v296_v52, %v282_v54  ;;  %v293_v58 = vadd.f32 %v342_v55, %v317_v47 }
 0x2f0   :  { %v284_v59 = vpop.f32.mrf.mxu1 }
 0x2f1   :  { %304 = vst.msk [vmem:[%s486_s8] sm:$0xff] %vm34_vm0, %v300_v57  ;;  %v303_v61 = vadd.f32 %v299_v56, %v293_v58  ;;  %v285_v62 = vadd.f32 %v317_v47, %v284_v59 }
 0x2f3   :  { %307 = vst.msk [vmem:[%s486_s8 + $0x18] sm:$0xff] %vm34_vm0, %v303_v61  ;;  %v301_v63 = vadd.f32 %v297_v60, %v285_v62 }
 0x2f5   :  { %305 = vst.msk [vmem:[%s486_s8 + $0x8] sm:$0xff] %vm34_vm0, %v301_v63 }

// kernel: _lambda_.10
= control target key start
LH: loop header
LB: loop body
LE: loop exit
PB: predicated region body
PF: predicated region fallthrough
CT: control target
= control target key end

     0   :  { %vm22_vm0 = vcmask 64512   ;;  %vm78_vm1 = vcmask 1043456   ;;  %v371_v29 = vmov 0.0   ;;  %vm372_vm2 = vmmov 0   ;;  %s469_s0 = inlined_call_operand.vmem [shape: f32[4,8,8], index: 0, kind: input, shape index: {}]   ;;  %s470_s3 = inlined_call_operand.vmem [shape: bf16[4,8,16], index: 3, kind: input, shape index: {}]   ;;  %s471_s1 = inlined_call_operand.vmem [shape: f32[1,8], index: 1, kind: input, shape index: {}]   ;;  %s472_s2 = inlined_call_operand.vmem [shape: f32[1,8], index: 2, kind: input, shape index: {}]   ;;  %s473_s4 = inlined_call_operand.vmem [shape: f32[1,16], index: 4, kind: input, shape index: {}]   ;;  %s474_s5 = inlined_call_operand.vmem [shape: f32[8,16], index: 5, kind: output, shape index: {}]  }
   0x1   :  { %v318_v0 = vld [vmem:[%s469_s0 + $0x8] sm:$0xff]  ;;  %v322_v1 = vld [vmem:[%s469_s0 + $0x10] sm:$0xff]  ;;  %v21_v2 = vld [vmem:[%s469_s0] sm:$0xff]  ;;  %337 = vmatprep.subr.bf16.mxu0 %v371_v29  ;;  %343 = vmatprep.subr.bf16.mxu1 %v371_v29  ;;  %vm310_vm3 = vcmask 130048  }
   0x2   :  { %v57_v3 = vsel %vm22_vm0, %v318_v0, 0.0  ;;  %v170_v4 = vsel %vm22_vm0, %v322_v1, 0.0  ;;  %v325_v5 = vld [vmem:[%s469_s0 + $0x18] sm:$0xff]  ;;  %v23_v6 = vsel %vm22_vm0, %v21_v2, 0.0  ;;  %v319_v28 = vld [vmem:[%s470_s3 + $0x4] sm:$0xf]  ;;  %339 = vmatprep.mubr.msk.bf16.mxu0 %vm372_vm2, %v371_v29  ;;  %345 = vmatprep.mubr.msk.bf16.mxu1 %vm372_vm2, %v371_v29 }
   0x3   :  { %58 = vadd.xlane.f32.xlu0 %v57_v3  ;;  %171 = vadd.xlane.f32.xlu1 %v170_v4  ;;  %v237_v7 = vsel %vm22_vm0, %v325_v5, 0.0  ;;  %v80_v30 = vsel %vm78_vm1, %v319_v28, 0  ;;  %v54_v31 = vld [vmem:[%s470_s3] sm:$0xf]  ;;  %v323_v32 = vld [vmem:[%s470_s3 + $0x8] sm:$0xf] }
   0x4   :  { %338 = vmatpush3.bf16.msra.mxu0 %v80_v30  ;;  %v126_v33 = vsel %vm78_vm1, %v54_v31, 0  ;;  %v192_v34 = vsel %vm78_vm1, %v323_v32, 0  ;;  %v326_v35 = vld [vmem:[%s470_s3 + $0xc] sm:$0xf]  ;;  %v316_v50 = vld [vmem:[%s471_s1] ss:$0 sm:$0xff] }
   0x5   :  { %349 = vmatprep.subr.bf16.mxu0 %v371_v29  ;;  %344 = vmatpush3.bf16.msra.mxu1 %v126_v33  ;;  %v259_v36 = vsel %vm78_vm1, %v326_v35, 0  ;;  %v317_v52 = vld [vmem:[%s472_s2] ss:$0 sm:$0xff] }
   0x6   :  { %355 = vmatprep.subr.bf16.mxu1 %v371_v29 }
   0x7   :  { %24 = vadd.xlane.f32.xlu0 %v23_v6  ;;  %238 = vadd.xlane.f32.xlu1 %v237_v7 }
  0x8c   :  { %v59_v8 = vpop.xlane.xlu0 %58  ;;  %v172_v9 = vpop.xlane.xlu1 %171 }
  0x8d   :  { %v60_v10 = vmul.f32 0.125, %v59_v8  ;;  %v173_v11 = vmul.f32 0.125, %v172_v9 }
  0x8f   :  { %v61_v12 = vsub.f32 %v318_v0, %v60_v10  ;;  %v419_v13 = vsub.f32 %v322_v1, %v173_v11 }
  0x90   :  { %v25_v14 = vpop.xlane.xlu0 %24  ;;  %v239_v15 = vpop.xlane.xlu1 %238 }
  0x91   :  { %v27_v16 = vmul.f32 0.125, %v25_v14  ;;  %v240_v17 = vmul.f32 0.125, %v239_v15  ;;  %v62_v18 = vmul.f32 %v61_v12, %v61_v12  ;;  %v175_v19 = vmul.f32 %v419_v13, %v419_v13 }
  0x93   :  { %v28_v20 = vsub.f32 %v21_v2, %v27_v16  ;;  %v423_v21 = vsub.f32 %v325_v5, %v240_v17  ;;  %v63_v22 = vsel %vm22_vm0, %v62_v18, 0.0  ;;  %v176_v23 = vsel %vm22_vm0, %v175_v19, 0.0 }
  0x94   :  { %64 = vadd.xlane.f32.xlu0 %v63_v22 }
  0x95   :  { %v29_v24 = vmul.f32 %v28_v20, %v28_v20  ;;  %v242_v25 = vmul.f32 %v423_v21, %v423_v21 }
  0x97   :  { %v30_v26 = vsel %vm22_vm0, %v29_v24, 0.0  ;;  %v243_v27 = vsel %vm22_vm0, %v242_v25, 0.0 }
  0x98   :  { %177 = vadd.xlane.f32.xlu0 %v176_v23  ;;  %31 = vadd.xlane.f32.xlu1 %v30_v26 }
  0x9c   :  { %244 = vadd.xlane.f32.xlu1 %v243_v27 }
 0x11d   :  { %v65_v37 = vpop.xlane.xlu0 %64 }
 0x11e   :  { %v66_v38 = vmul.f32 0.125, %v65_v37 }
 0x120   :  { %v67_v39 = vadd.f32 1e-06, %v66_v38 }
 0x121   :  { %v32_v40 = vpop.xlane.xlu1 %31  ;;  %v178_v41 = vpop.xlane.xlu0 %177 }
 0x122   :  { %363 = vrsqrt.f32 %v67_v39  ;;  %v33_v42 = vmul.f32 0.125, %v32_v40  ;;  %v179_v43 = vmul.f32 0.125, %v178_v41 }
 0x124   :  { %v34_v44 = vadd.f32 1e-06, %v33_v42  ;;  %v180_v45 = vadd.f32 1e-06, %v179_v43 }
 0x125   :  { %v245_v46 = vpop.xlane.xlu1 %244 }
 0x126   :  { %365 = vrsqrt.f32 %v34_v44  ;;  %v246_v47 = vmul.f32 0.125, %v245_v46 }
 0x127   :  { %367 = vrsqrt.f32 %v180_v45 }
 0x128   :  { %v247_v48 = vadd.f32 1e-06, %v246_v47 }
 0x12a   :  { %369 = vrsqrt.f32 %v247_v48 }
 0x12f   :  { %v364_v49 = vpop.eup %363 }
 0x130   :  { %v69_v51 = vmul.f32 %v364_v49, %v61_v12 }
 0x132   :  { %v70_v53 = vmul.f32 %v316_v50, %v69_v51 }
 0x133   :  { %v366_v54 = vpop.eup %365 }
 0x134   :  { %v368_v55 = vpop.eup %367  ;;  %v71_v56 = vadd.f32 %v317_v52, %v70_v53  ;;  %v36_v57 = vmul.f32 %v366_v54, %v28_v20 }
 0x135   :  { %v182_v58 = vmul.f32 %v368_v55, %v419_v13 }
 0x136   :  { %v72_v59 = vpack.c.bf16 %v71_v56, %v71_v56  ;;  %v44_v60 = vmul.f32 %v316_v50, %v36_v57 }
 0x137   :  { %v370_v61 = vpop.eup %369  ;;  %v183_v62 = vmul.f32 %v316_v50, %v182_v58 }
 0x138   :  { %v249_v63 = vmul.f32 %v370_v61, %v423_v21  ;;  %340 = vmatmul.mubr.msk.bf16.vlgmr.msra.gmra.mxu0 %vm22_vm0, %v72_v59  ;;  %v52_v0 = vadd.f32 %v317_v52, %v44_v60  ;;  %v328_v21 = vld [vmem:[%s473_s4] ss:$0 sm:$0xff] }
 0x139   :  { %350 = vmatpush3.bf16.msra.mxu0 %v192_v34  ;;  %351 = vmatprep.mubr.msk.bf16.mxu0 %vm372_vm2, %v371_v29  ;;  %v184_v2 = vadd.f32 %v317_v52, %v183_v62 }
 0x13a   :  { %v53_v1 = vpack.c.bf16 %v52_v0, %v52_v0  ;;  %v250_v3 = vmul.f32 %v316_v50, %v249_v63 }
 0x13b   :  { %v185_v4 = vpack.c.bf16 %v184_v2, %v184_v2 }
 0x13c   :  { %346 = vmatmul.mubr.msk.bf16.vlgmr.msra.gmra.mxu1 %vm22_vm0, %v53_v1  ;;  %v251_v5 = vadd.f32 %v317_v52, %v250_v3 }
 0x13d   :  { %356 = vmatpush3.bf16.msra.mxu1 %v259_v36  ;;  %357 = vmatprep.mubr.msk.bf16.mxu1 %vm372_vm2, %v371_v29 }
 0x13e   :  { %v252_v6 = vpack.c.bf16 %v251_v5, %v251_v5 }
 0x140   :  { %352 = vmatmul.mubr.msk.bf16.vlgmr.msra.gmra.mxu0 %vm22_vm0, %v185_v4 }
 0x144   :  { %358 = vmatmul.mubr.msk.bf16.vlgmr.msra.gmra.mxu1 %vm22_vm0, %v252_v6 }
 0x1f8   :  { %v116_v7 = vpop.f32.mrf.mxu0 }
 0x1fa   :  { %v341_v8 = vpop.f32.mrf.mxu0 }
 0x1fc   :  { %v119_v9 = vpop.f32.mrf.mxu0  ;;  %v162_v10 = vpop.f32.mrf.mxu1 }
 0x1fd   :  { %v163_v15 = vadd.f32 %v162_v10, %v116_v7 }
 0x1fe   :  { %v342_v11 = vpop.f32.mrf.mxu0  ;;  %v347_v12 = vpop.f32.mrf.mxu1 }
 0x200   :  { %v165_v13 = vpop.f32.mrf.mxu1  ;;  %v228_v14 = vpop.f32.mrf.mxu0 }
 0x201   :  { %v234_v18 = vadd.f32 %v228_v14, %v163_v15 }
 0x202   :  { %v348_v16 = vpop.f32.mrf.mxu1  ;;  %v353_v17 = vpop.f32.mrf.mxu0 }
 0x204   :  { %v231_v19 = vpop.f32.mrf.mxu0  ;;  %v295_v20 = vpop.f32.mrf.mxu1 }
 0x205   :  { %v301_v22 = vadd.f32 %v295_v20, %v234_v18 }
 0x206   :  { %v354_v23 = vpop.f32.mrf.mxu0  ;;  %v359_v24 = vpop.f32.mrf.mxu1 }
 0x207   :  { %v309_v25 = vadd.f32 %v328_v21, %v301_v22 }
 0x208   :  { %v298_v26 = vpop.f32.mrf.mxu1 }
 0x209   :  { %311 = vst.msk [vmem:[%s474_s5] sm:$0xff] %vm310_vm3, %v309_v25 }
 0x20a   :  { %v360_v27 = vpop.f32.mrf.mxu1 }

// kernel: _lambda_.8
= control target key start
LH: loop header
LB: loop body
LE: loop exit
PB: predicated region body
PF: predicated region fallthrough
CT: control target
= control target key end

     0   :  { %s1347_s12 = smov 0   ;;  %s1716_s0 = inlined_call_operand.vmem [shape: f32[2,10,10,8], index: 0, kind: input, shape index: {}]   ;;  %s1717_s1 = inlined_call_operand.vmem [shape: f32[49,8], index: 1, kind: input, shape index: {}]   ;;  %s1718_s2 = inlined_call_operand.vmem [shape: f32[1,8], index: 2, kind: input, shape index: {}]   ;;  %s1719_s3 = inlined_call_operand.vmem [shape: f32[2,4,4,8], index: 3, kind: output, shape index: {}]  }
   0x1 LB: > { %s1081_s13 = sadd.s32 4294967295, %s1325_s12   ;;  %p1085_p0 = scmp.ge.s32.totalorder %s1325_s12, 1  ;;  %s1325_s12 = sphi %s1347_s12, %s13_s12  }
   0x2   : > { %p137_p1 = scmp.lt.s32.totalorder %s1325_s12, 3 }
   0x4   : > { %p138_p2 = pnand %p1085_p0, %p137_p1 }
   0x5   : > { %p161_p3 = scmp.lt.s32.totalorder (!%p138_p2), %s1081_s13, 1 }
   0x6   : > { %141 = sbr.rel (%p138_p2) target bundleno = 120 (0x78), region = 32 }
   0xb   : > { %s1721_s13 = smov (!%p161_p3, %s1081_s13), 1  ;;  %v1089_v0 = vld [vmem:[%s1717_s1] ss:$0 sm:$0xff]  ;;  %v1090_v1 = vld [vmem:[%s1717_s1 + $0x1] ss:$0 sm:$0xff]  ;;  %vm1021_vm0 = vcmask 60416  }
   0xc   : > { %s1310_s14 = smul.u32 160, %s1721_s13  ;;  %v1091_v2 = vld [vmem:[%s1717_s1 + $0x2] ss:$0 sm:$0xff]  ;;  %v1092_v6 = vld [vmem:[%s1717_s1 + $0x3] ss:$0 sm:$0xff]  ;;  %s1309_s20 = sshll.u32 %s1721_s13, 4 }
   0xd   : > { %v1093_v19 = vld [vmem:[%s1717_s1 + $0x4] ss:$0 sm:$0xff]  ;;  %v1094_v33 = vld [vmem:[%s1717_s1 + $0x5] ss:$0 sm:$0xff]  ;;  %v1095_v60 = vld [vmem:[%s1717_s1 + $0x6] ss:$0 sm:$0xff]  ;;  %s170_s24 = scalar_lea.vmem %s1719_s3, %s1309_s20 }
   0xe   : > { %s1364_s19 = scalar_lea.vmem %s1716_s0, %s1310_s14 }
   0xf   : > { %v171_v3 = vld [vmem:[%s1364_s19] sm:$0xf]  ;;  %v172_v4 = vld [vmem:[%s1364_s19 + $0x10] sm:$0xf]  ;;  %v239_v39 = vld [vmem:[%s1364_s19 + $0x4] sm:$0xf] }
  0x10   : > { %v173_v5 = vld [vmem:[%s1364_s19 + $0x20] sm:$0xf]  ;;  %v174_v7 = vld [vmem:[%s1364_s19 + $0x30] sm:$0xf]  ;;  %v180_v8 = vmul.f32 %v1089_v0, %v171_v3  ;;  %v181_v9 = vmul.f32 %v1089_v0, %v172_v4  ;;  %v240_v40 = vld [vmem:[%s1364_s19 + $0x14] sm:$0xf]  ;;  %v248_v51 = vmul.f32 %v1093_v19, %v239_v39 }
  0x11   : > { %v182_v10 = vmul.f32 %v1089_v0, %v173_v5  ;;  %v188_v11 = vld [vmem:[%s1364_s19 + $0x1] sm:$0xf]  ;;  %v189_v12 = vld [vmem:[%s1364_s19 + $0x11] sm:$0xf]  ;;  %v183_v13 = vmul.f32 %v1089_v0, %v174_v7  ;;  %v256_v47 = vld [vmem:[%s1364_s19 + $0x5] sm:$0xf]  ;;  %v249_v56 = vmul.f32 %v1093_v19, %v240_v40 }
  0x12   : > { %v190_v14 = vld [vmem:[%s1364_s19 + $0x21] sm:$0xf]  ;;  %v191_v15 = vld [vmem:[%s1364_s19 + $0x31] sm:$0xf]  ;;  %v197_v16 = vmul.f32 %v1090_v1, %v188_v11  ;;  %v198_v17 = vmul.f32 %v1090_v1, %v189_v12  ;;  %v257_v52 = vld [vmem:[%s1364_s19 + $0x15] sm:$0xf]  ;;  %v265_v0 = vmul.f32 %v1094_v33, %v256_v47 }
  0x13   : > { %v205_v18 = vld [vmem:[%s1364_s19 + $0x2] sm:$0xf]  ;;  %v199_v20 = vmul.f32 %v1090_v1, %v190_v14  ;;  %v200_v21 = vmul.f32 %v1090_v1, %v191_v15  ;;  %v206_v22 = vld [vmem:[%s1364_s19 + $0x12] sm:$0xf]  ;;  %v273_v59 = vld [vmem:[%s1364_s19 + $0x6] sm:$0xf]  ;;  %v266_v5 = vmul.f32 %v1094_v33, %v257_v52 }
  0x14   : > { %v207_v23 = vld [vmem:[%s1364_s19 + $0x22] sm:$0xf]  ;;  %v208_v24 = vld [vmem:[%s1364_s19 + $0x32] sm:$0xf]  ;;  %v214_v25 = vmul.f32 %v1091_v2, %v205_v18  ;;  %v201_v26 = vadd.f32 %v197_v16, %v180_v8  ;;  %v202_v27 = vadd.f32 %v198_v17, %v181_v9  ;;  %v215_v28 = vmul.f32 %v1091_v2, %v206_v22  ;;  %v274_v1 = vld [vmem:[%s1364_s19 + $0x16] sm:$0xf] }
  0x15   : > { %v216_v29 = vmul.f32 %v1091_v2, %v207_v23  ;;  %v222_v30 = vld [vmem:[%s1364_s19 + $0x3] sm:$0xf]  ;;  %v223_v31 = vld [vmem:[%s1364_s19 + $0x13] sm:$0xf]  ;;  %v203_v34 = vadd.f32 %v199_v20, %v182_v10  ;;  %v204_v35 = vadd.f32 %v200_v21, %v183_v13  ;;  %v217_v36 = vmul.f32 %v1091_v2, %v208_v24  ;;  %v1100_v9 = vld [vmem:[%s1717_s1 + $0x7] ss:$0 sm:$0xff] }
  0x16   : > { %v224_v32 = vld [vmem:[%s1364_s19 + $0x23] sm:$0xf]  ;;  %v225_v37 = vld [vmem:[%s1364_s19 + $0x33] sm:$0xf]  ;;  %v231_v38 = vmul.f32 %v1092_v6, %v222_v30  ;;  %v218_v41 = vadd.f32 %v214_v25, %v201_v26  ;;  %v219_v42 = vadd.f32 %v215_v28, %v202_v27  ;;  %v232_v43 = vmul.f32 %v1092_v6, %v223_v31  ;;  %v1105_v22 = vld [vmem:[%s1717_s1 + $0x8] ss:$0 sm:$0xff] }
  0x17   : > { %v233_v44 = vmul.f32 %v1092_v6, %v224_v32  ;;  %v241_v45 = vld [vmem:[%s1364_s19 + $0x24] sm:$0xf]  ;;  %v242_v46 = vld [vmem:[%s1364_s19 + $0x34] sm:$0xf]  ;;  %v220_v48 = vadd.f32 %v216_v29, %v203_v34  ;;  %v221_v49 = vadd.f32 %v217_v36, %v204_v35  ;;  %v234_v50 = vmul.f32 %v1092_v6, %v225_v37  ;;  %v1096_v8 = vld [vmem:[%s1364_s19 + $0x10] sm:$0xf] }
  0x18   : > { %v258_v53 = vld [vmem:[%s1364_s19 + $0x25] sm:$0xf]  ;;  %v235_v54 = vadd.f32 %v231_v38, %v218_v41  ;;  %v236_v55 = vadd.f32 %v232_v43, %v219_v42  ;;  %v250_v57 = vmul.f32 %v1093_v19, %v241_v45  ;;  %v259_v58 = vld [vmem:[%s1364_s19 + $0x35] sm:$0xf]  ;;  %v251_v63 = vmul.f32 %v1093_v19, %v242_v46  ;;  %v1097_v14 = vld [vmem:[%s1364_s19 + $0x20] sm:$0xf] }
  0x19   : > { %v237_v61 = vadd.f32 %v233_v44, %v220_v48  ;;  %v238_v62 = vadd.f32 %v234_v50, %v221_v49  ;;  %v275_v2 = vld [vmem:[%s1364_s19 + $0x26] sm:$0xf]  ;;  %v267_v6 = vmul.f32 %v1094_v33, %v258_v53  ;;  %v276_v7 = vld [vmem:[%s1364_s19 + $0x36] sm:$0xf]  ;;  %v268_v12 = vmul.f32 %v1094_v33, %v259_v58  ;;  %v1098_v15 = vld [vmem:[%s1364_s19 + $0x30] sm:$0xf] }
  0x1a   : > { %v252_v3 = vadd.f32 %v248_v51, %v235_v54  ;;  %v253_v4 = vadd.f32 %v249_v56, %v236_v55  ;;  %v282_v13 = vmul.f32 %v1095_v60, %v273_v59  ;;  %v283_v18 = vmul.f32 %v1095_v60, %v274_v1  ;;  %v1099_v20 = vld [vmem:[%s1364_s19 + $0x40] sm:$0xf]  ;;  %v1101_v21 = vld [vmem:[%s1364_s19 + $0x11] sm:$0xf]  ;;  %v1110_v35 = vld [vmem:[%s1717_s1 + $0x9] ss:$0 sm:$0xff] }
  0x1b   : > { %v254_v10 = vadd.f32 %v250_v57, %v237_v61  ;;  %v255_v11 = vadd.f32 %v251_v63, %v238_v62  ;;  %v284_v19 = vmul.f32 %v1095_v60, %v275_v2  ;;  %v285_v25 = vmul.f32 %v1095_v60, %v276_v7  ;;  %v1102_v27 = vld [vmem:[%s1364_s19 + $0x21] sm:$0xf]  ;;  %v1103_v28 = vld [vmem:[%s1364_s19 + $0x31] sm:$0xf]  ;;  %v1115_v48 = vld [vmem:[%s1717_s1 + $0xa] ss:$0 sm:$0xff] }
  0x1c   : > { %v269_v16 = vadd.f32 %v265_v0, %v252_v3  ;;  %v270_v17 = vadd.f32 %v266_v5, %v253_v4  ;;  %v300_v26 = vmul.f32 %v1100_v9, %v1096_v8  ;;  %v301_v31 = vmul.f32 %v1100_v9, %v1097_v14  ;;  %v1104_v33 = vld [vmem:[%s1364_s19 + $0x41] sm:$0xf]  ;;  %v1106_v34 = vld [vmem:[%s1364_s19 + $0x12] sm:$0xf]  ;;  %v1120_v61 = vld [vmem:[%s1717_s1 + $0xb] ss:$0 sm:$0xff] }
  0x1d   : > { %v271_v23 = vadd.f32 %v267_v6, %v254_v10  ;;  %v272_v24 = vadd.f32 %v268_v12, %v255_v11  ;;  %v302_v32 = vmul.f32 %v1100_v9, %v1098_v15  ;;  %v303_v38 = vmul.f32 %v1100_v9, %v1099_v20  ;;  %v1107_v40 = vld [vmem:[%s1364_s19 + $0x22] sm:$0xf]  ;;  %v1108_v41 = vld [vmem:[%s1364_s19 + $0x32] sm:$0xf]  ;;  %v1125_v10 = vld [vmem:[%s1717_s1 + $0xc] ss:$0 sm:$0xff] }
  0x1e   : > { %v286_v29 = vadd.f32 %v282_v13, %v269_v16  ;;  %v287_v30 = vadd.f32 %v283_v18, %v270_v17  ;;  %v317_v39 = vmul.f32 %v1105_v22, %v1101_v21  ;;  %v318_v44 = vmul.f32 %v1105_v22, %v1102_v27  ;;  %v1109_v46 = vld [vmem:[%s1364_s19 + $0x42] sm:$0xf]  ;;  %v1111_v47 = vld [vmem:[%s1364_s19 + $0x13] sm:$0xf] }
  0x1f   : > { %v288_v36 = vadd.f32 %v284_v19, %v271_v23  ;;  %v289_v37 = vadd.f32 %v285_v25, %v272_v24  ;;  %v319_v45 = vmul.f32 %v1105_v22, %v1103_v28  ;;  %v320_v51 = vmul.f32 %v1105_v22, %v1104_v33  ;;  %v1112_v53 = vld [vmem:[%s1364_s19 + $0x23] sm:$0xf]  ;;  %v1113_v54 = vld [vmem:[%s1364_s19 + $0x33] sm:$0xf]  ;;  %v1130_v23 = vld [vmem:[%s1717_s1 + $0xd] ss:$0 sm:$0xff] }
  0x20   : > { %v304_v42 = vadd.f32 %v300_v26, %v286_v29  ;;  %v305_v43 = vadd.f32 %v301_v31, %v287_v30  ;;  %v334_v52 = vmul.f32 %v1110_v35, %v1106_v34  ;;  %v335_v57 = vmul.f32 %v1110_v35, %v1107_v40  ;;  %v1114_v59 = vld [vmem:[%s1364_s19 + $0x43] sm:$0xf]  ;;  %v1116_v60 = vld [vmem:[%s1364_s19 + $0x14] sm:$0xf] }
  0x21   : > { %v306_v49 = vadd.f32 %v302_v32, %v288_v36  ;;  %v307_v50 = vadd.f32 %v303_v38, %v289_v37  ;;  %v336_v58 = vmul.f32 %v1110_v35, %v1108_v41  ;;  %v337_v0 = vmul.f32 %v1110_v35, %v1109_v46  ;;  %v1117_v2 = vld [vmem:[%s1364_s19 + $0x24] sm:$0xf]  ;;  %v1118_v3 = vld [vmem:[%s1364_s19 + $0x34] sm:$0xf]  ;;  %v1131_v35 = vld [vmem:[%s1364_s19 + $0x20] sm:$0xf] }
  0x22   : > { %v321_v55 = vadd.f32 %v317_v39, %v304_v42  ;;  %v322_v56 = vadd.f32 %v318_v44, %v305_v43  ;;  %v351_v1 = vmul.f32 %v1115_v48, %v1111_v47  ;;  %v352_v6 = vmul.f32 %v1115_v48, %v1112_v53  ;;  %v1119_v8 = vld [vmem:[%s1364_s19 + $0x44] sm:$0xf]  ;;  %v1121_v9 = vld [vmem:[%s1364_s19 + $0x15] sm:$0xf]  ;;  %v1135_v36 = vld [vmem:[%s1717_s1 + $0xe] ss:$0 sm:$0xff] }
  0x23   : > { %v323_v62 = vadd.f32 %v319_v45, %v306_v49  ;;  %v324_v63 = vadd.f32 %v320_v51, %v307_v50  ;;  %v353_v7 = vmul.f32 %v1115_v48, %v1113_v54  ;;  %v354_v13 = vmul.f32 %v1115_v48, %v1114_v59  ;;  %v1122_v15 = vld [vmem:[%s1364_s19 + $0x25] sm:$0xf]  ;;  %v1123_v16 = vld [vmem:[%s1364_s19 + $0x35] sm:$0xf]  ;;  %v1132_v41 = vld [vmem:[%s1364_s19 + $0x30] sm:$0xf] }
  0x24   : > { %v338_v4 = vadd.f32 %v334_v52, %v321_v55  ;;  %v339_v5 = vadd.f32 %v335_v57, %v322_v56  ;;  %v368_v14 = vmul.f32 %v1120_v61, %v1116_v60  ;;  %v369_v19 = vmul.f32 %v1120_v61, %v1117_v2  ;;  %v1124_v21 = vld [vmem:[%s1364_s19 + $0x45] sm:$0xf]  ;;  %v1126_v22 = vld [vmem:[%s1364_s19 + $0x16] sm:$0xf]  ;;  %v1133_v42 = vld [vmem:[%s1364_s19 + $0x40] sm:$0xf] }
  0x25   : > { %v340_v11 = vadd.f32 %v336_v58, %v323_v62  ;;  %v341_v12 = vadd.f32 %v337_v0, %v324_v63  ;;  %v370_v20 = vmul.f32 %v1120_v61, %v1118_v3  ;;  %v371_v26 = vmul.f32 %v1120_v61, %v1119_v8  ;;  %v1127_v28 = vld [vmem:[%s1364_s19 + $0x26] sm:$0xf]  ;;  %v1128_v29 = vld [vmem:[%s1364_s19 + $0x36] sm:$0xf]  ;;  %v1134_v47 = vld [vmem:[%s1364_s19 + $0x50] sm:$0xf] }
  0x26   : > { %v355_v17 = vadd.f32 %v351_v1, %v338_v4  ;;  %v356_v18 = vadd.f32 %v352_v6, %v339_v5  ;;  %v385_v27 = vmul.f32 %v1125_v10, %v1121_v9  ;;  %v386_v32 = vmul.f32 %v1125_v10, %v1122_v15  ;;  %v1129_v34 = vld [vmem:[%s1364_s19 + $0x46] sm:$0xf]  ;;  %v1136_v48 = vld [vmem:[%s1364_s19 + $0x21] sm:$0xf]  ;;  %v1140_v49 = vld [vmem:[%s1717_s1 + $0xf] ss:$0 sm:$0xff] }
  0x27   : > { %v357_v24 = vadd.f32 %v353_v7, %v340_v11  ;;  %v358_v25 = vadd.f32 %v354_v13, %v341_v12  ;;  %v387_v33 = vmul.f32 %v1125_v10, %v1123_v16  ;;  %v388_v39 = vmul.f32 %v1125_v10, %v1124_v21  ;;  %v1137_v54 = vld [vmem:[%s1364_s19 + $0x31] sm:$0xf]  ;;  %v1138_v55 = vld [vmem:[%s1364_s19 + $0x41] sm:$0xf]  ;;  %v1145_v62 = vld [vmem:[%s1717_s1 + $0x10] ss:$0 sm:$0xff] }
  0x28   : > { %v372_v30 = vadd.f32 %v368_v14, %v355_v17  ;;  %v373_v31 = vadd.f32 %v369_v19, %v356_v18  ;;  %v402_v40 = vmul.f32 %v1130_v23, %v1126_v22  ;;  %v403_v45 = vmul.f32 %v1130_v23, %v1127_v28  ;;  %v1139_v60 = vld [vmem:[%s1364_s19 + $0x51] sm:$0xf]  ;;  %v1141_v61 = vld [vmem:[%s1364_s19 + $0x22] sm:$0xf] }
  0x29   : > { %v374_v37 = vadd.f32 %v370_v20, %v357_v24  ;;  %v375_v38 = vadd.f32 %v371_v26, %v358_v25  ;;  %v404_v46 = vmul.f32 %v1130_v23, %v1128_v29  ;;  %v405_v52 = vmul.f32 %v1130_v23, %v1129_v34  ;;  %v1142_v3 = vld [vmem:[%s1364_s19 + $0x32] sm:$0xf]  ;;  %v1143_v4 = vld [vmem:[%s1364_s19 + $0x42] sm:$0xf]  ;;  %v1150_v11 = vld [vmem:[%s1717_s1 + $0x11] ss:$0 sm:$0xff] }
  0x2a   : > { %v389_v43 = vadd.f32 %v385_v27, %v372_v30  ;;  %v390_v44 = vadd.f32 %v386_v32, %v373_v31  ;;  %v420_v53 = vmul.f32 %v1135_v36, %v1131_v35  ;;  %v421_v58 = vmul.f32 %v1135_v36, %v1132_v41  ;;  %v1144_v9 = vld [vmem:[%s1364_s19 + $0x52] sm:$0xf]  ;;  %v1146_v10 = vld [vmem:[%s1364_s19 + $0x23] sm:$0xf] }
  0x2b   : > { %v391_v50 = vadd.f32 %v387_v33, %v374_v37  ;;  %v392_v51 = vadd.f32 %v388_v39, %v375_v38  ;;  %v422_v59 = vmul.f32 %v1135_v36, %v1133_v42  ;;  %v423_v1 = vmul.f32 %v1135_v36, %v1134_v47  ;;  %v1147_v16 = vld [vmem:[%s1364_s19 + $0x33] sm:$0xf]  ;;  %v1148_v17 = vld [vmem:[%s1364_s19 + $0x43] sm:$0xf]  ;;  %v1155_v24 = vld [vmem:[%s1717_s1 + $0x12] ss:$0 sm:$0xff] }
  0x2c   : > { %v406_v56 = vadd.f32 %v402_v40, %v389_v43  ;;  %v407_v57 = vadd.f32 %v403_v45, %v390_v44  ;;  %v437_v2 = vmul.f32 %v1140_v49, %v1136_v48  ;;  %v438_v7 = vmul.f32 %v1140_v49, %v1137_v54  ;;  %v1149_v22 = vld [vmem:[%s1364_s19 + $0x53] sm:$0xf]  ;;  %v1151_v23 = vld [vmem:[%s1364_s19 + $0x24] sm:$0xf] }
  0x2d   : > { %v408_v63 = vadd.f32 %v404_v46, %v391_v50  ;;  %v409_v0 = vadd.f32 %v405_v52, %v392_v51  ;;  %v439_v8 = vmul.f32 %v1140_v49, %v1138_v55  ;;  %v440_v14 = vmul.f32 %v1140_v49, %v1139_v60  ;;  %v1152_v29 = vld [vmem:[%s1364_s19 + $0x34] sm:$0xf]  ;;  %v1153_v30 = vld [vmem:[%s1364_s19 + $0x44] sm:$0xf]  ;;  %v1160_v37 = vld [vmem:[%s1717_s1 + $0x13] ss:$0 sm:$0xff] }
  0x2e   : > { %v424_v5 = vadd.f32 %v420_v53, %v406_v56  ;;  %v425_v6 = vadd.f32 %v421_v58, %v407_v57  ;;  %v454_v15 = vmul.f32 %v1145_v62, %v1141_v61  ;;  %v455_v20 = vmul.f32 %v1145_v62, %v1142_v3  ;;  %v1154_v35 = vld [vmem:[%s1364_s19 + $0x54] sm:$0xf]  ;;  %v1156_v36 = vld [vmem:[%s1364_s19 + $0x25] sm:$0xf] }
  0x2f   : > { %v426_v12 = vadd.f32 %v422_v59, %v408_v63  ;;  %v427_v13 = vadd.f32 %v423_v1, %v409_v0  ;;  %v456_v21 = vmul.f32 %v1145_v62, %v1143_v4  ;;  %v457_v27 = vmul.f32 %v1145_v62, %v1144_v9  ;;  %v1157_v42 = vld [vmem:[%s1364_s19 + $0x35] sm:$0xf]  ;;  %v1158_v43 = vld [vmem:[%s1364_s19 + $0x45] sm:$0xf]  ;;  %v1165_v50 = vld [vmem:[%s1717_s1 + $0x14] ss:$0 sm:$0xff] }
  0x30   : > { %v441_v18 = vadd.f32 %v437_v2, %v424_v5  ;;  %v442_v19 = vadd.f32 %v438_v7, %v425_v6  ;;  %v471_v28 = vmul.f32 %v1150_v11, %v1146_v10  ;;  %v472_v33 = vmul.f32 %v1150_v11, %v1147_v16  ;;  %v1159_v48 = vld [vmem:[%s1364_s19 + $0x55] sm:$0xf]  ;;  %v1161_v49 = vld [vmem:[%s1364_s19 + $0x26] sm:$0xf]  ;;  %v1166_v62 = vld [vmem:[%s1364_s19 + $0x30] sm:$0xf] }
  0x31   : > { %v443_v25 = vadd.f32 %v439_v8, %v426_v12  ;;  %v444_v26 = vadd.f32 %v440_v14, %v427_v13  ;;  %v473_v34 = vmul.f32 %v1150_v11, %v1148_v17  ;;  %v474_v40 = vmul.f32 %v1150_v11, %v1149_v22  ;;  %v1162_v55 = vld [vmem:[%s1364_s19 + $0x36] sm:$0xf]  ;;  %v1163_v56 = vld [vmem:[%s1364_s19 + $0x46] sm:$0xf]  ;;  %v1170_v63 = vld [vmem:[%s1717_s1 + $0x15] ss:$0 sm:$0xff] }
  0x32   : > { %v458_v31 = vadd.f32 %v454_v15, %v441_v18  ;;  %v459_v32 = vadd.f32 %v455_v20, %v442_v19  ;;  %v488_v41 = vmul.f32 %v1155_v24, %v1151_v23  ;;  %v489_v46 = vmul.f32 %v1155_v24, %v1152_v29  ;;  %v1164_v61 = vld [vmem:[%s1364_s19 + $0x56] sm:$0xf]  ;;  %v1167_v4 = vld [vmem:[%s1364_s19 + $0x40] sm:$0xf]  ;;  %v1168_v5 = vld [vmem:[%s1364_s19 + $0x50] sm:$0xf] }
  0x33   : > { %v460_v38 = vadd.f32 %v456_v21, %v443_v25  ;;  %v461_v39 = vadd.f32 %v457_v27, %v444_v26  ;;  %v490_v47 = vmul.f32 %v1155_v24, %v1153_v30  ;;  %v491_v53 = vmul.f32 %v1155_v24, %v1154_v35  ;;  %v1169_v10 = vld [vmem:[%s1364_s19 + $0x60] sm:$0xf]  ;;  %v1171_v11 = vld [vmem:[%s1364_s19 + $0x31] sm:$0xf]  ;;  %v1175_v12 = vld [vmem:[%s1717_s1 + $0x16] ss:$0 sm:$0xff] }
  0x34   : > { %v475_v44 = vadd.f32 %v471_v28, %v458_v31  ;;  %v476_v45 = vadd.f32 %v472_v33, %v459_v32  ;;  %v505_v54 = vmul.f32 %v1160_v37, %v1156_v36  ;;  %v506_v59 = vmul.f32 %v1160_v37, %v1157_v42  ;;  %v1172_v17 = vld [vmem:[%s1364_s19 + $0x41] sm:$0xf]  ;;  %v1173_v18 = vld [vmem:[%s1364_s19 + $0x51] sm:$0xf]  ;;  %v1180_v25 = vld [vmem:[%s1717_s1 + $0x17] ss:$0 sm:$0xff] }
  0x35   : > { %v477_v51 = vadd.f32 %v473_v34, %v460_v38  ;;  %v478_v52 = vadd.f32 %v474_v40, %v461_v39  ;;  %v507_v60 = vmul.f32 %v1160_v37, %v1158_v43  ;;  %v508_v2 = vmul.f32 %v1160_v37, %v1159_v48  ;;  %v1174_v23 = vld [vmem:[%s1364_s19 + $0x61] sm:$0xf]  ;;  %v1176_v24 = vld [vmem:[%s1364_s19 + $0x32] sm:$0xf]  ;;  %v1185_v38 = vld [vmem:[%s1717_s1 + $0x18] ss:$0 sm:$0xff] }
  0x36   : > { %v492_v57 = vadd.f32 %v488_v41, %v475_v44  ;;  %v493_v58 = vadd.f32 %v489_v46, %v476_v45  ;;  %v522_v3 = vmul.f32 %v1165_v50, %v1161_v49  ;;  %v523_v8 = vmul.f32 %v1165_v50, %v1162_v55  ;;  %v1177_v30 = vld [vmem:[%s1364_s19 + $0x42] sm:$0xf]  ;;  %v1178_v31 = vld [vmem:[%s1364_s19 + $0x52] sm:$0xf] }
  0x37   : > { %v494_v0 = vadd.f32 %v490_v47, %v477_v51  ;;  %v495_v1 = vadd.f32 %v491_v53, %v478_v52  ;;  %v524_v9 = vmul.f32 %v1165_v50, %v1163_v56  ;;  %v525_v15 = vmul.f32 %v1165_v50, %v1164_v61  ;;  %v1179_v36 = vld [vmem:[%s1364_s19 + $0x62] sm:$0xf]  ;;  %v1181_v37 = vld [vmem:[%s1364_s19 + $0x33] sm:$0xf]  ;;  %v1190_v51 = vld [vmem:[%s1717_s1 + $0x19] ss:$0 sm:$0xff] }
  0x38   : > { %v509_v6 = vadd.f32 %v505_v54, %v492_v57  ;;  %v510_v7 = vadd.f32 %v506_v59, %v493_v58  ;;  %v540_v16 = vmul.f32 %v1170_v63, %v1166_v62  ;;  %v541_v21 = vmul.f32 %v1170_v63, %v1167_v4  ;;  %v1182_v43 = vld [vmem:[%s1364_s19 + $0x43] sm:$0xf]  ;;  %v1183_v44 = vld [vmem:[%s1364_s19 + $0x53] sm:$0xf] }
  0x39   : > { %v511_v13 = vadd.f32 %v507_v60, %v494_v0  ;;  %v512_v14 = vadd.f32 %v508_v2, %v495_v1  ;;  %v542_v22 = vmul.f32 %v1170_v63, %v1168_v5  ;;  %v543_v28 = vmul.f32 %v1170_v63, %v1169_v10  ;;  %v1184_v49 = vld [vmem:[%s1364_s19 + $0x63] sm:$0xf]  ;;  %v1186_v50 = vld [vmem:[%s1364_s19 + $0x34] sm:$0xf]  ;;  %v1195_v0 = vld [vmem:[%s1717_s1 + $0x1a] ss:$0 sm:$0xff] }
  0x3a   : > { %v526_v19 = vadd.f32 %v522_v3, %v509_v6  ;;  %v527_v20 = vadd.f32 %v523_v8, %v510_v7  ;;  %v557_v29 = vmul.f32 %v1175_v12, %v1171_v11  ;;  %v558_v34 = vmul.f32 %v1175_v12, %v1172_v17  ;;  %v1187_v56 = vld [vmem:[%s1364_s19 + $0x44] sm:$0xf]  ;;  %v1188_v57 = vld [vmem:[%s1364_s19 + $0x54] sm:$0xf] }
  0x3b   : > { %v528_v26 = vadd.f32 %v524_v9, %v511_v13  ;;  %v529_v27 = vadd.f32 %v525_v15, %v512_v14  ;;  %v559_v35 = vmul.f32 %v1175_v12, %v1173_v18  ;;  %v560_v41 = vmul.f32 %v1175_v12, %v1174_v23  ;;  %v1189_v62 = vld [vmem:[%s1364_s19 + $0x64] sm:$0xf]  ;;  %v1191_v63 = vld [vmem:[%s1364_s19 + $0x35] sm:$0xf]  ;;  %v1200_v13 = vld [vmem:[%s1717_s1 + $0x1b] ss:$0 sm:$0xff] }
  0x3c   : > { %v544_v32 = vadd.f32 %v540_v16, %v526_v19  ;;  %v545_v33 = vadd.f32 %v541_v21, %v527_v20  ;;  %v574_v42 = vmul.f32 %v1180_v25, %v1176_v24  ;;  %v575_v47 = vmul.f32 %v1180_v25, %v1177_v30  ;;  %v1192_v5 = vld [vmem:[%s1364_s19 + $0x45] sm:$0xf]  ;;  %v1193_v6 = vld [vmem:[%s1364_s19 + $0x55] sm:$0xf] }
  0x3d   : > { %v546_v39 = vadd.f32 %v542_v22, %v528_v26  ;;  %v547_v40 = vadd.f32 %v543_v28, %v529_v27  ;;  %v576_v48 = vmul.f32 %v1180_v25, %v1178_v31  ;;  %v577_v54 = vmul.f32 %v1180_v25, %v1179_v36  ;;  %v1194_v11 = vld [vmem:[%s1364_s19 + $0x65] sm:$0xf]  ;;  %v1196_v12 = vld [vmem:[%s1364_s19 + $0x36] sm:$0xf]  ;;  %v1201_v25 = vld [vmem:[%s1364_s19 + $0x40] sm:$0xf] }
  0x3e   : > { %v561_v45 = vadd.f32 %v557_v29, %v544_v32  ;;  %v562_v46 = vadd.f32 %v558_v34, %v545_v33  ;;  %v591_v55 = vmul.f32 %v1185_v38, %v1181_v37  ;;  %v592_v60 = vmul.f32 %v1185_v38, %v1182_v43  ;;  %v1197_v18 = vld [vmem:[%s1364_s19 + $0x46] sm:$0xf]  ;;  %v1198_v19 = vld [vmem:[%s1364_s19 + $0x56] sm:$0xf]  ;;  %v1205_v26 = vld [vmem:[%s1717_s1 + $0x1c] ss:$0 sm:$0xff] }
  0x3f   : > { %v563_v52 = vadd.f32 %v559_v35, %v546_v39  ;;  %v564_v53 = vadd.f32 %v560_v41, %v547_v40  ;;  %v593_v61 = vmul.f32 %v1185_v38, %v1183_v44  ;;  %v594_v3 = vmul.f32 %v1185_v38, %v1184_v49  ;;  %v1199_v24 = vld [vmem:[%s1364_s19 + $0x66] sm:$0xf]  ;;  %v1202_v31 = vld [vmem:[%s1364_s19 + $0x50] sm:$0xf]  ;;  %v1203_v32 = vld [vmem:[%s1364_s19 + $0x60] sm:$0xf] }
  0x40   : > { %v578_v58 = vadd.f32 %v574_v42, %v561_v45  ;;  %v579_v59 = vadd.f32 %v575_v47, %v562_v46  ;;  %v608_v4 = vmul.f32 %v1190_v51, %v1186_v50  ;;  %v609_v9 = vmul.f32 %v1190_v51, %v1187_v56  ;;  %v1204_v37 = vld [vmem:[%s1364_s19 + $0x70] sm:$0xf]  ;;  %v1206_v38 = vld [vmem:[%s1364_s19 + $0x41] sm:$0xf]  ;;  %v1210_v39 = vld [vmem:[%s1717_s1 + $0x1d] ss:$0 sm:$0xff] }
  0x41   : > { %v580_v1 = vadd.f32 %v576_v48, %v563_v52  ;;  %v581_v2 = vadd.f32 %v577_v54, %v564_v53  ;;  %v610_v10 = vmul.f32 %v1190_v51, %v1188_v57  ;;  %v611_v16 = vmul.f32 %v1190_v51, %v1189_v62  ;;  %v1207_v44 = vld [vmem:[%s1364_s19 + $0x51] sm:$0xf]  ;;  %v1208_v45 = vld [vmem:[%s1364_s19 + $0x61] sm:$0xf]  ;;  %v1215_v52 = vld [vmem:[%s1717_s1 + $0x1e] ss:$0 sm:$0xff] }
  0x42   : > { %v595_v7 = vadd.f32 %v591_v55, %v578_v58  ;;  %v596_v8 = vadd.f32 %v592_v60, %v579_v59  ;;  %v625_v17 = vmul.f32 %v1195_v0, %v1191_v63  ;;  %v626_v22 = vmul.f32 %v1195_v0, %v1192_v5  ;;  %v1209_v50 = vld [vmem:[%s1364_s19 + $0x71] sm:$0xf]  ;;  %v1211_v51 = vld [vmem:[%s1364_s19 + $0x42] sm:$0xf] }
  0x43   : > { %v597_v14 = vadd.f32 %v593_v61, %v580_v1  ;;  %v598_v15 = vadd.f32 %v594_v3, %v581_v2  ;;  %v627_v23 = vmul.f32 %v1195_v0, %v1193_v6  ;;  %v628_v29 = vmul.f32 %v1195_v0, %v1194_v11  ;;  %v1212_v57 = vld [vmem:[%s1364_s19 + $0x52] sm:$0xf]  ;;  %v1213_v58 = vld [vmem:[%s1364_s19 + $0x62] sm:$0xf]  ;;  %v1220_v1 = vld [vmem:[%s1717_s1 + $0x1f] ss:$0 sm:$0xff] }
  0x44   : > { %v612_v20 = vadd.f32 %v608_v4, %v595_v7  ;;  %v613_v21 = vadd.f32 %v609_v9, %v596_v8  ;;  %v642_v30 = vmul.f32 %v1200_v13, %v1196_v12  ;;  %v643_v35 = vmul.f32 %v1200_v13, %v1197_v18  ;;  %v1214_v63 = vld [vmem:[%s1364_s19 + $0x72] sm:$0xf]  ;;  %v1216_v0 = vld [vmem:[%s1364_s19 + $0x43] sm:$0xf] }
  0x45   : > { %v614_v27 = vadd.f32 %v610_v10, %v597_v14  ;;  %v615_v28 = vadd.f32 %v611_v16, %v598_v15  ;;  %v644_v36 = vmul.f32 %v1200_v13, %v1198_v19  ;;  %v645_v42 = vmul.f32 %v1200_v13, %v1199_v24  ;;  %v1217_v6 = vld [vmem:[%s1364_s19 + $0x53] sm:$0xf]  ;;  %v1218_v7 = vld [vmem:[%s1364_s19 + $0x63] sm:$0xf]  ;;  %v1225_v14 = vld [vmem:[%s1717_s1 + $0x20] ss:$0 sm:$0xff] }
  0x46   : > { %v629_v33 = vadd.f32 %v625_v17, %v612_v20  ;;  %v630_v34 = vadd.f32 %v626_v22, %v613_v21  ;;  %v660_v43 = vmul.f32 %v1205_v26, %v1201_v25  ;;  %v661_v48 = vmul.f32 %v1205_v26, %v1202_v31  ;;  %v1219_v12 = vld [vmem:[%s1364_s19 + $0x73] sm:$0xf]  ;;  %v1221_v13 = vld [vmem:[%s1364_s19 + $0x44] sm:$0xf] }
  0x47   : > { %v631_v40 = vadd.f32 %v627_v23, %v614_v27  ;;  %v632_v41 = vadd.f32 %v628_v29, %v615_v28  ;;  %v662_v49 = vmul.f32 %v1205_v26, %v1203_v32  ;;  %v663_v55 = vmul.f32 %v1205_v26, %v1204_v37  ;;  %v1222_v19 = vld [vmem:[%s1364_s19 + $0x54] sm:$0xf]  ;;  %v1223_v20 = vld [vmem:[%s1364_s19 + $0x64] sm:$0xf]  ;;  %v1230_v27 = vld [vmem:[%s1717_s1 + $0x21] ss:$0 sm:$0xff] }
  0x48   : > { %v646_v46 = vadd.f32 %v642_v30, %v629_v33  ;;  %v647_v47 = vadd.f32 %v643_v35, %v630_v34  ;;  %v677_v56 = vmul.f32 %v1210_v39, %v1206_v38  ;;  %v678_v61 = vmul.f32 %v1210_v39, %v1207_v44  ;;  %v1224_v25 = vld [vmem:[%s1364_s19 + $0x74] sm:$0xf]  ;;  %v1226_v26 = vld [vmem:[%s1364_s19 + $0x45] sm:$0xf] }
  0x49   : > { %v648_v53 = vadd.f32 %v644_v36, %v631_v40  ;;  %v649_v54 = vadd.f32 %v645_v42, %v632_v41  ;;  %v679_v62 = vmul.f32 %v1210_v39, %v1208_v45  ;;  %v680_v4 = vmul.f32 %v1210_v39, %v1209_v50  ;;  %v1227_v32 = vld [vmem:[%s1364_s19 + $0x55] sm:$0xf]  ;;  %v1228_v33 = vld [vmem:[%s1364_s19 + $0x65] sm:$0xf]  ;;  %v1235_v40 = vld [vmem:[%s1717_s1 + $0x22] ss:$0 sm:$0xff] }
  0x4a   : > { %v664_v59 = vadd.f32 %v660_v43, %v646_v46  ;;  %v665_v60 = vadd.f32 %v661_v48, %v647_v47  ;;  %v694_v5 = vmul.f32 %v1215_v52, %v1211_v51  ;;  %v695_v10 = vmul.f32 %v1215_v52, %v1212_v57  ;;  %v1229_v38 = vld [vmem:[%s1364_s19 + $0x75] sm:$0xf]  ;;  %v1231_v39 = vld [vmem:[%s1364_s19 + $0x46] sm:$0xf] }
  0x4b   : > { %v666_v2 = vadd.f32 %v662_v49, %v648_v53  ;;  %v667_v3 = vadd.f32 %v663_v55, %v649_v54  ;;  %v696_v11 = vmul.f32 %v1215_v52, %v1213_v58  ;;  %v697_v17 = vmul.f32 %v1215_v52, %v1214_v63  ;;  %v1232_v45 = vld [vmem:[%s1364_s19 + $0x56] sm:$0xf]  ;;  %v1233_v46 = vld [vmem:[%s1364_s19 + $0x66] sm:$0xf]  ;;  %v1236_v52 = vld [vmem:[%s1364_s19 + $0x50] sm:$0xf] }
  0x4c   : > { %v681_v8 = vadd.f32 %v677_v56, %v664_v59  ;;  %v682_v9 = vadd.f32 %v678_v61, %v665_v60  ;;  %v711_v18 = vmul.f32 %v1220_v1, %v1216_v0  ;;  %v712_v23 = vmul.f32 %v1220_v1, %v1217_v6  ;;  %v1234_v51 = vld [vmem:[%s1364_s19 + $0x76] sm:$0xf]  ;;  %v1240_v53 = vld [vmem:[%s1717_s1 + $0x23] ss:$0 sm:$0xff]  ;;  %v1238_v59 = vld [vmem:[%s1364_s19 + $0x70] sm:$0xf] }
  0x4d   : > { %v683_v15 = vadd.f32 %v679_v62, %v666_v2  ;;  %v684_v16 = vadd.f32 %v680_v4, %v667_v3  ;;  %v713_v24 = vmul.f32 %v1220_v1, %v1218_v7  ;;  %v714_v30 = vmul.f32 %v1220_v1, %v1219_v12  ;;  %v1237_v58 = vld [vmem:[%s1364_s19 + $0x60] sm:$0xf]  ;;  %v1241_v1 = vld [vmem:[%s1364_s19 + $0x51] sm:$0xf]  ;;  %v1245_v2 = vld [vmem:[%s1717_s1 + $0x24] ss:$0 sm:$0xff] }
  0x4e   : > { %v698_v21 = vadd.f32 %v694_v5, %v681_v8  ;;  %v699_v22 = vadd.f32 %v695_v10, %v682_v9  ;;  %v728_v31 = vmul.f32 %v1225_v14, %v1221_v13  ;;  %v729_v36 = vmul.f32 %v1225_v14, %v1222_v19  ;;  %v1239_v0 = vld [vmem:[%s1364_s19 + $0x80] sm:$0xf]  ;;  %v1243_v8 = vld [vmem:[%s1364_s19 + $0x71] sm:$0xf] }
  0x4f   : > { %v700_v28 = vadd.f32 %v696_v11, %v683_v15  ;;  %v701_v29 = vadd.f32 %v697_v17, %v684_v16  ;;  %v730_v37 = vmul.f32 %v1225_v14, %v1223_v20  ;;  %v731_v43 = vmul.f32 %v1225_v14, %v1224_v25  ;;  %v1242_v7 = vld [vmem:[%s1364_s19 + $0x61] sm:$0xf]  ;;  %v1246_v14 = vld [vmem:[%s1364_s19 + $0x52] sm:$0xf]  ;;  %v1250_v15 = vld [vmem:[%s1717_s1 + $0x25] ss:$0 sm:$0xff] }
  0x50   : > { %v715_v34 = vadd.f32 %v711_v18, %v698_v21  ;;  %v716_v35 = vadd.f32 %v712_v23, %v699_v22  ;;  %v745_v44 = vmul.f32 %v1230_v27, %v1226_v26  ;;  %v746_v49 = vmul.f32 %v1230_v27, %v1227_v32  ;;  %v1244_v13 = vld [vmem:[%s1364_s19 + $0x81] sm:$0xf]  ;;  %v1248_v21 = vld [vmem:[%s1364_s19 + $0x72] sm:$0xf] }
  0x51   : > { %v717_v41 = vadd.f32 %v713_v24, %v700_v28  ;;  %v718_v42 = vadd.f32 %v714_v30, %v701_v29  ;;  %v747_v50 = vmul.f32 %v1230_v27, %v1228_v33  ;;  %v748_v56 = vmul.f32 %v1230_v27, %v1229_v38  ;;  %v1247_v20 = vld [vmem:[%s1364_s19 + $0x62] sm:$0xf]  ;;  %v1251_v27 = vld [vmem:[%s1364_s19 + $0x53] sm:$0xf]  ;;  %v1255_v28 = vld [vmem:[%s1717_s1 + $0x26] ss:$0 sm:$0xff] }
  0x52   : > { %v732_v47 = vadd.f32 %v728_v31, %v715_v34  ;;  %v733_v48 = vadd.f32 %v729_v36, %v716_v35  ;;  %v762_v57 = vmul.f32 %v1235_v40, %v1231_v39  ;;  %v763_v62 = vmul.f32 %v1235_v40, %v1232_v45  ;;  %v1249_v26 = vld [vmem:[%s1364_s19 + $0x82] sm:$0xf]  ;;  %v1253_v34 = vld [vmem:[%s1364_s19 + $0x73] sm:$0xf] }
  0x53   : > { %v734_v54 = vadd.f32 %v730_v37, %v717_v41  ;;  %v735_v55 = vadd.f32 %v731_v43, %v718_v42  ;;  %v764_v63 = vmul.f32 %v1235_v40, %v1233_v46  ;;  %v765_v5 = vmul.f32 %v1235_v40, %v1234_v51  ;;  %v1252_v33 = vld [vmem:[%s1364_s19 + $0x63] sm:$0xf]  ;;  %v1256_v40 = vld [vmem:[%s1364_s19 + $0x54] sm:$0xf]  ;;  %v1260_v41 = vld [vmem:[%s1717_s1 + $0x27] ss:$0 sm:$0xff] }
  0x54   : > { %v749_v60 = vadd.f32 %v745_v44, %v732_v47  ;;  %v750_v61 = vadd.f32 %v746_v49, %v733_v48  ;;  %v780_v6 = vmul.f32 %v1240_v53, %v1236_v52  ;;  %v781_v11 = vmul.f32 %v1240_v53, %v1237_v58  ;;  %v1254_v39 = vld [vmem:[%s1364_s19 + $0x83] sm:$0xf]  ;;  %v1258_v47 = vld [vmem:[%s1364_s19 + $0x74] sm:$0xf] }
  0x55   : > { %v751_v3 = vadd.f32 %v747_v50, %v734_v54  ;;  %v752_v4 = vadd.f32 %v748_v56, %v735_v55  ;;  %v782_v12 = vmul.f32 %v1240_v53, %v1238_v59  ;;  %v783_v18 = vmul.f32 %v1240_v53, %v1239_v0  ;;  %v1257_v46 = vld [vmem:[%s1364_s19 + $0x64] sm:$0xf]  ;;  %v1261_v53 = vld [vmem:[%s1364_s19 + $0x55] sm:$0xf]  ;;  %v1265_v54 = vld [vmem:[%s1717_s1 + $0x28] ss:$0 sm:$0xff] }
  0x56   : > { %v766_v9 = vadd.f32 %v762_v57, %v749_v60  ;;  %v767_v10 = vadd.f32 %v763_v62, %v750_v61  ;;  %v797_v19 = vmul.f32 %v1245_v2, %v1241_v1  ;;  %v798_v24 = vmul.f32 %v1245_v2, %v1242_v7  ;;  %v1259_v52 = vld [vmem:[%s1364_s19 + $0x84] sm:$0xf]  ;;  %v1263_v60 = vld [vmem:[%s1364_s19 + $0x75] sm:$0xf] }
  0x57   : > { %v768_v16 = vadd.f32 %v764_v63, %v751_v3  ;;  %v769_v17 = vadd.f32 %v765_v5, %v752_v4  ;;  %v799_v25 = vmul.f32 %v1245_v2, %v1243_v8  ;;  %v800_v31 = vmul.f32 %v1245_v2, %v1244_v13  ;;  %v1262_v59 = vld [vmem:[%s1364_s19 + $0x65] sm:$0xf]  ;;  %v1266_v2 = vld [vmem:[%s1364_s19 + $0x56] sm:$0xf]  ;;  %v1270_v3 = vld [vmem:[%s1717_s1 + $0x29] ss:$0 sm:$0xff] }
  0x58   : > { %v784_v22 = vadd.f32 %v780_v6, %v766_v9  ;;  %v785_v23 = vadd.f32 %v781_v11, %v767_v10  ;;  %v814_v32 = vmul.f32 %v1250_v15, %v1246_v14  ;;  %v815_v37 = vmul.f32 %v1250_v15, %v1247_v20  ;;  %v1264_v1 = vld [vmem:[%s1364_s19 + $0x85] sm:$0xf]  ;;  %v1268_v9 = vld [vmem:[%s1364_s19 + $0x76] sm:$0xf] }
  0x59   : > { %v786_v29 = vadd.f32 %v782_v12, %v768_v16  ;;  %v787_v30 = vadd.f32 %v783_v18, %v769_v17  ;;  %v816_v38 = vmul.f32 %v1250_v15, %v1248_v21  ;;  %v817_v44 = vmul.f32 %v1250_v15, %v1249_v26  ;;  %v1267_v8 = vld [vmem:[%s1364_s19 + $0x66] sm:$0xf]  ;;  %v1271_v15 = vld [vmem:[%s1364_s19 + $0x60] sm:$0xf]  ;;  %v1275_v16 = vld [vmem:[%s1717_s1 + $0x2a] ss:$0 sm:$0xff] }
  0x5a   : > { %v801_v35 = vadd.f32 %v797_v19, %v784_v22  ;;  %v802_v36 = vadd.f32 %v798_v24, %v785_v23  ;;  %v831_v45 = vmul.f32 %v1255_v28, %v1251_v27  ;;  %v832_v50 = vmul.f32 %v1255_v28, %v1252_v33  ;;  %v1269_v14 = vld [vmem:[%s1364_s19 + $0x86] sm:$0xf]  ;;  %v1272_v21 = vld [vmem:[%s1364_s19 + $0x70] sm:$0xf]  ;;  %v1273_v22 = vld [vmem:[%s1364_s19 + $0x80] sm:$0xf] }
  0x5b   : > { %v803_v42 = vadd.f32 %v799_v25, %v786_v29  ;;  %v804_v43 = vadd.f32 %v800_v31, %v787_v30  ;;  %v833_v51 = vmul.f32 %v1255_v28, %v1253_v34  ;;  %v834_v57 = vmul.f32 %v1255_v28, %v1254_v39  ;;  %v1274_v27 = vld [vmem:[%s1364_s19 + $0x90] sm:$0xf]  ;;  %v1276_v28 = vld [vmem:[%s1364_s19 + $0x61] sm:$0xf]  ;;  %v1280_v29 = vld [vmem:[%s1717_s1 + $0x2b] ss:$0 sm:$0xff] }
  0x5c   : > { %v818_v48 = vadd.f32 %v814_v32, %v801_v35  ;;  %v819_v49 = vadd.f32 %v815_v37, %v802_v36  ;;  %v848_v58 = vmul.f32 %v1260_v41, %v1256_v40  ;;  %v849_v63 = vmul.f32 %v1260_v41, %v1257_v46  ;;  %v1277_v34 = vld [vmem:[%s1364_s19 + $0x71] sm:$0xf]  ;;  %v1278_v35 = vld [vmem:[%s1364_s19 + $0x81] sm:$0xf] }
  0x5d   : > { %v820_v55 = vadd.f32 %v816_v38, %v803_v42  ;;  %v821_v56 = vadd.f32 %v817_v44, %v804_v43  ;;  %v850_v0 = vmul.f32 %v1260_v41, %v1258_v47  ;;  %v851_v6 = vmul.f32 %v1260_v41, %v1259_v52  ;;  %v1279_v40 = vld [vmem:[%s1364_s19 + $0x91] sm:$0xf]  ;;  %v1281_v41 = vld [vmem:[%s1364_s19 + $0x62] sm:$0xf]  ;;  %v1285_v42 = vld [vmem:[%s1717_s1 + $0x2c] ss:$0 sm:$0xff] }
  0x5e   : > { %v835_v61 = vadd.f32 %v831_v45, %v818_v48  ;;  %v836_v62 = vadd.f32 %v832_v50, %v819_v49  ;;  %v865_v7 = vmul.f32 %v1265_v54, %v1261_v53  ;;  %v866_v12 = vmul.f32 %v1265_v54, %v1262_v59  ;;  %v1282_v47 = vld [vmem:[%s1364_s19 + $0x72] sm:$0xf]  ;;  %v1283_v48 = vld [vmem:[%s1364_s19 + $0x82] sm:$0xf] }
  0x5f   : > { %v837_v4 = vadd.f32 %v833_v51, %v820_v55  ;;  %v838_v5 = vadd.f32 %v834_v57, %v821_v56  ;;  %v867_v13 = vmul.f32 %v1265_v54, %v1263_v60  ;;  %v868_v19 = vmul.f32 %v1265_v54, %v1264_v1  ;;  %v1284_v53 = vld [vmem:[%s1364_s19 + $0x92] sm:$0xf]  ;;  %v1286_v54 = vld [vmem:[%s1364_s19 + $0x63] sm:$0xf]  ;;  %v1290_v55 = vld [vmem:[%s1717_s1 + $0x2d] ss:$0 sm:$0xff] }
  0x60   : > { %v852_v10 = vadd.f32 %v848_v58, %v835_v61  ;;  %v853_v11 = vadd.f32 %v849_v63, %v836_v62  ;;  %v882_v20 = vmul.f32 %v1270_v3, %v1266_v2  ;;  %v883_v25 = vmul.f32 %v1270_v3, %v1267_v8  ;;  %v1287_v60 = vld [vmem:[%s1364_s19 + $0x73] sm:$0xf]  ;;  %v1288_v61 = vld [vmem:[%s1364_s19 + $0x83] sm:$0xf] }
  0x61   : > { %v854_v17 = vadd.f32 %v850_v0, %v837_v4  ;;  %v855_v18 = vadd.f32 %v851_v6, %v838_v5  ;;  %v884_v26 = vmul.f32 %v1270_v3, %v1268_v9  ;;  %v885_v32 = vmul.f32 %v1270_v3, %v1269_v14  ;;  %v1289_v2 = vld [vmem:[%s1364_s19 + $0x93] sm:$0xf]  ;;  %v1291_v3 = vld [vmem:[%s1364_s19 + $0x64] sm:$0xf]  ;;  %v1295_v4 = vld [vmem:[%s1717_s1 + $0x2e] ss:$0 sm:$0xff] }
  0x62   : > { %v869_v23 = vadd.f32 %v865_v7, %v852_v10  ;;  %v870_v24 = vadd.f32 %v866_v12, %v853_v11  ;;  %v900_v33 = vmul.f32 %v1275_v16, %v1271_v15  ;;  %v901_v38 = vmul.f32 %v1275_v16, %v1272_v21  ;;  %v1292_v9 = vld [vmem:[%s1364_s19 + $0x74] sm:$0xf]  ;;  %v1293_v10 = vld [vmem:[%s1364_s19 + $0x84] sm:$0xf] }
  0x63   : > { %v871_v30 = vadd.f32 %v867_v13, %v854_v17  ;;  %v872_v31 = vadd.f32 %v868_v19, %v855_v18  ;;  %v902_v39 = vmul.f32 %v1275_v16, %v1273_v22  ;;  %v903_v45 = vmul.f32 %v1275_v16, %v1274_v27  ;;  %v1294_v15 = vld [vmem:[%s1364_s19 + $0x94] sm:$0xf]  ;;  %v1296_v16 = vld [vmem:[%s1364_s19 + $0x65] sm:$0xf]  ;;  %v1300_v17 = vld [vmem:[%s1717_s1 + $0x2f] ss:$0 sm:$0xff] }
  0x64   : > { %v886_v36 = vadd.f32 %v882_v20, %v869_v23  ;;  %v887_v37 = vadd.f32 %v883_v25, %v870_v24  ;;  %v917_v46 = vmul.f32 %v1280_v29, %v1276_v28  ;;  %v918_v51 = vmul.f32 %v1280_v29, %v1277_v34  ;;  %v1297_v22 = vld [vmem:[%s1364_s19 + $0x75] sm:$0xf]  ;;  %v1298_v23 = vld [vmem:[%s1364_s19 + $0x85] sm:$0xf] }
  0x65   : > { %v888_v43 = vadd.f32 %v884_v26, %v871_v30  ;;  %v889_v44 = vadd.f32 %v885_v32, %v872_v31  ;;  %v919_v52 = vmul.f32 %v1280_v29, %v1278_v35  ;;  %v920_v58 = vmul.f32 %v1280_v29, %v1279_v40  ;;  %v1299_v28 = vld [vmem:[%s1364_s19 + $0x95] sm:$0xf]  ;;  %v1301_v29 = vld [vmem:[%s1364_s19 + $0x66] sm:$0xf]  ;;  %v1305_v30 = vld [vmem:[%s1717_s1 + $0x30] ss:$0 sm:$0xff] }
  0x66   : > { %v904_v49 = vadd.f32 %v900_v33, %v886_v36  ;;  %v905_v50 = vadd.f32 %v901_v38, %v887_v37  ;;  %v934_v59 = vmul.f32 %v1285_v42, %v1281_v41  ;;  %v935_v0 = vmul.f32 %v1285_v42, %v1282_v47  ;;  %v1302_v35 = vld [vmem:[%s1364_s19 + $0x76] sm:$0xf]  ;;  %v1303_v36 = vld [vmem:[%s1364_s19 + $0x86] sm:$0xf] }
  0x67   : > { %v906_v56 = vadd.f32 %v902_v39, %v888_v43  ;;  %v907_v57 = vadd.f32 %v903_v45, %v889_v44  ;;  %v936_v1 = vmul.f32 %v1285_v42, %v1283_v48  ;;  %v937_v7 = vmul.f32 %v1285_v42, %v1284_v53  ;;  %v1304_v41 = vld [vmem:[%s1364_s19 + $0x96] sm:$0xf]  ;;  %v1306_v53 = vld [vmem:[%s1718_s2] ss:$0 sm:$0xff] }
  0x68   : > { %v921_v62 = vadd.f32 %v917_v46, %v904_v49  ;;  %v922_v63 = vadd.f32 %v918_v51, %v905_v50  ;;  %v951_v8 = vmul.f32 %v1290_v55, %v1286_v54  ;;  %v952_v13 = vmul.f32 %v1290_v55, %v1287_v60 }
  0x69   : > { %v923_v5 = vadd.f32 %v919_v52, %v906_v56  ;;  %v924_v6 = vadd.f32 %v920_v58, %v907_v57  ;;  %v953_v14 = vmul.f32 %v1290_v55, %v1288_v61  ;;  %v954_v20 = vmul.f32 %v1290_v55, %v1289_v2 }
  0x6a   : > { %v938_v11 = vadd.f32 %v934_v59, %v921_v62  ;;  %v939_v12 = vadd.f32 %v935_v0, %v922_v63  ;;  %v968_v21 = vmul.f32 %v1295_v4, %v1291_v3  ;;  %v969_v26 = vmul.f32 %v1295_v4, %v1292_v9 }
  0x6b   : > { %v940_v18 = vadd.f32 %v936_v1, %v923_v5  ;;  %v941_v19 = vadd.f32 %v937_v7, %v924_v6  ;;  %v970_v27 = vmul.f32 %v1295_v4, %v1293_v10  ;;  %v971_v33 = vmul.f32 %v1295_v4, %v1294_v15 }
  0x6c   : > { %v955_v24 = vadd.f32 %v951_v8, %v938_v11  ;;  %v956_v25 = vadd.f32 %v952_v13, %v939_v12  ;;  %v985_v34 = vmul.f32 %v1300_v17, %v1296_v16  ;;  %v986_v39 = vmul.f32 %v1300_v17, %v1297_v22 }
  0x6d   : > { %v957_v31 = vadd.f32 %v953_v14, %v940_v18  ;;  %v958_v32 = vadd.f32 %v954_v20, %v941_v19  ;;  %v987_v40 = vmul.f32 %v1300_v17, %v1298_v23  ;;  %v988_v44 = vmul.f32 %v1300_v17, %v1299_v28 }
  0x6e   : > { %v972_v37 = vadd.f32 %v968_v21, %v955_v24  ;;  %v973_v38 = vadd.f32 %v969_v26, %v956_v25  ;;  %v1002_v45 = vmul.f32 %v1305_v30, %v1301_v29  ;;  %v1003_v48 = vmul.f32 %v1305_v30, %v1302_v35 }
  0x6f   : > { %v974_v42 = vadd.f32 %v970_v27, %v957_v31  ;;  %v975_v43 = vadd.f32 %v971_v33, %v958_v32  ;;  %v1004_v49 = vmul.f32 %v1305_v30, %v1303_v36  ;;  %v1005_v52 = vmul.f32 %v1305_v30, %v1304_v41 }
  0x70   : > { %v989_v46 = vadd.f32 %v985_v34, %v972_v37  ;;  %v990_v47 = vadd.f32 %v986_v39, %v973_v38 }
  0x71   : > { %v991_v50 = vadd.f32 %v987_v40, %v974_v42  ;;  %v992_v51 = vadd.f32 %v988_v44, %v975_v43 }
  0x72   : > { %v1006_v54 = vadd.f32 %v1002_v45, %v989_v46  ;;  %v1007_v55 = vadd.f32 %v1003_v48, %v990_v47 }
  0x73   : > { %v1008_v56 = vadd.f32 %v1004_v49, %v991_v50  ;;  %v1009_v57 = vadd.f32 %v1005_v52, %v992_v51 }
  0x74   : > { %v1017_v58 = vadd.f32 %v1306_v53, %v1006_v54  ;;  %v1018_v59 = vadd.f32 %v1306_v53, %v1007_v55 }
  0x75   : > { %v1019_v60 = vadd.f32 %v1306_v53, %v1008_v56  ;;  %v1020_v61 = vadd.f32 %v1306_v53, %v1009_v57 }
  0x76   : > { %1022 = vst.msk [vmem:[%s170_s24] sm:$0xf] %vm1021_vm0, %v1017_v58  ;;  %1023 = vst.msk [vmem:[%s170_s24 + $0x4] sm:$0xf] %vm1021_vm0, %v1018_v59 }
  0x77   : > { %1024 = vst.msk [vmem:[%s170_s24 + $0x8] sm:$0xf] %vm1021_vm0, %v1019_v60  ;;  %1025 = vst.msk [vmem:[%s170_s24 + $0xc] sm:$0xf] %vm1021_vm0, %v1020_v61 }
  0x78 PF: > { %s13_s12 = sadd.s32 1, %s1325_s12  }
  0x79   : > { %p10_p4 = scmp.ge.s32.totalorder %s13_s12, 4  }
  0x7b   :  { %12 = sbr.rel (!%p10_p4) target bundleno = 1 (0x1), region = 68 }

// kernel: _lambda_.13
= control target key start
LH: loop header
LB: loop body
LE: loop exit
PB: predicated region body
PF: predicated region fallthrough
CT: control target
= control target key end

     0   :  { %v157_v1 = vmov 0.0   ;;  %vm18_vm0 = vcmask 125952   ;;  %vm158_vm1 = vmmov 0   ;;  %s195_s0 = inlined_call_operand.vmem [shape: f32[2,4,16], index: 0, kind: input, shape index: {}]   ;;  %s196_s1 = inlined_call_operand.vmem [shape: bf16[16,10], index: 1, kind: input, shape index: {}]   ;;  %s197_s2 = inlined_call_operand.vmem [shape: f32[1,10], index: 2, kind: input, shape index: {}]   ;;  %s198_s3 = inlined_call_operand.hbm [shape: f32[2,10], index: 3, kind: output, shape index: {}]  }
   0x1   :  { %v134_v0 = vld [vmem:[%s196_s1] sm:$0xff]   ;;  %125 = vmatprep.subr.bf16.mxu0 %v157_v1  ;;  %127 = vmatprep.mubr.msk.bf16.mxu0 %vm158_vm1, %v157_v1 }
   0x2   :  { %v16_v2 = vld [vmem:[%s195_s0] sm:$0xf]  ;;  %v17_v3 = vld [vmem:[%s195_s0 + $0x4] sm:$0xf]  ;;  %126 = vmatpush3.bf16.msra.mxu0 %v134_v0 }
   0x3   :  { %v19_v4 = vsel %vm18_vm0, %v16_v2, 0.0  ;;  %v26_v5 = vsel %vm18_vm0, %v17_v3, 0.0 }
   0x4   :  { %v20_v6 = vrot.slane %v19_v4, 4  ;;  %v27_v7 = vrot.slane %v26_v5, 4 }
   0x5   :  { %8 = vsyncpa [#allocation3], 0  ;;  %vm51_vm2 = vcmask 1041409   ;;  %vm60_vm3 = vcmask 130048   ;;  %v120_v26 = vld [vmem:[%s197_s2] ss:$0 sm:$0xff] }
   0x6   :  { %v21_v8 = vadd.f32 %v20_v6, %v19_v4  ;;  %v28_v9 = vadd.f32 %v27_v7, %v26_v5  ;;  %s159_s18 = smov [#allocation2]   ;;  %vm104_vm4 = vcmask 74752  }
   0x7   :  { %s112_s19 = sshll.u32 %s159_s18, 4  ;;  %s113_s19 = int_to_ptr.vmem [resolvable:$true] %s112_s19 }
   0x8   :  { %v22_v10 = vrot.slane %v21_v8, 2  ;;  %v29_v11 = vrot.slane %v28_v9, 2  ;;  %s135_s20 = scalar_lea.vmem %s113_s19, 32  ;;  %p140_p1 = scmp.lt.s32.totalorder %s113_s19, %s113_s19 }
   0x9   :  { %p136_p0 = scmp.ne.s32.totalorder %s113_s19, %s135_s20  ;;  %p141_p2 = scmp.lt.s32.totalorder %s135_s20, %s135_s20 }
   0xa   :  { %v23_v12 = vadd.f32 %v22_v10, %v21_v8  ;;  %v30_v13 = vadd.f32 %v29_v11, %v28_v9 }
   0xb   :  { %p142_p3 = por %p141_p2, %p140_p1 }
   0xc   :  { %v24_v14 = vrot.slane %v23_v12, 1  ;;  %v31_v15 = vrot.slane %v30_v13, 1 }
   0xd   :  { %p143_p4 = pnand %p142_p3, %p136_p0 }
   0xe   :  { %v25_v16 = vadd.f32 %v24_v14, %v23_v12  ;;  %v32_v17 = vadd.f32 %v31_v15, %v30_v13 }
  0x10   :  { %v34_v18 = vmul.f32 0.25, %v25_v16  ;;  %v35_v19 = vmul.f32 0.25, %v32_v17 }
  0x12   :  { %v36_v20 = vpack.c.bf16 %v34_v18, %v34_v18  ;;  %v37_v21 = vpack.c.bf16 %v35_v19, %v35_v19 }
  0x14   :  { %v49_v22 = vunpack.c.l.b16 %v36_v20  ;;  %v50_v23 = vunpack.c.l.b16 %v37_v21 }
  0x16   :  { %v52_v24 = vsel %vm51_vm2, %v50_v23, %v49_v22 }
  0x17   :  { %v53_v25 = vpack.c.b16 %v52_v24, %v52_v24 }
  0x19   :  { %128 = vmatmul.mubr.msk.bf16.vlgmr.msra.gmra.mxu0 %vm60_vm3, %v53_v25 }
  0xd9   :  { %v98_v27 = vpop.f32.mrf.mxu0 }
  0xda   :  { %v99_v28 = vadd.f32 %v120_v26, %v98_v27 }
  0xdb   :  { %v129_v29 = vpop.f32.mrf.mxu0 }
  0xdc   :  { %105 = vst.msk [vmem:[#allocation2] sm:$0x3] %vm104_vm4, %v99_v28 }
  0xdd   :  { %v101_v30 = vpop.f32.mrf.mxu0 }
  0xde   :  { %146 = shalt.err (!%p143_p4)
}
  0xdf   :  { %115 = dma.vmem_to_hbm [thread:$0]  %s113_s19, 32, %s198_s3, [#allocation3]   ;;  %v130_v31 = vpop.f32.mrf.mxu0 }
  0xe0   :  { %155 = dma.done.wait [#allocation3], 32  }
  0xe1   :  { %156 = vsyncadd [#allocation3], 4294967264 }
  0xe2   :  { %119 = vsyncpa [#allocation3], 1 }

// kernel: _lambda_.12
= control target key start
LH: loop header
LB: loop body
LE: loop exit
PB: predicated region body
PF: predicated region fallthrough
CT: control target
= control target key end

     0   :  { %vm31_vm0 = vcmask 130048   ;;  %v268_v7 = vmov 0.0   ;;  %vm269_vm1 = vmmov 0   ;;  %vm170_vm2 = vcmask 523264   ;;  %s355_s0 = inlined_call_operand.vmem [shape: f32[8,16], index: 0, kind: input, shape index: {}]   ;;  %s356_s4 = inlined_call_operand.vmem [shape: bf16[16,64], index: 4, kind: input, shape index: {}]   ;;  %s357_s2 = inlined_call_operand.vmem [shape: f32[1,16], index: 2, kind: input, shape index: {}]   ;;  %s358_s3 = inlined_call_operand.vmem [shape: f32[1,16], index: 3, kind: input, shape index: {}]   ;;  %s359_s6 = inlined_call_operand.vmem [shape: bf16[64,16], index: 6, kind: input, shape index: {}]   ;;  %s360_s5 = inlined_call_operand.vmem [shape: f32[1,64], index: 5, kind: input, shape index: {}]   ;;  %s361_s7 = inlined_call_operand.vmem [shape: f32[1,16], index: 7, kind: input, shape index: {}]   ;;  %s362_s1 = inlined_call_operand.vmem [shape: f32[8,16], index: 1, kind: input, shape index: {}]   ;;  %s363_s8 = inlined_call_operand.vmem [shape: f32[8,16], index: 8, kind: output, shape index: {}]  }
   0x1   :  { %v30_v0 = vld [vmem:[%s355_s0] sm:$0xff]  ;;  %239 = vmatprep.subr.bf16.mxu0 %v268_v7  ;;  %241 = vmatprep.mubr.msk.bf16.mxu0 %vm269_vm1, %v268_v7  ;;  %v260_v19 = vld [vmem:[%s359_s6 + $0x18] sm:$0xff]   ;;  %v261_v20 = vld [vmem:[%s359_s6 + $0x10] sm:$0xff]  }
   0x2   :  { %v32_v1 = vsel %vm31_vm0, %v30_v0, 0.0  ;;  %v259_v8 = vld [vmem:[%s356_s4] sm:$0xff]   ;;  %245 = vmatprep.subr.bf16.mxu1 %v268_v7  ;;  %253 = vmatprep.mubr.msk.bf16.mxu1 %vm269_vm1, %v268_v7  ;;  %v262_v21 = vld [vmem:[%s359_s6 + $0x8] sm:$0xff]  }
   0x3   :  { %33 = vadd.xlane.f32.xlu0 %v32_v1  ;;  %240 = vmatpush3.bf16.msra.mxu0 %v259_v8  ;;  %v221_v13 = vld [vmem:[%s357_s2] ss:$0 sm:$0xff] }
   0x4   :  { %v222_v15 = vld [vmem:[%s358_s3] ss:$0 sm:$0xff]  ;;  %246 = vmatpush3.bf16.msra.mxu1 %v260_v19 }
   0x5   :  { %247 = vmatprep.subr.bf16.mxu1 %v268_v7  ;;  %v263_v22 = vld [vmem:[%s359_s6] sm:$0xff]  }
   0x6   :  { %v223_v23 = vld [vmem:[%s360_s5] ss:$0 sm:$0xff] }
   0x7   :  { %v226_v39 = vld [vmem:[%s361_s7] ss:$0 sm:$0xff] }
   0x8   :  { %248 = vmatpush3.bf16.msra.mxu1 %v261_v20  ;;  %v214_v41 = vld [vmem:[%s362_s1] sm:$0xff] }
   0x9   :  { %249 = vmatprep.subr.bf16.mxu1 %v268_v7 }
   0xc   :  { %250 = vmatpush3.bf16.msra.mxu1 %v262_v21 }
   0xd   :  { %251 = vmatprep.subr.bf16.mxu1 %v268_v7 }
  0x10   :  { %252 = vmatpush3.bf16.msra.mxu1 %v263_v22 }
  0x8c   :  { %v34_v2 = vpop.xlane.xlu0 %33 }
  0x8d   :  { %v36_v3 = vmul.f32 0.0625, %v34_v2 }
  0x8f   :  { %v37_v4 = vsub.f32 %v30_v0, %v36_v3 }
  0x91   :  { %v38_v5 = vmul.f32 %v37_v4, %v37_v4 }
  0x93   :  { %v39_v6 = vsel %vm31_vm0, %v38_v5, 0.0 }
  0x94   :  { %40 = vadd.xlane.f32.xlu0 %v39_v6 }
 0x11d   :  { %v41_v9 = vpop.xlane.xlu0 %40 }
 0x11e   :  { %v42_v10 = vmul.f32 0.0625, %v41_v9 }
 0x120   :  { %v43_v11 = vadd.f32 1e-06, %v42_v10 }
 0x122   :  { %264 = vrsqrt.f32 %v43_v11 }
 0x12f   :  { %v265_v12 = vpop.eup %264 }
 0x130   :  { %v45_v14 = vmul.f32 %v265_v12, %v37_v4 }
 0x132   :  { %v53_v16 = vmul.f32 %v221_v13, %v45_v14 }
 0x134   :  { %v61_v17 = vadd.f32 %v222_v15, %v53_v16 }
 0x136   :  { %v62_v18 = vpack.c.bf16 %v61_v17, %v61_v17 }
 0x138   :  { %242 = vmatmul.mubr.msk.bf16.vlgmr.msra.gmra.mxu0 %vm31_vm0, %v62_v18 }
 0x1f8   :  { %v115_v24 = vpop.f32.mrf.mxu0 }
 0x1f9   :  { %v116_v25 = vadd.f32 %v223_v23, %v115_v24 }
 0x1fa   :  { %v243_v26 = vpop.f32.mrf.mxu0 }
 0x1fb   :  { %v121_v27 = vmul.f32 %v116_v25, %v116_v25 }
 0x1fc   :  { %v118_v28 = vpop.f32.mrf.mxu0 }
 0x1fd   :  { %v122_v29 = vmul.f32 %v121_v27, %v116_v25 }
 0x1fe   :  { %v244_v30 = vpop.f32.mrf.mxu0 }
 0x1ff   :  { %v123_v31 = vmul.f32 0.044715, %v122_v29 }
 0x201   :  { %v124_v32 = vadd.f32 %v123_v31, %v116_v25 }
 0x203   :  { %v125_v33 = vmul.f32 0.7978846, %v124_v32 }
 0x205   :  { %266 = vtanh.f32 %v125_v33 }
 0x212   :  { %v267_v34 = vpop.eup %266 }
 0x213   :  { %v127_v35 = vadd.f32 1.0, %v267_v34 }
 0x215   :  { %v128_v36 = vmul.f32 0.5, %v127_v35 }
 0x217   :  { %v129_v37 = vmul.f32 %v128_v36, %v116_v25 }
 0x219   :  { %v130_v38 = vpack.c.bf16 %v129_v37, %v129_v37 }
 0x21b   :  { %254 = vmatmul.mubr.msk.bf16.vlgmr.msra.gmra.mxu1 %vm170_vm2, %v130_v38 }
 0x2db   :  { %v208_v40 = vpop.f32.mrf.mxu1 }
 0x2dc   :  { %v209_v42 = vadd.f32 %v226_v39, %v208_v40 }
 0x2dd   :  { %v255_v43 = vpop.f32.mrf.mxu1 }
 0x2de   :  { %v215_v44 = vadd.f32 %v214_v41, %v209_v42 }
 0x2df   :  { %v211_v45 = vpop.f32.mrf.mxu1 }
 0x2e0   :  { %216 = vst.msk [vmem:[%s363_s8] sm:$0xff] %vm31_vm0, %v215_v44 }
 0x2e1   :  { %v256_v46 = vpop.f32.mrf.mxu1 }

// kernel: _lambda_.11
= control target key start
LH: loop header
LB: loop body
LE: loop exit
PB: predicated region body
PF: predicated region fallthrough
CT: control target
= control target key end

     0   :  { %s966_s12 = smov 0   ;;  %s1237_s0 = inlined_call_operand.vmem [shape: f32[2,8,8,16], index: 0, kind: input, shape index: {}]   ;;  %s1238_s1 = inlined_call_operand.vmem [shape: f32[49,16], index: 1, kind: input, shape index: {}]   ;;  %s1239_s2 = inlined_call_operand.vmem [shape: f32[1,16], index: 2, kind: input, shape index: {}]   ;;  %s1240_s3 = inlined_call_operand.vmem [shape: f32[2,2,2,16], index: 3, kind: output, shape index: {}]  }
   0x1 LB: > { %s783_s13 = sadd.s32 4294967295, %s944_s12   ;;  %p787_p0 = scmp.ge.s32.totalorder %s944_s12, 1  ;;  %s944_s12 = sphi %s966_s12, %s13_s12  }
   0x2   : > { %p137_p1 = scmp.lt.s32.totalorder %s944_s12, 3 }
   0x4   : > { %p138_p2 = pnand %p787_p0, %p137_p1 }
   0x5   : > { %p161_p3 = scmp.lt.s32.totalorder (!%p138_p2), %s783_s13, 1 }
   0x6   : > { %141 = sbr.rel (%p138_p2) target bundleno = 117 (0x75), region = 32 }
   0xb   : > { %s1242_s13 = smov (!%p161_p3, %s783_s13), 1  ;;  %v792_v0 = vld [vmem:[%s1238_s1] ss:$0 sm:$0xff]  ;;  %v793_v1 = vld [vmem:[%s1238_s1 + $0x1] ss:$0 sm:$0xff]  ;;  %vm725_vm0 = vcmask 123904  }
   0xc   : > { %s928_s14 = sshll.u32 %s1242_s13, 6  ;;  %v794_v2 = vld [vmem:[%s1238_s1 + $0x2] ss:$0 sm:$0xff]  ;;  %v795_v3 = vld [vmem:[%s1238_s1 + $0x3] ss:$0 sm:$0xff]  ;;  %s929_s19 = sshll.u32 %s1242_s13, 2 }
   0xd   : > { %s986_s21 = scalar_lea.vmem %s1237_s0, %s928_s14  ;;  %v796_v7 = vld [vmem:[%s1238_s1 + $0x4] ss:$0 sm:$0xff]  ;;  %v797_v26 = vld [vmem:[%s1238_s1 + $0x5] ss:$0 sm:$0xff]  ;;  %v798_v33 = vld [vmem:[%s1238_s1 + $0x6] ss:$0 sm:$0xff]  ;;  %s170_s25 = scalar_lea.vmem %s1240_s3, %s929_s19 }
   0xe   : > { %v171_v4 = vld [vmem:[%s986_s21] sm:$0x3]  ;;  %v172_v5 = vld [vmem:[%s986_s21 + $0x8] sm:$0x3]  ;;  %v193_v12 = vld [vmem:[%s986_s21 + $0x2] sm:$0x3] }
   0xf   : > { %v182_v6 = vld [vmem:[%s986_s21 + $0x1] sm:$0x3]  ;;  %v178_v8 = vmul.f32 %v792_v0, %v171_v4  ;;  %v179_v9 = vmul.f32 %v792_v0, %v172_v5  ;;  %v183_v10 = vld [vmem:[%s986_s21 + $0x9] sm:$0x3]  ;;  %v200_v15 = vmul.f32 %v794_v2, %v193_v12  ;;  %v204_v17 = vld [vmem:[%s986_s21 + $0x3] sm:$0x3] }
  0x10   : > { %v189_v11 = vmul.f32 %v793_v1, %v182_v6  ;;  %v194_v13 = vld [vmem:[%s986_s21 + $0xa] sm:$0x3]  ;;  %v190_v14 = vmul.f32 %v793_v1, %v183_v10  ;;  %v215_v19 = vld [vmem:[%s986_s21 + $0x4] sm:$0x3]  ;;  %v211_v21 = vmul.f32 %v795_v3, %v204_v17  ;;  %v216_v22 = vld [vmem:[%s986_s21 + $0xc] sm:$0x3] }
  0x11   : > { %v201_v16 = vmul.f32 %v794_v2, %v194_v13  ;;  %v205_v18 = vld [vmem:[%s986_s21 + $0xb] sm:$0x3]  ;;  %v226_v25 = vld [vmem:[%s986_s21 + $0x5] sm:$0x3]  ;;  %v222_v28 = vmul.f32 %v796_v7, %v215_v19  ;;  %v227_v29 = vld [vmem:[%s986_s21 + $0xd] sm:$0x3]  ;;  %v223_v31 = vmul.f32 %v796_v7, %v216_v22 }
  0x12   : > { %v191_v20 = vadd.f32 %v189_v11, %v178_v8  ;;  %v192_v23 = vadd.f32 %v190_v14, %v179_v9  ;;  %v212_v24 = vmul.f32 %v795_v3, %v205_v18  ;;  %v237_v32 = vld [vmem:[%s986_s21 + $0x6] sm:$0x3]  ;;  %v233_v35 = vmul.f32 %v797_v26, %v226_v25  ;;  %v238_v36 = vld [vmem:[%s986_s21 + $0xe] sm:$0x3]  ;;  %v799_v39 = vld [vmem:[%s986_s21 + $0x8] sm:$0x3] }
  0x13   : > { %v234_v38 = vmul.f32 %v797_v26, %v227_v29  ;;  %v801_v40 = vld [vmem:[%s1238_s1 + $0x7] ss:$0 sm:$0xff]  ;;  %v244_v42 = vmul.f32 %v798_v33, %v237_v32  ;;  %v800_v43 = vld [vmem:[%s986_s21 + $0x10] sm:$0x3]  ;;  %v245_v45 = vmul.f32 %v798_v33, %v238_v36  ;;  %v802_v46 = vld [vmem:[%s986_s21 + $0x9] sm:$0x3] }
  0x14   : > { %v202_v27 = vadd.f32 %v200_v15, %v191_v20  ;;  %v203_v30 = vadd.f32 %v201_v16, %v192_v23  ;;  %v804_v47 = vld [vmem:[%s1238_s1 + $0x8] ss:$0 sm:$0xff]  ;;  %v256_v49 = vmul.f32 %v801_v40, %v799_v39  ;;  %v803_v50 = vld [vmem:[%s986_s21 + $0x11] sm:$0x3]  ;;  %v257_v52 = vmul.f32 %v801_v40, %v800_v43  ;;  %v805_v53 = vld [vmem:[%s986_s21 + $0xa] sm:$0x3] }
  0x15   : > { %v807_v54 = vld [vmem:[%s1238_s1 + $0x9] ss:$0 sm:$0xff]  ;;  %v267_v56 = vmul.f32 %v804_v47, %v802_v46  ;;  %v806_v57 = vld [vmem:[%s986_s21 + $0x12] sm:$0x3]  ;;  %v268_v59 = vmul.f32 %v804_v47, %v803_v50  ;;  %v808_v60 = vld [vmem:[%s986_s21 + $0xb] sm:$0x3] }
  0x16   : > { %v213_v34 = vadd.f32 %v211_v21, %v202_v27  ;;  %v214_v37 = vadd.f32 %v212_v24, %v203_v30  ;;  %v810_v61 = vld [vmem:[%s1238_s1 + $0xa] ss:$0 sm:$0xff]  ;;  %v278_v63 = vmul.f32 %v807_v54, %v805_v53  ;;  %v809_v0 = vld [vmem:[%s986_s21 + $0x13] sm:$0x3]  ;;  %v279_v2 = vmul.f32 %v807_v54, %v806_v57  ;;  %v811_v3 = vld [vmem:[%s986_s21 + $0xc] sm:$0x3] }
  0x17   : > { %v813_v4 = vld [vmem:[%s1238_s1 + $0xb] ss:$0 sm:$0xff]  ;;  %v289_v6 = vmul.f32 %v810_v61, %v808_v60  ;;  %v812_v7 = vld [vmem:[%s986_s21 + $0x14] sm:$0x3]  ;;  %v290_v9 = vmul.f32 %v810_v61, %v809_v0  ;;  %v814_v10 = vld [vmem:[%s986_s21 + $0xd] sm:$0x3] }
  0x18   : > { %v224_v41 = vadd.f32 %v222_v28, %v213_v34  ;;  %v225_v44 = vadd.f32 %v223_v31, %v214_v37  ;;  %v816_v11 = vld [vmem:[%s1238_s1 + $0xc] ss:$0 sm:$0xff]  ;;  %v300_v13 = vmul.f32 %v813_v4, %v811_v3  ;;  %v815_v14 = vld [vmem:[%s986_s21 + $0x15] sm:$0x3]  ;;  %v301_v16 = vmul.f32 %v813_v4, %v812_v7  ;;  %v817_v17 = vld [vmem:[%s986_s21 + $0xe] sm:$0x3] }
  0x19   : > { %v819_v18 = vld [vmem:[%s1238_s1 + $0xd] ss:$0 sm:$0xff]  ;;  %v311_v20 = vmul.f32 %v816_v11, %v814_v10  ;;  %v818_v21 = vld [vmem:[%s986_s21 + $0x16] sm:$0x3]  ;;  %v312_v23 = vmul.f32 %v816_v11, %v815_v14  ;;  %v820_v24 = vld [vmem:[%s986_s21 + $0x10] sm:$0x3] }
  0x1a   : > { %v235_v48 = vadd.f32 %v233_v35, %v224_v41  ;;  %v236_v51 = vadd.f32 %v234_v38, %v225_v44  ;;  %v822_v25 = vld [vmem:[%s1238_s1 + $0xe] ss:$0 sm:$0xff]  ;;  %v322_v27 = vmul.f32 %v819_v18, %v817_v17  ;;  %v821_v28 = vld [vmem:[%s986_s21 + $0x18] sm:$0x3]  ;;  %v323_v30 = vmul.f32 %v819_v18, %v818_v21  ;;  %v823_v31 = vld [vmem:[%s986_s21 + $0x11] sm:$0x3] }
  0x1b   : > { %v825_v32 = vld [vmem:[%s1238_s1 + $0xf] ss:$0 sm:$0xff]  ;;  %v334_v34 = vmul.f32 %v822_v25, %v820_v24  ;;  %v824_v35 = vld [vmem:[%s986_s21 + $0x19] sm:$0x3]  ;;  %v335_v37 = vmul.f32 %v822_v25, %v821_v28  ;;  %v826_v38 = vld [vmem:[%s986_s21 + $0x12] sm:$0x3] }
  0x1c   : > { %v246_v55 = vadd.f32 %v244_v42, %v235_v48  ;;  %v247_v58 = vadd.f32 %v245_v45, %v236_v51  ;;  %v828_v39 = vld [vmem:[%s1238_s1 + $0x10] ss:$0 sm:$0xff]  ;;  %v345_v41 = vmul.f32 %v825_v32, %v823_v31  ;;  %v827_v42 = vld [vmem:[%s986_s21 + $0x1a] sm:$0x3]  ;;  %v346_v44 = vmul.f32 %v825_v32, %v824_v35  ;;  %v829_v45 = vld [vmem:[%s986_s21 + $0x13] sm:$0x3] }
  0x1d   : > { %v831_v46 = vld [vmem:[%s1238_s1 + $0x11] ss:$0 sm:$0xff]  ;;  %v356_v48 = vmul.f32 %v828_v39, %v826_v38  ;;  %v357_v51 = vmul.f32 %v828_v39, %v827_v42  ;;  %v834_v53 = vld [vmem:[%s1238_s1 + $0x12] ss:$0 sm:$0xff]  ;;  %v837_v60 = vld [vmem:[%s1238_s1 + $0x13] ss:$0 sm:$0xff] }
  0x1e   : > { %v258_v62 = vadd.f32 %v256_v49, %v246_v55  ;;  %v259_v1 = vadd.f32 %v257_v52, %v247_v58  ;;  %v830_v49 = vld [vmem:[%s986_s21 + $0x1b] sm:$0x3]  ;;  %v832_v52 = vld [vmem:[%s986_s21 + $0x14] sm:$0x3]  ;;  %v367_v55 = vmul.f32 %v831_v46, %v829_v45  ;;  %v846_v17 = vld [vmem:[%s1238_s1 + $0x16] ss:$0 sm:$0xff] }
  0x1f   : > { %v368_v58 = vmul.f32 %v831_v46, %v830_v49  ;;  %v840_v3 = vld [vmem:[%s1238_s1 + $0x14] ss:$0 sm:$0xff]  ;;  %v843_v10 = vld [vmem:[%s1238_s1 + $0x15] ss:$0 sm:$0xff]  ;;  %v849_v24 = vld [vmem:[%s1238_s1 + $0x17] ss:$0 sm:$0xff] }
  0x20   : > { %v269_v5 = vadd.f32 %v267_v56, %v258_v62  ;;  %v270_v8 = vadd.f32 %v268_v59, %v259_v1  ;;  %v833_v56 = vld [vmem:[%s986_s21 + $0x1c] sm:$0x3]  ;;  %v835_v59 = vld [vmem:[%s986_s21 + $0x15] sm:$0x3]  ;;  %v378_v62 = vmul.f32 %v834_v53, %v832_v52  ;;  %v852_v31 = vld [vmem:[%s1238_s1 + $0x18] ss:$0 sm:$0xff] }
  0x21   : > { %v379_v1 = vmul.f32 %v834_v53, %v833_v56  ;;  %v855_v38 = vld [vmem:[%s1238_s1 + $0x19] ss:$0 sm:$0xff]  ;;  %v858_v45 = vld [vmem:[%s1238_s1 + $0x1a] ss:$0 sm:$0xff]  ;;  %v861_v52 = vld [vmem:[%s1238_s1 + $0x1b] ss:$0 sm:$0xff] }
  0x22   : > { %v280_v12 = vadd.f32 %v278_v63, %v269_v5  ;;  %v281_v15 = vadd.f32 %v279_v2, %v270_v8  ;;  %v836_v63 = vld [vmem:[%s986_s21 + $0x1d] sm:$0x3]  ;;  %v838_v2 = vld [vmem:[%s986_s21 + $0x16] sm:$0x3]  ;;  %v389_v5 = vmul.f32 %v837_v60, %v835_v59  ;;  %v864_v59 = vld [vmem:[%s1238_s1 + $0x1c] ss:$0 sm:$0xff] }
  0x23   : > { %v390_v8 = vmul.f32 %v837_v60, %v836_v63 }
  0x24   : > { %v291_v19 = vadd.f32 %v289_v6, %v280_v12  ;;  %v292_v22 = vadd.f32 %v290_v9, %v281_v15  ;;  %v839_v6 = vld [vmem:[%s986_s21 + $0x1e] sm:$0x3]  ;;  %v841_v9 = vld [vmem:[%s986_s21 + $0x18] sm:$0x3]  ;;  %v400_v12 = vmul.f32 %v840_v3, %v838_v2  ;;  %v867_v2 = vld [vmem:[%s1238_s1 + $0x1d] ss:$0 sm:$0xff] }
  0x25   : > { %v401_v15 = vmul.f32 %v840_v3, %v839_v6 }
  0x26   : > { %v302_v26 = vadd.f32 %v300_v13, %v291_v19  ;;  %v303_v29 = vadd.f32 %v301_v16, %v292_v22  ;;  %v842_v13 = vld [vmem:[%s986_s21 + $0x20] sm:$0x3]  ;;  %v844_v16 = vld [vmem:[%s986_s21 + $0x19] sm:$0x3]  ;;  %v412_v19 = vmul.f32 %v843_v10, %v841_v9  ;;  %v870_v9 = vld [vmem:[%s1238_s1 + $0x1e] ss:$0 sm:$0xff] }
  0x27   : > { %v413_v22 = vmul.f32 %v843_v10, %v842_v13 }
  0x28   : > { %v313_v33 = vadd.f32 %v311_v20, %v302_v26  ;;  %v314_v36 = vadd.f32 %v312_v23, %v303_v29  ;;  %v845_v20 = vld [vmem:[%s986_s21 + $0x21] sm:$0x3]  ;;  %v847_v23 = vld [vmem:[%s986_s21 + $0x1a] sm:$0x3]  ;;  %v423_v26 = vmul.f32 %v846_v17, %v844_v16  ;;  %v873_v16 = vld [vmem:[%s1238_s1 + $0x1f] ss:$0 sm:$0xff] }
  0x29   : > { %v424_v29 = vmul.f32 %v846_v17, %v845_v20 }
  0x2a   : > { %v324_v40 = vadd.f32 %v322_v27, %v313_v33  ;;  %v325_v43 = vadd.f32 %v323_v30, %v314_v36  ;;  %v848_v27 = vld [vmem:[%s986_s21 + $0x22] sm:$0x3]  ;;  %v850_v30 = vld [vmem:[%s986_s21 + $0x1b] sm:$0x3]  ;;  %v434_v33 = vmul.f32 %v849_v24, %v847_v23  ;;  %v876_v23 = vld [vmem:[%s1238_s1 + $0x20] ss:$0 sm:$0xff] }
  0x2b   : > { %v435_v36 = vmul.f32 %v849_v24, %v848_v27 }
  0x2c   : > { %v336_v47 = vadd.f32 %v334_v34, %v324_v40  ;;  %v337_v50 = vadd.f32 %v335_v37, %v325_v43  ;;  %v851_v34 = vld [vmem:[%s986_s21 + $0x23] sm:$0x3]  ;;  %v853_v37 = vld [vmem:[%s986_s21 + $0x1c] sm:$0x3]  ;;  %v445_v40 = vmul.f32 %v852_v31, %v850_v30  ;;  %v879_v30 = vld [vmem:[%s1238_s1 + $0x21] ss:$0 sm:$0xff] }
  0x2d   : > { %v446_v43 = vmul.f32 %v852_v31, %v851_v34 }
  0x2e   : > { %v347_v54 = vadd.f32 %v345_v41, %v336_v47  ;;  %v348_v57 = vadd.f32 %v346_v44, %v337_v50  ;;  %v854_v41 = vld [vmem:[%s986_s21 + $0x24] sm:$0x3]  ;;  %v856_v44 = vld [vmem:[%s986_s21 + $0x1d] sm:$0x3]  ;;  %v456_v47 = vmul.f32 %v855_v38, %v853_v37  ;;  %v882_v37 = vld [vmem:[%s1238_s1 + $0x22] ss:$0 sm:$0xff] }
  0x2f   : > { %v457_v50 = vmul.f32 %v855_v38, %v854_v41 }
  0x30   : > { %v358_v61 = vadd.f32 %v356_v48, %v347_v54  ;;  %v359_v0 = vadd.f32 %v357_v51, %v348_v57  ;;  %v857_v48 = vld [vmem:[%s986_s21 + $0x25] sm:$0x3]  ;;  %v859_v51 = vld [vmem:[%s986_s21 + $0x1e] sm:$0x3]  ;;  %v467_v54 = vmul.f32 %v858_v45, %v856_v44  ;;  %v885_v44 = vld [vmem:[%s1238_s1 + $0x23] ss:$0 sm:$0xff] }
  0x31   : > { %v468_v57 = vmul.f32 %v858_v45, %v857_v48 }
  0x32   : > { %v369_v4 = vadd.f32 %v367_v55, %v358_v61  ;;  %v370_v7 = vadd.f32 %v368_v58, %v359_v0  ;;  %v860_v55 = vld [vmem:[%s986_s21 + $0x26] sm:$0x3]  ;;  %v862_v58 = vld [vmem:[%s986_s21 + $0x20] sm:$0x3]  ;;  %v478_v61 = vmul.f32 %v861_v52, %v859_v51  ;;  %v888_v51 = vld [vmem:[%s1238_s1 + $0x24] ss:$0 sm:$0xff] }
  0x33   : > { %v479_v0 = vmul.f32 %v861_v52, %v860_v55 }
  0x34   : > { %v380_v11 = vadd.f32 %v378_v62, %v369_v4  ;;  %v381_v14 = vadd.f32 %v379_v1, %v370_v7  ;;  %v863_v62 = vld [vmem:[%s986_s21 + $0x28] sm:$0x3]  ;;  %v865_v1 = vld [vmem:[%s986_s21 + $0x21] sm:$0x3]  ;;  %v490_v4 = vmul.f32 %v864_v59, %v862_v58  ;;  %v891_v58 = vld [vmem:[%s1238_s1 + $0x25] ss:$0 sm:$0xff] }
  0x35   : > { %v491_v7 = vmul.f32 %v864_v59, %v863_v62 }
  0x36   : > { %v391_v18 = vadd.f32 %v389_v5, %v380_v11  ;;  %v392_v21 = vadd.f32 %v390_v8, %v381_v14  ;;  %v866_v5 = vld [vmem:[%s986_s21 + $0x29] sm:$0x3]  ;;  %v868_v8 = vld [vmem:[%s986_s21 + $0x22] sm:$0x3]  ;;  %v501_v11 = vmul.f32 %v867_v2, %v865_v1  ;;  %v894_v1 = vld [vmem:[%s1238_s1 + $0x26] ss:$0 sm:$0xff] }
  0x37   : > { %v502_v14 = vmul.f32 %v867_v2, %v866_v5 }
  0x38   : > { %v402_v25 = vadd.f32 %v400_v12, %v391_v18  ;;  %v403_v28 = vadd.f32 %v401_v15, %v392_v21  ;;  %v869_v12 = vld [vmem:[%s986_s21 + $0x2a] sm:$0x3]  ;;  %v871_v15 = vld [vmem:[%s986_s21 + $0x23] sm:$0x3]  ;;  %v512_v18 = vmul.f32 %v870_v9, %v868_v8  ;;  %v897_v8 = vld [vmem:[%s1238_s1 + $0x27] ss:$0 sm:$0xff] }
  0x39   : > { %v513_v21 = vmul.f32 %v870_v9, %v869_v12 }
  0x3a   : > { %v414_v32 = vadd.f32 %v412_v19, %v402_v25  ;;  %v415_v35 = vadd.f32 %v413_v22, %v403_v28  ;;  %v872_v19 = vld [vmem:[%s986_s21 + $0x2b] sm:$0x3]  ;;  %v874_v22 = vld [vmem:[%s986_s21 + $0x24] sm:$0x3]  ;;  %v523_v25 = vmul.f32 %v873_v16, %v871_v15  ;;  %v900_v15 = vld [vmem:[%s1238_s1 + $0x28] ss:$0 sm:$0xff] }
  0x3b   : > { %v524_v28 = vmul.f32 %v873_v16, %v872_v19 }
  0x3c   : > { %v425_v39 = vadd.f32 %v423_v26, %v414_v32  ;;  %v426_v42 = vadd.f32 %v424_v29, %v415_v35  ;;  %v875_v26 = vld [vmem:[%s986_s21 + $0x2c] sm:$0x3]  ;;  %v877_v29 = vld [vmem:[%s986_s21 + $0x25] sm:$0x3]  ;;  %v534_v32 = vmul.f32 %v876_v23, %v874_v22  ;;  %v903_v22 = vld [vmem:[%s1238_s1 + $0x29] ss:$0 sm:$0xff] }
  0x3d   : > { %v535_v35 = vmul.f32 %v876_v23, %v875_v26 }
  0x3e   : > { %v436_v46 = vadd.f32 %v434_v33, %v425_v39  ;;  %v437_v49 = vadd.f32 %v435_v36, %v426_v42  ;;  %v878_v33 = vld [vmem:[%s986_s21 + $0x2d] sm:$0x3]  ;;  %v880_v36 = vld [vmem:[%s986_s21 + $0x26] sm:$0x3]  ;;  %v545_v39 = vmul.f32 %v879_v30, %v877_v29  ;;  %v906_v29 = vld [vmem:[%s1238_s1 + $0x2a] ss:$0 sm:$0xff] }
  0x3f   : > { %v546_v42 = vmul.f32 %v879_v30, %v878_v33 }
  0x40   : > { %v447_v53 = vadd.f32 %v445_v40, %v436_v46  ;;  %v448_v56 = vadd.f32 %v446_v43, %v437_v49  ;;  %v881_v40 = vld [vmem:[%s986_s21 + $0x2e] sm:$0x3]  ;;  %v883_v43 = vld [vmem:[%s986_s21 + $0x28] sm:$0x3]  ;;  %v556_v46 = vmul.f32 %v882_v37, %v880_v36  ;;  %v909_v36 = vld [vmem:[%s1238_s1 + $0x2b] ss:$0 sm:$0xff] }
  0x41   : > { %v557_v49 = vmul.f32 %v882_v37, %v881_v40 }
  0x42   : > { %v458_v60 = vadd.f32 %v456_v47, %v447_v53  ;;  %v459_v63 = vadd.f32 %v457_v50, %v448_v56  ;;  %v884_v47 = vld [vmem:[%s986_s21 + $0x30] sm:$0x3]  ;;  %v886_v50 = vld [vmem:[%s986_s21 + $0x29] sm:$0x3]  ;;  %v568_v53 = vmul.f32 %v885_v44, %v883_v43  ;;  %v912_v43 = vld [vmem:[%s1238_s1 + $0x2c] ss:$0 sm:$0xff] }
  0x43   : > { %v569_v56 = vmul.f32 %v885_v44, %v884_v47 }
  0x44   : > { %v469_v3 = vadd.f32 %v467_v54, %v458_v60  ;;  %v470_v6 = vadd.f32 %v468_v57, %v459_v63  ;;  %v887_v54 = vld [vmem:[%s986_s21 + $0x31] sm:$0x3]  ;;  %v889_v57 = vld [vmem:[%s986_s21 + $0x2a] sm:$0x3]  ;;  %v579_v60 = vmul.f32 %v888_v51, %v886_v50  ;;  %v915_v50 = vld [vmem:[%s1238_s1 + $0x2d] ss:$0 sm:$0xff] }
  0x45   : > { %v580_v63 = vmul.f32 %v888_v51, %v887_v54 }
  0x46   : > { %v480_v10 = vadd.f32 %v478_v61, %v469_v3  ;;  %v481_v13 = vadd.f32 %v479_v0, %v470_v6  ;;  %v890_v61 = vld [vmem:[%s986_s21 + $0x32] sm:$0x3]  ;;  %v892_v0 = vld [vmem:[%s986_s21 + $0x2b] sm:$0x3]  ;;  %v590_v3 = vmul.f32 %v891_v58, %v889_v57  ;;  %v918_v57 = vld [vmem:[%s1238_s1 + $0x2e] ss:$0 sm:$0xff] }
  0x47   : > { %v591_v6 = vmul.f32 %v891_v58, %v890_v61 }
  0x48   : > { %v492_v17 = vadd.f32 %v490_v4, %v480_v10  ;;  %v493_v20 = vadd.f32 %v491_v7, %v481_v13  ;;  %v893_v4 = vld [vmem:[%s986_s21 + $0x33] sm:$0x3]  ;;  %v895_v7 = vld [vmem:[%s986_s21 + $0x2c] sm:$0x3]  ;;  %v601_v10 = vmul.f32 %v894_v1, %v892_v0  ;;  %v921_v0 = vld [vmem:[%s1238_s1 + $0x2f] ss:$0 sm:$0xff] }
  0x49   : > { %v602_v13 = vmul.f32 %v894_v1, %v893_v4 }
  0x4a   : > { %v503_v24 = vadd.f32 %v501_v11, %v492_v17  ;;  %v504_v27 = vadd.f32 %v502_v14, %v493_v20  ;;  %v896_v11 = vld [vmem:[%s986_s21 + $0x34] sm:$0x3]  ;;  %v898_v14 = vld [vmem:[%s986_s21 + $0x2d] sm:$0x3]  ;;  %v612_v17 = vmul.f32 %v897_v8, %v895_v7  ;;  %v924_v7 = vld [vmem:[%s1238_s1 + $0x30] ss:$0 sm:$0xff] }
  0x4b   : > { %v613_v20 = vmul.f32 %v897_v8, %v896_v11 }
  0x4c   : > { %v514_v31 = vadd.f32 %v512_v18, %v503_v24  ;;  %v515_v34 = vadd.f32 %v513_v21, %v504_v27  ;;  %v899_v18 = vld [vmem:[%s986_s21 + $0x35] sm:$0x3]  ;;  %v901_v21 = vld [vmem:[%s986_s21 + $0x2e] sm:$0x3]  ;;  %v623_v24 = vmul.f32 %v900_v15, %v898_v14 }
  0x4d   : > { %v624_v27 = vmul.f32 %v900_v15, %v899_v18 }
  0x4e   : > { %v525_v38 = vadd.f32 %v523_v25, %v514_v31  ;;  %v526_v41 = vadd.f32 %v524_v28, %v515_v34  ;;  %v902_v25 = vld [vmem:[%s986_s21 + $0x36] sm:$0x3]  ;;  %v904_v28 = vld [vmem:[%s986_s21 + $0x30] sm:$0x3]  ;;  %v634_v31 = vmul.f32 %v903_v22, %v901_v21 }
  0x4f   : > { %v635_v34 = vmul.f32 %v903_v22, %v902_v25 }
  0x50   : > { %v536_v45 = vadd.f32 %v534_v32, %v525_v38  ;;  %v537_v48 = vadd.f32 %v535_v35, %v526_v41  ;;  %v905_v32 = vld [vmem:[%s986_s21 + $0x38] sm:$0x3]  ;;  %v907_v35 = vld [vmem:[%s986_s21 + $0x31] sm:$0x3]  ;;  %v646_v38 = vmul.f32 %v906_v29, %v904_v28 }
  0x51   : > { %v647_v41 = vmul.f32 %v906_v29, %v905_v32 }
  0x52   : > { %v547_v52 = vadd.f32 %v545_v39, %v536_v45  ;;  %v548_v55 = vadd.f32 %v546_v42, %v537_v48  ;;  %v908_v39 = vld [vmem:[%s986_s21 + $0x39] sm:$0x3]  ;;  %v910_v42 = vld [vmem:[%s986_s21 + $0x32] sm:$0x3]  ;;  %v657_v45 = vmul.f32 %v909_v36, %v907_v35 }
  0x53   : > { %v658_v48 = vmul.f32 %v909_v36, %v908_v39 }
  0x54   : > { %v558_v59 = vadd.f32 %v556_v46, %v547_v52  ;;  %v559_v62 = vadd.f32 %v557_v49, %v548_v55  ;;  %v911_v46 = vld [vmem:[%s986_s21 + $0x3a] sm:$0x3]  ;;  %v913_v49 = vld [vmem:[%s986_s21 + $0x33] sm:$0x3]  ;;  %v668_v52 = vmul.f32 %v912_v43, %v910_v42 }
  0x55   : > { %v669_v55 = vmul.f32 %v912_v43, %v911_v46 }
  0x56   : > { %v570_v2 = vadd.f32 %v568_v53, %v558_v59  ;;  %v571_v5 = vadd.f32 %v569_v56, %v559_v62  ;;  %v914_v53 = vld [vmem:[%s986_s21 + $0x3b] sm:$0x3]  ;;  %v916_v56 = vld [vmem:[%s986_s21 + $0x34] sm:$0x3]  ;;  %v679_v59 = vmul.f32 %v915_v50, %v913_v49 }
  0x57   : > { %v680_v62 = vmul.f32 %v915_v50, %v914_v53 }
  0x58   : > { %v581_v9 = vadd.f32 %v579_v60, %v570_v2  ;;  %v582_v12 = vadd.f32 %v580_v63, %v571_v5  ;;  %v917_v60 = vld [vmem:[%s986_s21 + $0x3c] sm:$0x3]  ;;  %v919_v63 = vld [vmem:[%s986_s21 + $0x35] sm:$0x3]  ;;  %v690_v2 = vmul.f32 %v918_v57, %v916_v56 }
  0x59   : > { %v691_v5 = vmul.f32 %v918_v57, %v917_v60 }
  0x5a   : > { %v592_v16 = vadd.f32 %v590_v3, %v581_v9  ;;  %v593_v19 = vadd.f32 %v591_v6, %v582_v12  ;;  %v920_v3 = vld [vmem:[%s986_s21 + $0x3d] sm:$0x3]  ;;  %v922_v6 = vld [vmem:[%s986_s21 + $0x36] sm:$0x3]  ;;  %v701_v9 = vmul.f32 %v921_v0, %v919_v63 }
  0x5b   : > { %v702_v12 = vmul.f32 %v921_v0, %v920_v3  ;;  %v712_v14 = vmul.f32 %v924_v7, %v922_v6 }
  0x5c   : > { %v603_v23 = vadd.f32 %v601_v10, %v592_v16  ;;  %v604_v26 = vadd.f32 %v602_v13, %v593_v19  ;;  %v923_v10 = vld [vmem:[%s986_s21 + $0x3e] sm:$0x3]  ;;  %v925_v19 = vld [vmem:[%s1239_s2] ss:$0 sm:$0xff] }
  0x5d   : > { %v713_v16 = vmul.f32 %v924_v7, %v923_v10 }
  0x5e   : > { %v614_v30 = vadd.f32 %v612_v17, %v603_v23  ;;  %v615_v33 = vadd.f32 %v613_v20, %v604_v26 }
  0x60   : > { %v625_v37 = vadd.f32 %v623_v24, %v614_v30  ;;  %v626_v40 = vadd.f32 %v624_v27, %v615_v33 }
  0x62   : > { %v636_v44 = vadd.f32 %v634_v31, %v625_v37  ;;  %v637_v47 = vadd.f32 %v635_v34, %v626_v40 }
  0x64   : > { %v648_v51 = vadd.f32 %v646_v38, %v636_v44  ;;  %v649_v54 = vadd.f32 %v647_v41, %v637_v47 }
  0x66   : > { %v659_v58 = vadd.f32 %v657_v45, %v648_v51  ;;  %v660_v61 = vadd.f32 %v658_v48, %v649_v54 }
  0x68   : > { %v670_v1 = vadd.f32 %v668_v52, %v659_v58  ;;  %v671_v4 = vadd.f32 %v669_v55, %v660_v61 }
  0x6a   : > { %v681_v8 = vadd.f32 %v679_v59, %v670_v1  ;;  %v682_v11 = vadd.f32 %v680_v62, %v671_v4 }
  0x6c   : > { %v692_v13 = vadd.f32 %v690_v2, %v681_v8  ;;  %v693_v15 = vadd.f32 %v691_v5, %v682_v11 }
  0x6e   : > { %v703_v17 = vadd.f32 %v701_v9, %v692_v13  ;;  %v704_v18 = vadd.f32 %v702_v12, %v693_v15 }
  0x70   : > { %v714_v20 = vadd.f32 %v712_v14, %v703_v17  ;;  %v715_v21 = vadd.f32 %v713_v16, %v704_v18 }
  0x72   : > { %v723_v22 = vadd.f32 %v925_v19, %v714_v20  ;;  %v724_v23 = vadd.f32 %v925_v19, %v715_v21 }
  0x74   : > { %726 = vst.msk [vmem:[%s170_s25] sm:$0x3] %vm725_vm0, %v723_v22  ;;  %727 = vst.msk [vmem:[%s170_s25 + $0x2] sm:$0x3] %vm725_vm0, %v724_v23 }
  0x75 PF: > { %s13_s12 = sadd.s32 1, %s944_s12  }
  0x76   : > { %p10_p4 = scmp.ge.s32.totalorder %s13_s12, 4  }
  0x78   :  { %12 = sbr.rel (!%p10_p4) target bundleno = 1 (0x1), region = 68 }

</bundles_post_ra>
